<compile_context>
chip_gen: v7x
topology: tpu7x:2x2x1
jax: 0.10.0
libtpu: 0.0.40
codegen_flags: <defaults>
</compile_context>

<pallas_src>
import numpy as np
import jax
import jax.numpy as jnp
from jax import lax
from jax.experimental import pallas as pl
from jax.experimental.pallas import tpu as pltpu


# ---------------------------------------------------------------------------
# Fused kernel: cv1 -> (upsample x2 fused into) cv2 -> cv3, one batch image
# per grid step.
# ---------------------------------------------------------------------------
def make_proto_kernel(H, W, C1, Cm):
    HW = H * W

    def kernel(x_ref, w1_ref, b1_ref, w2_ref, b2_ref, w3_ref, b3_ref,
               o_ref, xpad_ref, ypad_ref):
        # ---- cv1: 3x3 conv (pad 1) + folded BN + SiLU ----------------------
        # Zero only the 1-px halo border; interior is overwritten right after.
        zrow1 = jnp.zeros((1, W + 2, C1), jnp.bfloat16)
        zcol1 = jnp.zeros((H + 2, 1, C1), jnp.bfloat16)
        xpad_ref[0:1, :, :] = zrow1
        xpad_ref[H + 1:H + 2, :, :] = zrow1
        xpad_ref[:, 0:1, :] = zcol1
        xpad_ref[:, W + 1:W + 2, :] = zcol1
        # f32 -> bf16 cast happens here (no wrapper-side astype / HBM copy).
        xpad_ref[1:H + 1, 1:W + 1, :] = x_ref[0].astype(jnp.bfloat16)

        # im2col (K = 9*C1) — only worthwhile because C1 is tiny.
        cols = [xpad_ref[u:u + H, v:v + W, :]
                for u in range(3) for v in range(3)]
        col1 = jnp.concatenate(cols, axis=-1).reshape(HW, 9 * C1)   # bf16
        a1 = jnp.dot(col1, w1_ref[...],
                     preferred_element_type=jnp.float32) + b1_ref[...]
        y1 = a1 * jax.nn.sigmoid(a1)                # SiLU, f32, (HW, Cm)

        # ---- x2 nearest upsample + cv2: polyphase 3x3 conv -----------------
        # The upsampled tensor is never built; the 4 phases are extra output
        # columns.  9 accumulating K=Cm dots (no im2col concat / 9x buffer).
        zrow2 = jnp.zeros((1, W + 2, Cm), jnp.bfloat16)
        zcol2 = jnp.zeros((H + 2, 1, Cm), jnp.bfloat16)
        ypad_ref[0:1, :, :] = zrow2
        ypad_ref[H + 1:H + 2, :, :] = zrow2
        ypad_ref[:, 0:1, :] = zcol2
        ypad_ref[:, W + 1:W + 2, :] = zcol2
        ypad_ref[1:H + 1, 1:W + 1, :] = (
            y1.reshape(H, W, Cm).astype(jnp.bfloat16))

        acc2 = jnp.zeros((HW, 4 * Cm), jnp.float32)
        tap = 0
        for u in range(3):
            for v in range(3):
                win = ypad_ref[u:u + H, v:v + W, :].reshape(HW, Cm)  # bf16
                acc2 = acc2 + jnp.dot(win, w2_ref[tap],
                                      preferred_element_type=jnp.float32)
                tap += 1
        a2 = acc2 + b2_ref[...]
        y2 = a2 * jax.nn.sigmoid(a2)                # (HW, 4*Cm), phase-stacked

        # ---- cv3: 1x1 conv, block-diagonal over the 4 phases ---------------
        a3 = jnp.dot(y2.astype(jnp.bfloat16), w3_ref[...],
                     preferred_element_type=jnp.float32) + b3_ref[...]
        y3 = a3 * jax.nn.sigmoid(a3)                # (HW, 4*C2pp) = 128 lanes
        o_ref[0] = y3.astype(o_ref.dtype)           # bf16, lane-dense store

    return kernel


def proto_forward_pallas(x_nhwc, kp):
    """x_nhwc: (N, H, W, C1) f32.  Returns (N, 2H, 2W, C2) f32 (NHWC)."""
    N, H, W, C1 = x_nhwc.shape
    Cm, C2, C2pp = kp["cm"], kp["c2"], kp["c2pp"]
    kernel = make_proto_kernel(H, W, C1, Cm)

    out = pl.pallas_call(
        kernel,
        out_shape=jax.ShapeDtypeStruct((N, H * W, 4 * C2pp), jnp.bfloat16),
        grid=(N,),
        in_specs=[
            pl.BlockSpec((1, H, W, C1), lambda n: (n, 0, 0, 0)),
            pl.BlockSpec((9 * C1, Cm), lambda n: (0, 0)),
            pl.BlockSpec((1, Cm), lambda n: (0, 0)),
            pl.BlockSpec((9, Cm, 4 * Cm), lambda n: (0, 0, 0)),
            pl.BlockSpec((1, 4 * Cm), lambda n: (0, 0)),
            pl.BlockSpec((4 * Cm, 4 * C2pp), lambda n: (0, 0)),
            pl.BlockSpec((1, 4 * C2pp), lambda n: (0, 0)),
        ],
        out_specs=pl.BlockSpec((1, H * W, 4 * C2pp), lambda n: (n, 0, 0)),
        scratch_shapes=[
            pltpu.VMEM((H + 2, W + 2, C1), jnp.bfloat16),   # padded input
            pltpu.VMEM((H + 2, W + 2, Cm), jnp.bfloat16),   # padded y1
        ],
        compiler_params=pltpu.CompilerParams(
            dimension_semantics=("parallel",),
            vmem_limit_bytes=64 * 1024 * 1024),
    )(x_nhwc, kp["w1"], kp["b1"], kp["w2"], kp["b2"], kp["w3"], kp["b3"])

    # phase-stacked bf16 (N, H*W, 4*C2pp) -> NHWC f32 (N, 2H, 2W, C2).
    # (cheap XLA glue on the smallest possible kernel output; cast back to
    #  f32 here so external semantics match the PyTorch module)
    out = out.reshape(N, H, W, 2, 2, C2pp)[..., :C2].astype(jnp.float32)
    out = jnp.transpose(out, (0, 1, 3, 2, 4, 5)).reshape(N, 2 * H, 2 * W, C2)
    return out


# ---------------------------------------------------------------------------
# Parameter construction: Conv2d (OIHW, no bias) + eval-mode BatchNorm folding
# ---------------------------------------------------------------------------
def init_conv_bn(key, cin, cout, k):
    kw_key, g_key, b_key, m_key, v_key = jax.random.split(key, 5)
    fan_in = cin * k * k
    w = jax.random.normal(kw_key, (cout, cin, k, k), jnp.float32) / np.sqrt(fan_in)
    gamma = 1.0 + 0.1 * jax.random.normal(g_key, (cout,), jnp.float32)
    beta = 0.05 * jax.random.normal(b_key, (cout,), jnp.float32)
    mean = 0.1 * jax.random.normal(m_key, (cout,), jnp.float32)
    var = 0.5 + 0.5 * jax.nn.softplus(jax.random.normal(v_key, (cout,), jnp.float32))
    eps = 1e-5
    scale = gamma / jnp.sqrt(var + eps)
    return dict(w_oihw=w * scale[:, None, None, None],    # BN folded into conv
                b=beta - mean * scale, k=k)


_PHASE_OFF = (0, 1, 1, 2)   # o(e): padded-y1 offset hit by upsampled offset e


def prepare_proto_params(p1, p2, p3):
    """Build bf16 kernel weight operands (host-side, numpy)."""
    w1 = np.asarray(p1["w_oihw"], np.float32)            # (Cm, C1, 3, 3)
    w2 = np.asarray(p2["w_oihw"], np.float32)            # (Cm, Cm, 3, 3)
    w3 = np.asarray(p3["w_oihw"], np.float32)            # (C2, Cm, 1, 1)
    b1 = np.asarray(p1["b"], np.float32)
    b2 = np.asarray(p2["b"], np.float32)
    b3 = np.asarray(p3["b"], np.float32)
    Cm, C1 = w1.shape[0], w1.shape[1]
    C2 = w3.shape[0]

    # cv1: plain im2col weight (9*C1, Cm), rows ordered (kh, kw, ci).
    w1_mat = np.transpose(w1, (2, 3, 1, 0)).reshape(9 * C1, Cm)

    # cv2: polyphase weights fusing the x2 nearest upsample, one (Cm, 4*Cm)
    # matrix per padded-y1 tap (u, v); tap index t = u*3 + v.
    w2_hwio = np.transpose(w2, (2, 3, 1, 0))              # (3,3,Cm,Cm)
    w2_eff = np.zeros((2, 2, 3, 3, Cm, Cm), np.float32)   # [a,b,u,v,ci,co]
    for a in range(2):
        for b in range(2):
            for kh in range(3):
                for kw in range(3):
                    w2_eff[a, b, _PHASE_OFF[a + kh], _PHASE_OFF[b + kw]] += \
                        w2_hwio[kh, kw]
    w2_taps = np.transpose(w2_eff, (2, 3, 4, 0, 1, 5)).reshape(9, Cm, 4 * Cm)
    b2_mat = np.tile(b2, 4)

    # cv3: 1x1 conv as a block-diagonal matmul over the 4 phases; per-phase
    # output channels zero-padded so the store is exactly 128 lanes wide.
    c2pp = max(C2, ((4 * C2 + 127) // 128) * 128 // 4)
    w3_2d = w3[:, :, 0, 0].T                              # (Cm, C2)
    w3_mat = np.zeros((4 * Cm, 4 * c2pp), np.float32)
    b3_mat = np.zeros((4 * c2pp,), np.float32)
    for p in range(4):
        w3_mat[p * Cm:(p + 1) * Cm, p * c2pp:p * c2pp + C2] = w3_2d
        b3_mat[p * c2pp:p * c2pp + C2] = b3

    return dict(
        cm=Cm, c2=C2, c2pp=c2pp,
        w1=jnp.asarray(w1_mat, jnp.bfloat16),
        b1=jnp.asarray(b1, jnp.float32).reshape(1, Cm),
        w2=jnp.asarray(w2_taps, jnp.bfloat16),
        b2=jnp.asarray(b2_mat, jnp.float32).reshape(1, 4 * Cm),
        w3=jnp.asarray(w3_mat, jnp.bfloat16),
        b3=jnp.asarray(b3_mat, jnp.float32).reshape(1, 4 * c2pp),
    )


# ---------------------------------------------------------------------------
# Pure-JAX reference (same bf16 operand precision, f32 accumulation)
# ---------------------------------------------------------------------------
def _ref_conv_bn_silu(x, p, pad):
    w = jnp.transpose(p["w_oihw"], (2, 3, 1, 0)).astype(jnp.bfloat16)
    y = lax.conv_general_dilated(
        x.astype(jnp.bfloat16), w, window_strides=(1, 1),
        padding=[(pad, pad), (pad, pad)],
        dimension_numbers=("NHWC", "HWIO", "NHWC"),
        preferred_element_type=jnp.float32)
    y = y + p["b"]
    return y * jax.nn.sigmoid(y)


def proto_forward_ref(x_nhwc, p1, p2, p3):
    y1 = _ref_conv_bn_silu(x_nhwc, p1, 1)
    y1u = jnp.repeat(jnp.repeat(y1, 2, axis=1), 2, axis=2)
    y2 = _ref_conv_bn_silu(y1u, p2, 1)
    return _ref_conv_bn_silu(y2, p3, 0)


# ---------------------------------------------------------------------------
if __name__ == "__main__":
    # Proto(c1=8, c_=32, c2=16), input NHWC (N=2, H=8, W=8, C1=8)
    N, C1, Cm, C2, H, W = 2, 8, 32, 16, 8, 8

    root = jax.random.PRNGKey(0)
    kx, k1, k2, k3 = jax.random.split(root, 4)
    x = jax.random.normal(kx, (N, H, W, C1), jnp.float32)      # NHWC input

    p1 = init_conv_bn(k1, C1, Cm, 3)     # cv1: Conv(c1, c_, k=3)
    p2 = init_conv_bn(k2, Cm, Cm, 3)     # cv2: Conv(c_, c_, k=3)
    p3 = init_conv_bn(k3, Cm, C2, 1)     # cv3: Conv(c_, c2, k=1)
    kp = prepare_proto_params(p1, p2, p3)

    out = jax.block_until_ready(proto_forward_pallas(x, kp))
    ref = jax.block_until_ready(proto_forward_ref(x, p1, p2, p3))

    assert out.shape == (N, 2 * H, 2 * W, C2)
    # bf16 matmul operands, bf16 rounding of the polyphase weight sums, and a
    # bf16 kernel output vs. the bf16 lax.conv reference -> a few 1e-2 slack;
    # structural errors (wrong padding / phase / indexing) would be O(1).
    np.testing.assert_allclose(np.asarray(out), np.asarray(ref),
                               rtol=4e-2, atol=4e-2)
    print("KERNEL_OK")
</pallas_src>

<mosaic_0001>
module attributes {stable_mosaic.version = 11 : i64} {
  func.func @kernel(%arg0: i32, %arg1: memref<1x8x8x8xf32, #tpu.memory_space<vmem>>, %arg2: memref<72x32xbf16, #tpu.memory_space<vmem>>, %arg3: memref<1x32xf32, #tpu.memory_space<vmem>>, %arg4: memref<9x32x128xbf16, #tpu.memory_space<vmem>>, %arg5: memref<1x128xf32, #tpu.memory_space<vmem>>, %arg6: memref<128x128xbf16, #tpu.memory_space<vmem>>, %arg7: memref<1x128xf32, #tpu.memory_space<vmem>>, %arg8: memref<1x64x128xbf16, #tpu.memory_space<vmem>>, %arg9: memref<10x10x8xbf16, #tpu.memory_space<vmem>>, %arg10: memref<10x10x32xbf16, #tpu.memory_space<vmem>>) attributes {dimension_semantics = [#tpu.dimension_semantics<parallel>], iteration_bounds = array<i64: 2>, scalar_prefetch = 0 : i64, scratch_operands = 2 : i64, tpu.core_type = #tpu.core_type<tc>, window_params = [{transform_indices = @transform_0, window_bounds = array<i64: 1, 8, 8, 8>}, {pipeline_mode = #tpu.pipeline_mode<synchronous>, transform_indices = @transform_1, window_bounds = array<i64: 72, 32>}, {pipeline_mode = #tpu.pipeline_mode<synchronous>, transform_indices = @transform_2, window_bounds = array<i64: 1, 32>}, {pipeline_mode = #tpu.pipeline_mode<synchronous>, transform_indices = @transform_3, window_bounds = array<i64: 9, 32, 128>}, {pipeline_mode = #tpu.pipeline_mode<synchronous>, transform_indices = @transform_4, window_bounds = array<i64: 1, 128>}, {pipeline_mode = #tpu.pipeline_mode<synchronous>, transform_indices = @transform_5, window_bounds = array<i64: 128, 128>}, {pipeline_mode = #tpu.pipeline_mode<synchronous>, transform_indices = @transform_6, window_bounds = array<i64: 1, 128>}, {transform_indices = @transform_7, window_bounds = array<i64: 1, 64, 128>}]} {
    %cst = arith.constant 0.000000e+00 : bf16
    %0 = vector.broadcast %cst : bf16 to vector<1x10x8xbf16>
    %cst_0 = arith.constant 0.000000e+00 : bf16
    %1 = vector.broadcast %cst_0 : bf16 to vector<10x1x8xbf16>
    %c0 = arith.constant 0 : index
    %c0_1 = arith.constant 0 : index
    %c0_2 = arith.constant 0 : index
    %2 = vector.load %arg9[%c0, %c0_1, %c0_2] : memref<10x10x8xbf16, #tpu.memory_space<vmem>>, vector<1x10x8xbf16>
    tpu.vector_store %arg9[%c0, %c0_1, %c0_2], %0 {strides = array<i32>} : memref<10x10x8xbf16, #tpu.memory_space<vmem>>, vector<1x10x8xbf16>,
    %c9 = arith.constant 9 : index
    %c0_3 = arith.constant 0 : index
    %c0_4 = arith.constant 0 : index
    %3 = vector.load %arg9[%c9, %c0_3, %c0_4] : memref<10x10x8xbf16, #tpu.memory_space<vmem>>, vector<1x10x8xbf16>
    tpu.vector_store %arg9[%c9, %c0_3, %c0_4], %0 {strides = array<i32>} : memref<10x10x8xbf16, #tpu.memory_space<vmem>>, vector<1x10x8xbf16>,
    %c0_5 = arith.constant 0 : index
    %c0_6 = arith.constant 0 : index
    %c0_7 = arith.constant 0 : index
    %4 = vector.load %arg9[%c0_5, %c0_6, %c0_7] : memref<10x10x8xbf16, #tpu.memory_space<vmem>>, vector<10x1x8xbf16>
    tpu.vector_store %arg9[%c0_5, %c0_6, %c0_7], %1 {strides = array<i32>} : memref<10x10x8xbf16, #tpu.memory_space<vmem>>, vector<10x1x8xbf16>,
    %c0_8 = arith.constant 0 : index
    %c9_9 = arith.constant 9 : index
    %c0_10 = arith.constant 0 : index
    %5 = vector.load %arg9[%c0_8, %c9_9, %c0_10] : memref<10x10x8xbf16, #tpu.memory_space<vmem>>, vector<10x1x8xbf16>
    tpu.vector_store %arg9[%c0_8, %c9_9, %c0_10], %1 {strides = array<i32>} : memref<10x10x8xbf16, #tpu.memory_space<vmem>>, vector<10x1x8xbf16>,
    %c0_11 = arith.constant 0 : index
    %c0_12 = arith.constant 0 : index
    %c0_13 = arith.constant 0 : index
    %c0_14 = arith.constant 0 : index
    %6 = vector.load %arg1[%c0_11, %c0_12, %c0_13, %c0_14] : memref<1x8x8x8xf32, #tpu.memory_space<vmem>>, vector<1x8x8x8xf32>
    %7 = vector.shape_cast %6 : vector<1x8x8x8xf32> to vector<8x8x8xf32>
    %8 = arith.truncf %7 : vector<8x8x8xf32> to vector<8x8x8xbf16>
    %c1 = arith.constant 1 : index
    %c1_15 = arith.constant 1 : index
    %c0_16 = arith.constant 0 : index
    %9 = vector.load %arg9[%c1, %c1_15, %c0_16] : memref<10x10x8xbf16, #tpu.memory_space<vmem>>, vector<8x8x8xbf16>
    tpu.vector_store %arg9[%c1, %c1_15, %c0_16], %8 {strides = array<i32>} : memref<10x10x8xbf16, #tpu.memory_space<vmem>>, vector<8x8x8xbf16>,
    %c0_17 = arith.constant 0 : index
    %c0_18 = arith.constant 0 : index
    %c0_19 = arith.constant 0 : index
    %10 = vector.load %arg9[%c0_17, %c0_18, %c0_19] : memref<10x10x8xbf16, #tpu.memory_space<vmem>>, vector<8x8x8xbf16>
    %c0_20 = arith.constant 0 : index
    %c1_21 = arith.constant 1 : index
    %c0_22 = arith.constant 0 : index
    %11 = vector.load %arg9[%c0_20, %c1_21, %c0_22] : memref<10x10x8xbf16, #tpu.memory_space<vmem>>, vector<8x8x8xbf16>
    %c0_23 = arith.constant 0 : index
    %c2 = arith.constant 2 : index
    %c0_24 = arith.constant 0 : index
    %12 = vector.load %arg9[%c0_23, %c2, %c0_24] : memref<10x10x8xbf16, #tpu.memory_space<vmem>>, vector<8x8x8xbf16>
    %c1_25 = arith.constant 1 : index
    %c0_26 = arith.constant 0 : index
    %c0_27 = arith.constant 0 : index
    %13 = vector.load %arg9[%c1_25, %c0_26, %c0_27] : memref<10x10x8xbf16, #tpu.memory_space<vmem>>, vector<8x8x8xbf16>
    %c1_28 = arith.constant 1 : index
    %c1_29 = arith.constant 1 : index
    %c0_30 = arith.constant 0 : index
    %14 = vector.load %arg9[%c1_28, %c1_29, %c0_30] : memref<10x10x8xbf16, #tpu.memory_space<vmem>>, vector<8x8x8xbf16>
    %c1_31 = arith.constant 1 : index
    %c2_32 = arith.constant 2 : index
    %c0_33 = arith.constant 0 : index
    %15 = vector.load %arg9[%c1_31, %c2_32, %c0_33] : memref<10x10x8xbf16, #tpu.memory_space<vmem>>, vector<8x8x8xbf16>
    %c2_34 = arith.constant 2 : index
    %c0_35 = arith.constant 0 : index
    %c0_36 = arith.constant 0 : index
    %16 = vector.load %arg9[%c2_34, %c0_35, %c0_36] : memref<10x10x8xbf16, #tpu.memory_space<vmem>>, vector<8x8x8xbf16>
    %c2_37 = arith.constant 2 : index
    %c1_38 = arith.constant 1 : index
    %c0_39 = arith.constant 0 : index
    %17 = vector.load %arg9[%c2_37, %c1_38, %c0_39] : memref<10x10x8xbf16, #tpu.memory_space<vmem>>, vector<8x8x8xbf16>
    %c2_40 = arith.constant 2 : index
    %c2_41 = arith.constant 2 : index
    %c0_42 = arith.constant 0 : index
    %18 = vector.load %arg9[%c2_40, %c2_41, %c0_42] : memref<10x10x8xbf16, #tpu.memory_space<vmem>>, vector<8x8x8xbf16>
    %19 = tpu.concatenate %10, %11, %12, %13, %14, %15, %16, %17, %18 in 2 : vector<8x8x8xbf16>, vector<8x8x8xbf16>, vector<8x8x8xbf16>, vector<8x8x8xbf16>, vector<8x8x8xbf16>, vector<8x8x8xbf16>, vector<8x8x8xbf16>, vector<8x8x8xbf16>, vector<8x8x8xbf16> -> vector<8x8x72xbf16>
    %20 = vector.shape_cast %19 : vector<8x8x72xbf16> to vector<64x72xbf16>
    %c0_43 = arith.constant 0 : index
    %c0_44 = arith.constant 0 : index
    %21 = vector.load %arg2[%c0_43, %c0_44] : memref<72x32xbf16, #tpu.memory_space<vmem>>, vector<72x32xbf16>
    %cst_45 = arith.constant dense<0.000000e+00> : vector<64x32xf32>
    %22 = tpu.matmul %20, %21, %cst_45 {dimension_numbers = #tpu.dot_dimension_numbers<[1], [0], [0], [1], [0, 0, 1, 1], [], []>} : vector<64x72xbf16>, vector<72x32xbf16>, vector<64x32xf32> -> vector<64x32xf32>
    %c0_46 = arith.constant 0 : index
    %c0_47 = arith.constant 0 : index
    %23 = vector.load %arg3[%c0_46, %c0_47] : memref<1x32xf32, #tpu.memory_space<vmem>>, vector<1x32xf32>
    %24 = vector.broadcast %23 : vector<1x32xf32> to vector<64x32xf32>
    %25 = arith.addf %22, %24 : vector<64x32xf32>
    %26 = arith.negf %25 : vector<64x32xf32>
    %27 = math.exp %26 : vector<64x32xf32>
    %cst_48 = arith.constant 1.000000e+00 : f32
    %28 = vector.broadcast %cst_48 : f32 to vector<64x32xf32>
    %29 = arith.addf %28, %27 : vector<64x32xf32>
    %30 = arith.divf %28, %29 : vector<64x32xf32>
    %31 = arith.mulf %25, %30 : vector<64x32xf32>
    %cst_49 = arith.constant 0.000000e+00 : bf16
    %32 = vector.broadcast %cst_49 : bf16 to vector<1x10x32xbf16>
    %cst_50 = arith.constant 0.000000e+00 : bf16
    %33 = vector.broadcast %cst_50 : bf16 to vector<10x1x32xbf16>
    %c0_51 = arith.constant 0 : index
    %c0_52 = arith.constant 0 : index
    %c0_53 = arith.constant 0 : index
    %34 = vector.load %arg10[%c0_51, %c0_52, %c0_53] : memref<10x10x32xbf16, #tpu.memory_space<vmem>>, vector<1x10x32xbf16>
    tpu.vector_store %arg10[%c0_51, %c0_52, %c0_53], %32 {strides = array<i32>} : memref<10x10x32xbf16, #tpu.memory_space<vmem>>, vector<1x10x32xbf16>,
    %c9_54 = arith.constant 9 : index
    %c0_55 = arith.constant 0 : index
    %c0_56 = arith.constant 0 : index
    %35 = vector.load %arg10[%c9_54, %c0_55, %c0_56] : memref<10x10x32xbf16, #tpu.memory_space<vmem>>, vector<1x10x32xbf16>
    tpu.vector_store %arg10[%c9_54, %c0_55, %c0_56], %32 {strides = array<i32>} : memref<10x10x32xbf16, #tpu.memory_space<vmem>>, vector<1x10x32xbf16>,
    %c0_57 = arith.constant 0 : index
    %c0_58 = arith.constant 0 : index
    %c0_59 = arith.constant 0 : index
    %36 = vector.load %arg10[%c0_57, %c0_58, %c0_59] : memref<10x10x32xbf16, #tpu.memory_space<vmem>>, vector<10x1x32xbf16>
    tpu.vector_store %arg10[%c0_57, %c0_58, %c0_59], %33 {strides = array<i32>} : memref<10x10x32xbf16, #tpu.memory_space<vmem>>, vector<10x1x32xbf16>,
    %c0_60 = arith.constant 0 : index
    %c9_61 = arith.constant 9 : index
    %c0_62 = arith.constant 0 : index
    %37 = vector.load %arg10[%c0_60, %c9_61, %c0_62] : memref<10x10x32xbf16, #tpu.memory_space<vmem>>, vector<10x1x32xbf16>
    tpu.vector_store %arg10[%c0_60, %c9_61, %c0_62], %33 {strides = array<i32>} : memref<10x10x32xbf16, #tpu.memory_space<vmem>>, vector<10x1x32xbf16>,
    %38 = vector.shape_cast %31 : vector<64x32xf32> to vector<8x8x32xf32>
    %39 = arith.truncf %38 : vector<8x8x32xf32> to vector<8x8x32xbf16>
    %c1_63 = arith.constant 1 : index
    %c1_64 = arith.constant 1 : index
    %c0_65 = arith.constant 0 : index
    %40 = vector.load %arg10[%c1_63, %c1_64, %c0_65] : memref<10x10x32xbf16, #tpu.memory_space<vmem>>, vector<8x8x32xbf16>
    tpu.vector_store %arg10[%c1_63, %c1_64, %c0_65], %39 {strides = array<i32>} : memref<10x10x32xbf16, #tpu.memory_space<vmem>>, vector<8x8x32xbf16>,
    %cst_66 = arith.constant 0.000000e+00 : f32
    %41 = vector.broadcast %cst_66 : f32 to vector<64x128xf32>
    %c0_67 = arith.constant 0 : index
    %c0_68 = arith.constant 0 : index
    %c0_69 = arith.constant 0 : index
    %42 = vector.load %arg10[%c0_67, %c0_68, %c0_69] : memref<10x10x32xbf16, #tpu.memory_space<vmem>>, vector<8x8x32xbf16>
    %43 = vector.shape_cast %42 : vector<8x8x32xbf16> to vector<64x32xbf16>
    %c0_70 = arith.constant 0 : index
    %c0_71 = arith.constant 0 : index
    %c0_72 = arith.constant 0 : index
    %44 = vector.load %arg4[%c0_70, %c0_71, %c0_72] : memref<9x32x128xbf16, #tpu.memory_space<vmem>>, vector<1x32x128xbf16>
    %45 = vector.shape_cast %44 : vector<1x32x128xbf16> to vector<32x128xbf16>
    %cst_73 = arith.constant dense<0.000000e+00> : vector<64x128xf32>
    %46 = tpu.matmul %43, %45, %cst_73 {dimension_numbers = #tpu.dot_dimension_numbers<[1], [0], [0], [1], [0, 0, 1, 1], [], []>} : vector<64x32xbf16>, vector<32x128xbf16>, vector<64x128xf32> -> vector<64x128xf32>
    %47 = arith.addf %41, %46 : vector<64x128xf32>
    %c0_74 = arith.constant 0 : index
    %c1_75 = arith.constant 1 : index
    %c0_76 = arith.constant 0 : index
    %48 = vector.load %arg10[%c0_74, %c1_75, %c0_76] : memref<10x10x32xbf16, #tpu.memory_space<vmem>>, vector<8x8x32xbf16>
    %49 = vector.shape_cast %48 : vector<8x8x32xbf16> to vector<64x32xbf16>
    %c1_77 = arith.constant 1 : index
    %c0_78 = arith.constant 0 : index
    %c0_79 = arith.constant 0 : index
    %50 = vector.load %arg4[%c1_77, %c0_78, %c0_79] : memref<9x32x128xbf16, #tpu.memory_space<vmem>>, vector<1x32x128xbf16>
    %51 = vector.shape_cast %50 : vector<1x32x128xbf16> to vector<32x128xbf16>
    %cst_80 = arith.constant dense<0.000000e+00> : vector<64x128xf32>
    %52 = tpu.matmul %49, %51, %cst_80 {dimension_numbers = #tpu.dot_dimension_numbers<[1], [0], [0], [1], [0, 0, 1, 1], [], []>} : vector<64x32xbf16>, vector<32x128xbf16>, vector<64x128xf32> -> vector<64x128xf32>
    %53 = arith.addf %47, %52 : vector<64x128xf32>
    %c0_81 = arith.constant 0 : index
    %c2_82 = arith.constant 2 : index
    %c0_83 = arith.constant 0 : index
    %54 = vector.load %arg10[%c0_81, %c2_82, %c0_83] : memref<10x10x32xbf16, #tpu.memory_space<vmem>>, vector<8x8x32xbf16>
    %55 = vector.shape_cast %54 : vector<8x8x32xbf16> to vector<64x32xbf16>
    %c2_84 = arith.constant 2 : index
    %c0_85 = arith.constant 0 : index
    %c0_86 = arith.constant 0 : index
    %56 = vector.load %arg4[%c2_84, %c0_85, %c0_86] : memref<9x32x128xbf16, #tpu.memory_space<vmem>>, vector<1x32x128xbf16>
    %57 = vector.shape_cast %56 : vector<1x32x128xbf16> to vector<32x128xbf16>
    %cst_87 = arith.constant dense<0.000000e+00> : vector<64x128xf32>
    %58 = tpu.matmul %55, %57, %cst_87 {dimension_numbers = #tpu.dot_dimension_numbers<[1], [0], [0], [1], [0, 0, 1, 1], [], []>} : vector<64x32xbf16>, vector<32x128xbf16>, vector<64x128xf32> -> vector<64x128xf32>
    %59 = arith.addf %53, %58 : vector<64x128xf32>
    %c1_88 = arith.constant 1 : index
    %c0_89 = arith.constant 0 : index
    %c0_90 = arith.constant 0 : index
    %60 = vector.load %arg10[%c1_88, %c0_89, %c0_90] : memref<10x10x32xbf16, #tpu.memory_space<vmem>>, vector<8x8x32xbf16>
    %61 = vector.shape_cast %60 : vector<8x8x32xbf16> to vector<64x32xbf16>
    %c3 = arith.constant 3 : index
    %c0_91 = arith.constant 0 : index
    %c0_92 = arith.constant 0 : index
    %62 = vector.load %arg4[%c3, %c0_91, %c0_92] : memref<9x32x128xbf16, #tpu.memory_space<vmem>>, vector<1x32x128xbf16>
    %63 = vector.shape_cast %62 : vector<1x32x128xbf16> to vector<32x128xbf16>
    %cst_93 = arith.constant dense<0.000000e+00> : vector<64x128xf32>
    %64 = tpu.matmul %61, %63, %cst_93 {dimension_numbers = #tpu.dot_dimension_numbers<[1], [0], [0], [1], [0, 0, 1, 1], [], []>} : vector<64x32xbf16>, vector<32x128xbf16>, vector<64x128xf32> -> vector<64x128xf32>
    %65 = arith.addf %59, %64 : vector<64x128xf32>
    %c1_94 = arith.constant 1 : index
    %c1_95 = arith.constant 1 : index
    %c0_96 = arith.constant 0 : index
    %66 = vector.load %arg10[%c1_94, %c1_95, %c0_96] : memref<10x10x32xbf16, #tpu.memory_space<vmem>>, vector<8x8x32xbf16>
    %67 = vector.shape_cast %66 : vector<8x8x32xbf16> to vector<64x32xbf16>
    %c4 = arith.constant 4 : index
    %c0_97 = arith.constant 0 : index
    %c0_98 = arith.constant 0 : index
    %68 = vector.load %arg4[%c4, %c0_97, %c0_98] : memref<9x32x128xbf16, #tpu.memory_space<vmem>>, vector<1x32x128xbf16>
    %69 = vector.shape_cast %68 : vector<1x32x128xbf16> to vector<32x128xbf16>
    %cst_99 = arith.constant dense<0.000000e+00> : vector<64x128xf32>
    %70 = tpu.matmul %67, %69, %cst_99 {dimension_numbers = #tpu.dot_dimension_numbers<[1], [0], [0], [1], [0, 0, 1, 1], [], []>} : vector<64x32xbf16>, vector<32x128xbf16>, vector<64x128xf32> -> vector<64x128xf32>
    %71 = arith.addf %65, %70 : vector<64x128xf32>
    %c1_100 = arith.constant 1 : index
    %c2_101 = arith.constant 2 : index
    %c0_102 = arith.constant 0 : index
    %72 = vector.load %arg10[%c1_100, %c2_101, %c0_102] : memref<10x10x32xbf16, #tpu.memory_space<vmem>>, vector<8x8x32xbf16>
    %73 = vector.shape_cast %72 : vector<8x8x32xbf16> to vector<64x32xbf16>
    %c5 = arith.constant 5 : index
    %c0_103 = arith.constant 0 : index
    %c0_104 = arith.constant 0 : index
    %74 = vector.load %arg4[%c5, %c0_103, %c0_104] : memref<9x32x128xbf16, #tpu.memory_space<vmem>>, vector<1x32x128xbf16>
    %75 = vector.shape_cast %74 : vector<1x32x128xbf16> to vector<32x128xbf16>
    %cst_105 = arith.constant dense<0.000000e+00> : vector<64x128xf32>
    %76 = tpu.matmul %73, %75, %cst_105 {dimension_numbers = #tpu.dot_dimension_numbers<[1], [0], [0], [1], [0, 0, 1, 1], [], []>} : vector<64x32xbf16>, vector<32x128xbf16>, vector<64x128xf32> -> vector<64x128xf32>
    %77 = arith.addf %71, %76 : vector<64x128xf32>
    %c2_106 = arith.constant 2 : index
    %c0_107 = arith.constant 0 : index
    %c0_108 = arith.constant 0 : index
    %78 = vector.load %arg10[%c2_106, %c0_107, %c0_108] : memref<10x10x32xbf16, #tpu.memory_space<vmem>>, vector<8x8x32xbf16>
    %79 = vector.shape_cast %78 : vector<8x8x32xbf16> to vector<64x32xbf16>
    %c6 = arith.constant 6 : index
    %c0_109 = arith.constant 0 : index
    %c0_110 = arith.constant 0 : index
    %80 = vector.load %arg4[%c6, %c0_109, %c0_110] : memref<9x32x128xbf16, #tpu.memory_space<vmem>>, vector<1x32x128xbf16>
    %81 = vector.shape_cast %80 : vector<1x32x128xbf16> to vector<32x128xbf16>
    %cst_111 = arith.constant dense<0.000000e+00> : vector<64x128xf32>
    %82 = tpu.matmul %79, %81, %cst_111 {dimension_numbers = #tpu.dot_dimension_numbers<[1], [0], [0], [1], [0, 0, 1, 1], [], []>} : vector<64x32xbf16>, vector<32x128xbf16>, vector<64x128xf32> -> vector<64x128xf32>
    %83 = arith.addf %77, %82 : vector<64x128xf32>
    %c2_112 = arith.constant 2 : index
    %c1_113 = arith.constant 1 : index
    %c0_114 = arith.constant 0 : index
    %84 = vector.load %arg10[%c2_112, %c1_113, %c0_114] : memref<10x10x32xbf16, #tpu.memory_space<vmem>>, vector<8x8x32xbf16>
    %85 = vector.shape_cast %84 : vector<8x8x32xbf16> to vector<64x32xbf16>
    %c7 = arith.constant 7 : index
    %c0_115 = arith.constant 0 : index
    %c0_116 = arith.constant 0 : index
    %86 = vector.load %arg4[%c7, %c0_115, %c0_116] : memref<9x32x128xbf16, #tpu.memory_space<vmem>>, vector<1x32x128xbf16>
    %87 = vector.shape_cast %86 : vector<1x32x128xbf16> to vector<32x128xbf16>
    %cst_117 = arith.constant dense<0.000000e+00> : vector<64x128xf32>
    %88 = tpu.matmul %85, %87, %cst_117 {dimension_numbers = #tpu.dot_dimension_numbers<[1], [0], [0], [1], [0, 0, 1, 1], [], []>} : vector<64x32xbf16>, vector<32x128xbf16>, vector<64x128xf32> -> vector<64x128xf32>
    %89 = arith.addf %83, %88 : vector<64x128xf32>
    %c2_118 = arith.constant 2 : index
    %c2_119 = arith.constant 2 : index
    %c0_120 = arith.constant 0 : index
    %90 = vector.load %arg10[%c2_118, %c2_119, %c0_120] : memref<10x10x32xbf16, #tpu.memory_space<vmem>>, vector<8x8x32xbf16>
    %91 = vector.shape_cast %90 : vector<8x8x32xbf16> to vector<64x32xbf16>
    %c8 = arith.constant 8 : index
    %c0_121 = arith.constant 0 : index
    %c0_122 = arith.constant 0 : index
    %92 = vector.load %arg4[%c8, %c0_121, %c0_122] : memref<9x32x128xbf16, #tpu.memory_space<vmem>>, vector<1x32x128xbf16>
    %93 = vector.shape_cast %92 : vector<1x32x128xbf16> to vector<32x128xbf16>
    %cst_123 = arith.constant dense<0.000000e+00> : vector<64x128xf32>
    %94 = tpu.matmul %91, %93, %cst_123 {dimension_numbers = #tpu.dot_dimension_numbers<[1], [0], [0], [1], [0, 0, 1, 1], [], []>} : vector<64x32xbf16>, vector<32x128xbf16>, vector<64x128xf32> -> vector<64x128xf32>
    %95 = arith.addf %89, %94 : vector<64x128xf32>
    %c0_124 = arith.constant 0 : index
    %c0_125 = arith.constant 0 : index
    %96 = vector.load %arg5[%c0_124, %c0_125] : memref<1x128xf32, #tpu.memory_space<vmem>>, vector<1x128xf32>
    %97 = vector.broadcast %96 : vector<1x128xf32> to vector<64x128xf32>
    %98 = arith.addf %95, %97 : vector<64x128xf32>
    %99 = arith.negf %98 : vector<64x128xf32>
    %100 = math.exp %99 : vector<64x128xf32>
    %cst_126 = arith.constant 1.000000e+00 : f32
    %101 = vector.broadcast %cst_126 : f32 to vector<64x128xf32>
    %102 = arith.addf %101, %100 : vector<64x128xf32>
    %103 = arith.divf %101, %102 : vector<64x128xf32>
    %104 = arith.mulf %98, %103 : vector<64x128xf32>
    %105 = arith.truncf %104 : vector<64x128xf32> to vector<64x128xbf16>
    %c0_127 = arith.constant 0 : index
    %c0_128 = arith.constant 0 : index
    %106 = vector.load %arg6[%c0_127, %c0_128] : memref<128x128xbf16, #tpu.memory_space<vmem>>, vector<128x128xbf16>
    %cst_129 = arith.constant dense<0.000000e+00> : vector<64x128xf32>
    %107 = tpu.matmul %105, %106, %cst_129 {dimension_numbers = #tpu.dot_dimension_numbers<[1], [0], [0], [1], [0, 0, 1, 1], [], []>} : vector<64x128xbf16>, vector<128x128xbf16>, vector<64x128xf32> -> vector<64x128xf32>
    %c0_130 = arith.constant 0 : index
    %c0_131 = arith.constant 0 : index
    %108 = vector.load %arg7[%c0_130, %c0_131] : memref<1x128xf32, #tpu.memory_space<vmem>>, vector<1x128xf32>
    %109 = vector.broadcast %108 : vector<1x128xf32> to vector<64x128xf32>
    %110 = arith.addf %107, %109 : vector<64x128xf32>
    %111 = arith.negf %110 : vector<64x128xf32>
    %112 = math.exp %111 : vector<64x128xf32>
    %cst_132 = arith.constant 1.000000e+00 : f32
    %113 = vector.broadcast %cst_132 : f32 to vector<64x128xf32>
    %114 = arith.addf %113, %112 : vector<64x128xf32>
    %115 = arith.divf %113, %114 : vector<64x128xf32>
    %116 = arith.mulf %110, %115 : vector<64x128xf32>
    %117 = arith.truncf %116 : vector<64x128xf32> to vector<64x128xbf16>
    %c0_133 = arith.constant 0 : index
    %c0_134 = arith.constant 0 : index
    %c0_135 = arith.constant 0 : index
    %118 = vector.load %arg8[%c0_133, %c0_134, %c0_135] : memref<1x64x128xbf16, #tpu.memory_space<vmem>>, vector<1x64x128xbf16>
    %119 = vector.shape_cast %118 : vector<1x64x128xbf16> to vector<64x128xbf16>
    %120 = vector.shape_cast %117 : vector<64x128xbf16> to vector<1x64x128xbf16>
    tpu.vector_store %arg8[%c0_133, %c0_134, %c0_135], %120 {strides = array<i32>} : memref<1x64x128xbf16, #tpu.memory_space<vmem>>, vector<1x64x128xbf16>,
    return
  }
  func.func @transform_0(%arg0: i32) -> (i32, i32, i32, i32) {
    %c0_i32 = arith.constant 0 : i32
    %c0_i32_0 = arith.constant 0 : i32
    %c0_i32_1 = arith.constant 0 : i32
    %c0_i32_2 = arith.constant 0 : i32
    return %arg0, %c0_i32, %c0_i32_0, %c0_i32_1 : i32, i32, i32, i32
  }
  func.func @transform_1(%arg0: i32) -> (i32, i32) {
    %c0_i32 = arith.constant 0 : i32
    %c0_i32_0 = arith.constant 0 : i32
    %c0_i32_1 = arith.constant 0 : i32
    return %c0_i32, %c0_i32_0 : i32, i32
  }
  func.func @transform_2(%arg0: i32) -> (i32, i32) {
    %c0_i32 = arith.constant 0 : i32
    %c0_i32_0 = arith.constant 0 : i32
    %c0_i32_1 = arith.constant 0 : i32
    return %c0_i32, %c0_i32_0 : i32, i32
  }
  func.func @transform_3(%arg0: i32) -> (i32, i32, i32) {
    %c0_i32 = arith.constant 0 : i32
    %c0_i32_0 = arith.constant 0 : i32
    %c0_i32_1 = arith.constant 0 : i32
    %c0_i32_2 = arith.constant 0 : i32
    return %c0_i32, %c0_i32_0, %c0_i32_1 : i32, i32, i32
  }
  func.func @transform_4(%arg0: i32) -> (i32, i32) {
    %c0_i32 = arith.constant 0 : i32
    %c0_i32_0 = arith.constant 0 : i32
    %c0_i32_1 = arith.constant 0 : i32
    return %c0_i32, %c0_i32_0 : i32, i32
  }
  func.func @transform_5(%arg0: i32) -> (i32, i32) {
    %c0_i32 = arith.constant 0 : i32
    %c0_i32_0 = arith.constant 0 : i32
    %c0_i32_1 = arith.constant 0 : i32
    return %c0_i32, %c0_i32_0 : i32, i32
  }
  func.func @transform_6(%arg0: i32) -> (i32, i32) {
    %c0_i32 = arith.constant 0 : i32
    %c0_i32_0 = arith.constant 0 : i32
    %c0_i32_1 = arith.constant 0 : i32
    return %c0_i32, %c0_i32_0 : i32, i32
  }
  func.func @transform_7(%arg0: i32) -> (i32, i32, i32) {
    %c0_i32 = arith.constant 0 : i32
    %c0_i32_0 = arith.constant 0 : i32
    %c0_i32_1 = arith.constant 0 : i32
    return %arg0, %c0_i32, %c0_i32_0 : i32, i32, i32
  }
}

</mosaic_0001>

<bundles_post_ra>
// kernel: tpu_custom_call.1
= control target key start
LH: loop header
LB: loop body
LE: loop exit
PB: predicated region body
PF: predicated region fallthrough
CT: control target
= control target key end

     0   :  { %12 = vsyncpa [#allocation5], 0  ;;  %s6180_s0 = inlined_call_operand.hbm [shape: f32[2,8,8,8], index: 0, kind: input, shape index: {}]   ;;  %s6181_s1 = inlined_call_operand.hbm [shape: bf16[72,32], index: 1, kind: input, shape index: {}]   ;;  %s6182_s2 = inlined_call_operand.hbm [shape: f32[1,32], index: 2, kind: input, shape index: {}]   ;;  %s6183_s3 = inlined_call_operand.hbm [shape: bf16[9,32,128], index: 3, kind: input, shape index: {}]   ;;  %s6184_s4 = inlined_call_operand.hbm [shape: f32[1,128], index: 4, kind: input, shape index: {}]   ;;  %s6185_s5 = inlined_call_operand.hbm [shape: bf16[128,128], index: 5, kind: input, shape index: {}]   ;;  %s6186_s6 = inlined_call_operand.hbm [shape: f32[1,128], index: 6, kind: input, shape index: {}]   ;;  %s6187_s7 = inlined_call_operand.hbm [shape: bf16[2,64,128], index: 7, kind: output, shape index: {}]  }
   0x1   :  { %14 = vsyncpa [#allocation5 + $0x1], 0 }
   0x2   :  { %15 = vsyncpa [#allocation8], 0 }
   0x3   :  { %16 = vsyncpa [#allocation11], 0 }
   0x4   :  { %17 = vsyncpa [#allocation14], 0 }
   0x5   :  { %18 = vsyncpa [#allocation6], 0 }
   0x6   :  { %20 = vsyncpa [#allocation6 + $0x1], 0  ;;  %s5142_s24 = smov 0   ;;  %s5144_s25 = smov 0  }
   0x7   :  { %s5146_s26 = smov 0   ;;  %s5148_s27 = smov 0  }
   0x8 LB: > { %s5080_s28 = smov [#allocation7]   ;;  %s5163_s30 = sadd.s32 4294967295, %s5078_s27   ;;  %s5078_s27 = sphi %s5148_s27, %s6229_s27   ;;  %s5074_s26 = sphi %s5146_s26, %s6228_s26   ;;  %s5070_s25 = sphi %s5144_s25, %s6227_s25   ;;  %s5066_s24 = sphi %s5142_s24, %s6226_s24  }
   0x9   : > { %s221_s29 = sshll.u32 %s5080_s28, 4  ;;  %p3861_p0 = scmp.ge.s32.totalorder %s5078_s27, 1  ;;  %s5168_s29 = int_to_ptr.vmem [resolvable:$true] %s221_s29 }
   0xa   : > { %p6188_p1 = scmp.eq.s32.totalorder %s5163_s30, 0  ;;  %p209_p2 = scmp.lt.s32.totalorder %s5078_s27, 3 }
   0xb   : > { %s5081_s9 = smov [#allocation10]   ;;  %s5082_s12 = smov [#allocation13]  }
   0xc   : > { %p5170_p3 = pnand %p3861_p0, %p209_p2  ;;  %s245_s10 = sshll.u32 %s5081_s9, 4  ;;  %s5183_s10 = int_to_ptr.vmem [resolvable:$true] %s245_s10 }
   0xd   : > { %s269_s13 = sshll.u32 %s5082_s12, 4  ;;  %s4802_s16 = scalar_lea.hbm %s6181_s1, 576  ;;  %s5185_s13 = int_to_ptr.vmem [resolvable:$true] %s269_s13 }
   0xe   : > { %s6191_s8 = scalar_select %p5170_p3, 1, 0 }
   0xf   : > { %p4507_p5 = pneg %p5170_p3  ;;  %p4803_p7 = scmp.ne.s32.totalorder %s6181_s1, %s4802_s16 }
  0x10   : > { %p4809_p11 = scmp.lt.u32.totalorder %s4802_s16, %s6181_s1 }
  0x11   : > { %p5179_p6 = pnand %p4507_p5, %p6188_p1 }
  0x13   : > { %p5195_p8 = pneg %p5179_p6 }
  0x15   : > { %p4805_p9 = pnand %p5195_p8, %p4803_p7 }
  0x17   : > { %p4806_p10 = pneg %p4805_p9 }
  0x19   : > { %p4811_p12 = pnand %p4809_p11, %p4806_p10 }
  0x1b   : > { %4814 = shalt.err (!%p4811_p12)
}
  0x1c   : > { %s4815_s22 = scalar_lea.vmem %s5168_s29, 576  ;;  %p4823_p5 = scmp.lt.s32.totalorder %s5168_s29, %s5168_s29 }
  0x1d   : > { %p4816_p13 = scmp.ne.s32.totalorder %s5168_s29, %s4815_s22  ;;  %p4824_p4 = scmp.lt.s32.totalorder %s4815_s22, %s4815_s22 }
  0x1f   : > { %p4818_p0 = pnand %p4816_p13, %p5195_p8  ;;  %p4825_p7 = por %p4824_p4, %p4823_p5 }
  0x21   : > { %p4819_p2 = pneg %p4818_p0 }
  0x23   : > { %p4826_p9 = pnand %p4825_p7, %p4819_p2 }
  0x25   : > { %4829 = shalt.err (!%p4826_p9)
}
  0x26   : > { %s5083_s23 = smov 64   ;;  %s5084_s28 = smov 4  }
  0x27   : > { %4510 = dma.hbm_to_vmem [thread:$0]  (!%p5179_p6), %s6181_s1, 576, %s5168_s29, [#allocation8], %s5083_s23, %s5083_s23, %s5084_s28  }
  0x28   : > { %s4830_s16 = scalar_lea.hbm %s6183_s3, 2304 }
  0x29   : > { %p4831_p4 = scmp.ne.s32.totalorder %s6183_s3, %s4830_s16  ;;  %p4837_p12 = scmp.lt.u32.totalorder %s4830_s16, %s6183_s3 }
  0x2b   : > { %p4833_p10 = pnand %p4831_p4, %p5195_p8 }
  0x2d   : > { %p4834_p11 = pneg %p4833_p10 }
  0x2f   : > { %p4839_p13 = pnand %p4837_p12, %p4834_p11 }
  0x31   : > { %4842 = shalt.err (!%p4839_p13)
}
  0x32   : > { %s4843_s29 = scalar_lea.vmem %s5183_s10, 2304  ;;  %p4851_p7 = scmp.lt.s32.totalorder %s5183_s10, %s5183_s10 }
  0x33   : > { %p4844_p0 = scmp.ne.s32.totalorder %s5183_s10, %s4843_s29  ;;  %p4852_p9 = scmp.lt.s32.totalorder %s4843_s29, %s4843_s29 }
  0x35   : > { %p4846_p2 = pnand %p4844_p0, %p5195_p8  ;;  %p4853_p4 = por %p4852_p9, %p4851_p7 }
  0x37   : > { %p4847_p5 = pneg %p4846_p2 }
  0x39   : > { %p4854_p10 = pnand %p4853_p4, %p4847_p5 }
  0x3b   : > { %4857 = shalt.err (!%p4854_p10)
}
  0x3c   : > { %4516 = dma.hbm_to_vmem [thread:$0]  (!%p5179_p6), %s6183_s3, 2304, %s5183_s10, [#allocation11], %s5083_s23, %s5083_s23, %s5084_s28  }
  0x3d   : > { %s4858_s15 = scalar_lea.hbm %s6185_s5, 1024 }
  0x3e   : > { %p4859_p11 = scmp.ne.s32.totalorder %s6185_s5, %s4858_s15  ;;  %p4865_p0 = scmp.lt.u32.totalorder %s4858_s15, %s6185_s5 }
  0x40   : > { %p4861_p12 = pnand %p4859_p11, %p5195_p8 }
  0x42   : > { %p4862_p13 = pneg %p4861_p12 }
  0x44   : > { %p4867_p2 = pnand %p4865_p0, %p4862_p13 }
  0x46   : > { %4870 = shalt.err (!%p4867_p2)
}
  0x47   : > { %s4871_s10 = scalar_lea.vmem %s5185_s13, 1024  ;;  %p4879_p4 = scmp.lt.s32.totalorder %s5185_s13, %s5185_s13 }
  0x48   : > { %p4872_p5 = scmp.ne.s32.totalorder %s5185_s13, %s4871_s10  ;;  %p4880_p10 = scmp.lt.s32.totalorder %s4871_s10, %s4871_s10 }
  0x4a   : > { %p4874_p7 = pnand %p4872_p5, %p5195_p8  ;;  %p4881_p11 = por %p4880_p10, %p4879_p4 }
  0x4c   : > { %p4875_p9 = pneg %p4874_p7 }
  0x4e   : > { %p4882_p12 = pnand %p4881_p11, %p4875_p9 }
  0x50   : > { %4885 = shalt.err (!%p4882_p12)
}
  0x51   : > { %4522 = dma.hbm_to_vmem [thread:$0]  (!%p5179_p6), %s6185_s5, 1024, %s5185_s13, [#allocation14], %s5083_s23, %s5083_s23, %s5084_s28  }
  0x52   : > { %s5085_s22 = smov [#allocation9]   ;;  %s5086_s12 = smov [#allocation12]  }
  0x53   : > { %s235_s9 = sshll.u32 %s5085_s22, 4  ;;  %s259_s14 = sshll.u32 %s5086_s12, 4  ;;  %s236_s9 = int_to_ptr.vmem [resolvable:$true] %s235_s9  ;;  %s260_s14 = int_to_ptr.vmem [resolvable:$true] %s259_s14 }
  0x54   : > { %s4886_s17 = scalar_lea.hbm %s6182_s2, 16 }
  0x55   : > { %p4887_p13 = scmp.ne.s32.totalorder %s6182_s2, %s4886_s17  ;;  %p4893_p5 = scmp.lt.u32.totalorder %s4886_s17, %s6182_s2 }
  0x57   : > { %p4889_p0 = pnand %p4887_p13, %p5195_p8 }
  0x59   : > { %p4890_p2 = pneg %p4889_p0 }
  0x5b   : > { %p4895_p7 = pnand %p4893_p5, %p4890_p2 }
  0x5d   : > { %4898 = shalt.err (!%p4895_p7)
}
  0x5e   : > { %s4899_s13 = scalar_lea.vmem %s236_s9, 16  ;;  %s4906_s23 = scalar_lea.vmem %s236_s9, 32 }
  0x5f   : > { %p4900_p9 = scmp.ne.s32.totalorder %s236_s9, %s4899_s13  ;;  %p4907_p11 = scmp.lt.s32.totalorder %s236_s9, %s236_s9 }
  0x60   : > { %p4908_p12 = scmp.lt.s32.totalorder %s4906_s23, %s4899_s13 }
  0x61   : > { %p4902_p4 = pnand %p4900_p9, %p5195_p8 }
  0x62   : > { %p4909_p1 = por %p4908_p12, %p4907_p11 }
  0x63   : > { %p4903_p10 = pneg %p4902_p4 }
  0x65   : > { %p4910_p3 = pnand %p4909_p1, %p4903_p10 }
  0x67   : > { %4913 = shalt.err (!%p4910_p3)
}
  0x68   : > { %4513 = dma.hbm_to_vmem [thread:$0]  (!%p5179_p6), %s6182_s2, 16, %s236_s9, [#allocation8]  }
  0x69   : > { %s4914_s15 = scalar_lea.hbm %s6184_s4, 16 }
  0x6a   : > { %p4915_p13 = scmp.ne.s32.totalorder %s6184_s4, %s4914_s15  ;;  %p4921_p3 = scmp.lt.u32.totalorder %s4914_s15, %s6184_s4 }
  0x6c   : > { %p4917_p0 = pnand %p4915_p13, %p5195_p8 }
  0x6e   : > { %p4918_p1 = pneg %p4917_p0 }
  0x70   : > { %p4923_p2 = pnand %p4921_p3, %p4918_p1 }
  0x72   : > { %4926 = shalt.err (!%p4923_p2)
}
  0x73   : > { %s4927_s10 = scalar_lea.vmem %s260_s14, 16  ;;  %s4934_s9 = scalar_lea.vmem %s260_s14, 32 }
  0x74   : > { %p4928_p5 = scmp.ne.s32.totalorder %s260_s14, %s4927_s10  ;;  %p4935_p4 = scmp.lt.s32.totalorder %s260_s14, %s260_s14 }
  0x75   : > { %p4936_p10 = scmp.lt.s32.totalorder %s4934_s9, %s4927_s10 }
  0x76   : > { %p4930_p7 = pnand %p4928_p5, %p5195_p8 }
  0x77   : > { %p4937_p11 = por %p4936_p10, %p4935_p4 }
  0x78   : > { %p4931_p9 = pneg %p4930_p7 }
  0x7a   : > { %p4938_p12 = pnand %p4937_p11, %p4931_p9 }
  0x7c   : > { %4941 = shalt.err (!%p4938_p12)
}
  0x7d   : > { %4519 = dma.hbm_to_vmem [thread:$0]  (!%p5179_p6), %s6184_s4, 16, %s260_s14, [#allocation11]  }
  0x7e   : > { %s5087_s23 = smov [#allocation15]   ;;  %s4942_s12 = scalar_lea.hbm %s6186_s6, 16 }
  0x7f   : > { %s283_s28 = sshll.u32 %s5087_s23, 4  ;;  %p4943_p13 = scmp.ne.s32.totalorder %s6186_s6, %s4942_s12  ;;  %s284_s28 = int_to_ptr.vmem [resolvable:$true] %s283_s28 }
  0x80   : > { %p4949_p3 = scmp.lt.u32.totalorder %s4942_s12, %s6186_s6 }
  0x81   : > { %p4945_p0 = pnand %p4943_p13, %p5195_p8 }
  0x83   : > { %p4946_p1 = pneg %p4945_p0 }
  0x85   : > { %p4951_p2 = pnand %p4949_p3, %p4946_p1 }
  0x87   : > { %4954 = shalt.err (!%p4951_p2)
}
  0x88   : > { %s4955_s14 = scalar_lea.vmem %s284_s28, 16  ;;  %s4962_s20 = scalar_lea.vmem %s284_s28, 32 }
  0x89   : > { %p4956_p5 = scmp.ne.s32.totalorder %s284_s28, %s4955_s14  ;;  %p4963_p4 = scmp.lt.s32.totalorder %s284_s28, %s284_s28 }
  0x8a   : > { %p4964_p10 = scmp.lt.s32.totalorder %s4962_s20, %s4955_s14 }
  0x8b   : > { %p4958_p7 = pnand %p4956_p5, %p5195_p8 }
  0x8c   : > { %p4965_p11 = por %p4964_p10, %p4963_p4 }
  0x8d   : > { %p4959_p9 = pneg %p4958_p7 }
  0x8f   : > { %p4966_p12 = pnand %p4965_p11, %p4959_p9 }
  0x91   : > { %4969 = shalt.err (!%p4966_p12)
}
  0x92   : > { %4525 = dma.hbm_to_vmem [thread:$0]  (!%p5179_p6), %s6186_s6, 16, %s284_s28, [#allocation14]  }
  0x93   : > { %s3860_s19 = sadd.s32 4294967294, %s5078_s27   ;;  %s5327_s11 = sadd.s32 1, %s5078_s27  }
  0x94   : > { %s30_s21 = ssub.s32 %s5078_s27, %s5327_s11  ;;  %s33_s13 = sadd.s32 1, %s5074_s26 }
  0x95   : > { %p31_p8 = scmp.eq.s32.totalorder %s30_s21, 0  ;;  %p40_p13 = scmp.ne.s32.totalorder %s5074_s26, %s5070_s25 }
  0x96   : > { %p41_p0 = scmp.eq.s32.totalorder %s5078_s27, 0  ;;  %p46_p1 = scmp.ne.s32.totalorder %s5070_s25, %s5066_s24 }
  0x97   : > { %s5338_s23 = scalar_select %p31_p8, %s5074_s26, %s33_s13  }
  0x98   : > { %p5340_p3 = por %p41_p0, %p40_p13  ;;  %p6195_p2 = scmp.eq.s32.totalorder %s5163_s30, 0 }
  0x99   : > { %p196_p5 = scmp.eq.s32.totalorder %s5163_s30, 1  ;;  %p202_p7 = scmp.eq.s32.totalorder %s3860_s19, 1 }
  0x9a   : > { %p5346_p6 = por %p6195_p2, %p46_p1  ;;  %p4540_p9 = scmp.lt.s32.totalorder %s5078_s27, 2 }
  0x9b   : > { %s294_s22 = sand.u32 1, %s5074_s26   ;;  %p5353_p4 = por %p196_p5, %p40_p13 }
  0x9c   : > { %p5357_p10 = por %p202_p7, %p46_p1  ;;  %s3869_s16 = sshll.u32 %s294_s22, 6 }
  0x9d   : > { %s6197_s12 = scalar_select %p5353_p4, 1, 0 }
  0x9e   : > { %s6198_s15 = scalar_select %p5357_p10, 1, 0 }
  0x9f   : > { %s4136_s17 = sshll.u32 %s5078_s27, 10  ;;  %s298_s10 = scalar_lea.vmem [#allocation4], %s3869_s16 }
  0xa0   : > { %s5365_s20 = scalar_lea.hbm %s6180_s0, %s4136_s17  ;;  %s305_s9 = sshll.u32 %s298_s10, 4  ;;  %s5367_s9 = int_to_ptr.vmem [resolvable:$true] %s305_s9 }
  0xa1   : > { %p5371_p11 = pnand %p4540_p9, %p5340_p3  ;;  %s5375_s21 = scalar_lea.sflag [#allocation5], %s294_s22 }
  0xa2   : > { %s4970_s13 = scalar_lea.hbm %s5365_s20, 1024  ;;  %s4975_s29 = scalar_lea.hbm %s6180_s0, 2048 }
  0xa3   : > { %p4971_p12 = scmp.ne.s32.totalorder %s5365_s20, %s4970_s13  ;;  %p4972_p8 = pneg %p5371_p11 }
  0xa4   : > { %p4976_p1 = scmp.lt.u32.totalorder %s5365_s20, %s6180_s0  ;;  %p4977_p3 = scmp.lt.u32.totalorder %s4975_s29, %s4970_s13 }
  0xa5   : > { %p4973_p13 = pnand %p4972_p8, %p4971_p12  ;;  %p4979_p5 = scmp.lt.u32.totalorder %s4970_s13, %s5365_s20 }
  0xa6   : > { %p4978_p2 = por %p4977_p3, %p4976_p1 }
  0xa7   : > { %p4974_p0 = pneg %p4973_p13 }
  0xa8   : > { %p4980_p7 = por %p4979_p5, %p4978_p2 }
  0xaa   : > { %p4981_p9 = pnand %p4980_p7, %p4974_p0 }
  0xac   : > { %4984 = shalt.err (!%p4981_p9)
}
  0xad   : > { %s4985_s22 = scalar_lea.vmem %s5367_s9, 1024  ;;  %s5088_s10 = smov [#allocation4]  }
  0xae   : > { %p4986_p12 = scmp.ne.s32.totalorder %s5367_s9, %s4985_s22  ;;  %s4990_s16 = sshll.u32 %s5088_s10, 4  ;;  %s4991_s16 = int_to_ptr.vmem [resolvable:$false] %s4990_s16 }
  0xaf   : > { %s4992_s17 = scalar_lea.vmem %s4991_s16, 2048  ;;  %p4993_p4 = scmp.lt.s32.totalorder %s5367_s9, %s4991_s16 }
  0xb0   : > { %p4988_p13 = pnand %p4986_p12, %p4972_p8  ;;  %p4994_p1 = scmp.lt.s32.totalorder %s4992_s17, %s4985_s22 }
  0xb2   : > { %p4989_p10 = pneg %p4988_p13  ;;  %p4995_p3 = por %p4994_p1, %p4993_p4 }
  0xb4   : > { %p4996_p2 = pnand %p4995_p3, %p4989_p10 }
  0xb6   : > { %4999 = shalt.err (!%p4996_p2)
}
  0xb7   : > { %s5089_s13 = smov 128   ;;  %s5090_s29 = smov 8  }
  0xb8   : > { %4529 = dma.hbm_to_vmem [thread:$0]  (!%p5371_p11), %s5365_s20, 1024, %s5367_s9, %s5375_s21, %s5089_s13, %s5089_s13, %s5090_s29  }
  0xb9   : > { %p6200_p8 = scmp.ne.s32.totalorder %s6191_s8, 0 }
  0xba   : > { %s5406_s18 = sand.u32 (!%p6200_p8), 1, %s5070_s25  }
  0xbb   : > { %317 = sbr.rel (%p6200_p8) target bundleno = 1360 (0x550), region = 48  ;;  %s3873_s14 = sshll.u32 (!%p6200_p8), %s5406_s18, 6 }
  0xbc   : > { %s320_s22 = scalar_lea.sflag (!%p6200_p8), [#allocation5], %s5406_s18  ;;  %s5410_s10 = scalar_lea.vmem (!%p6200_p8), [#allocation4], %s3873_s14 }
  0xc2   : > { %5045 = dma.done.wait (%p5346_p6), %s320_s22, 1024  }
  0xc3   : > { %5047 = vsyncadd (%p5346_p6), %s320_s22, 4294966272  ;;  %p6201_p4 = scmp.eq.s32.totalorder %s5163_s30, 0 }
  0xc5   : > { %5049 = dma.done.wait (%p6201_p4), [#allocation8], 592   ;;  %p6202_p10 = pmov %p6201_p4 }
  0xc6   : > { %p6203_p11 = pmov %p6201_p4 }
  0xc7   : > { %5051 = vsyncadd (%p6202_p10), [#allocation8], 4294966704 }
  0xc8   : > { %5053 = dma.done.wait (%p6203_p11), [#allocation11], 2320   ;;  %p6204_p0 = pmov %p6201_p4 }
  0xca   : > { %5055 = vsyncadd (%p6204_p0), [#allocation11], 4294964976  ;;  %p6205_p5 = pmov %p6204_p0 }
  0xcb   : > { %p6206_p7 = pmov %p6204_p0 }
  0xcc   : > { %5057 = dma.done.wait (%p6205_p5), [#allocation14], 1040  }
  0xcd   : > { %5059 = vsyncadd (%p6206_p7), [#allocation14], 4294966256  ;;  %vm379_vm0 = vcmask 60416   ;;  %vm381_vm1 = vcmask 57344   ;;  %v5091_v0 = vmov 0   ;;  %vm1570_vm3 = vcmask 253952  }
  0xce   : > { %380 = vst.msk [vmem:[#allocation2] sm:$0xf] %vm379_vm0, %v5091_v0  ;;  %vm387_vm2 = vsmask.f32 256  ;;  %384 = vst.msk [vmem:[#allocation2 + $0x48] sm:$0xf] %vm379_vm0, %v5091_v0 }
  0xcf   : > { %382 = vst.msk [vmem:[#allocation2 + $0x4] sm:$0x1] %vm381_vm1, %v5091_v0  ;;  %385 = vst.msk [vmem:[#allocation2 + $0x4c] sm:$0x1] %vm381_vm1, %v5091_v0  ;;  %vm419_vm4 = vsmask.f32 7938 }
  0xd0   : > { %1571 = vst.msk [vmem:[#allocation3 + $0x4] sm:$0x1] %vm1570_vm3, %v5091_v0  ;;  %1574 = vst.msk [vmem:[#allocation3 + $0x4c] sm:$0x1] %vm1570_vm3, %v5091_v0  ;;  %v395_v4 = vld [vmem:[#allocation2 + $0x10] sm:$0x1] }
  0xd1   : > { %vm5438_vm5 = vmand %vm381_vm1, %vm387_vm2  ;;  %v427_v5 = vld [vmem:[#allocation2 + $0x14] sm:$0x1]  ;;  %v452_v6 = vld [vmem:[%s5410_s10 + $0x8] sm:$0xff]  ;;  %s5092_s8 = smov 16   ;;  %s5093_s28 = smov 8   ;;  %vm1443_vm9 = vcmask 1043456  }
  0xd2   : > { %vm5443_vm6 = vmand %vm1570_vm3, %vm387_vm2  ;;  %v4138_v9 = vpack.c.bf16 %v452_v6, %v452_v6  ;;  %v396_v12 = vsel %vm5438_vm5, 0, %v395_v4  ;;  %v392_v14 = vld [vmem:[#allocation2 + $0x8] sm:$0x1]  ;;  %v451_v18 = vld [vmem:[%s5410_s10] sm:$0xff]  ;;  %s5094_s20 = smov 24   ;;  %s5095_s9 = smov 40  }
  0xd3   : > { %vm5448_vm7 = vmand %vm381_vm1, %vm419_vm4  ;;  %397 = vst [vmem:[#allocation2 + $0x10] sm:$0x1] %v396_v12  ;;  %v393_v17 = vsel %vm5438_vm5, 0, %v392_v14  ;;  %v401_v19 = vld [vmem:[#allocation2 + $0x20] sm:$0x1]  ;;  %v4137_v20 = vpack.c.bf16 %v451_v18, %v451_v18  ;;  %v454_v23 = vld [vmem:[%s5410_s10 + $0x18] sm:$0xff] }
  0xd4   : > { %v428_v13 = vsel %vm5448_vm7, 0, %v427_v5  ;;  %v500_v15 = vshrl.u32 %v4138_v9, 16  ;;  %v503_v16 = vshll.u32 %v4138_v9, 16  ;;  %394 = vst [vmem:[#allocation2 + $0x8] sm:$0x1] %v393_v17  ;;  %v402_v21 = vsel %vm5438_vm5, 0, %v401_v19  ;;  %vm5477_vm8 = vmand %vm379_vm0, %vm419_vm4 }
  0xd5   : > { %v389_v8 = vld [vmem:[#allocation2] sm:$0x1]  ;;  %429 = vst [vmem:[#allocation2 + $0x14] sm:$0x1] %v428_v13  ;;  %v433_v22 = vld [vmem:[#allocation2 + $0x24] sm:$0x1]  ;;  %v4140_v27 = vpack.c.bf16 %v454_v23, %v454_v23 }
  0xd6   : > { %v421_v7 = vld [vmem:[#allocation2 + $0x4] sm:$0x1]  ;;  %v390_v11 = vsel %vm5438_vm5, 0, %v389_v8  ;;  %v398_v24 = vld [vmem:[#allocation2 + $0x18] sm:$0x1]  ;;  %v502_v25 = vrot.slane %v500_v15, 7 }
  0xd7   : > { %v422_v10 = vsel %vm5448_vm7, 0, %v421_v7  ;;  %391 = vst [vmem:[#allocation2] sm:$0x1] %v390_v11  ;;  %403 = vst [vmem:[#allocation2 + $0x20] sm:$0x1] %v402_v21  ;;  %v434_v26 = vsel %vm5448_vm7, 0, %v433_v22 }
  0xd8   : > { %423 = vst [vmem:[#allocation2 + $0x4] sm:$0x1] %v422_v10  ;;  %v399_v28 = vsel %vm5438_vm5, 0, %v398_v24  ;;  %v430_v29 = vld [vmem:[#allocation2 + $0x1c] sm:$0x1]  ;;  %v453_v30 = vld [vmem:[%s5410_s10 + $0x10] sm:$0xff]  ;;  %v505_v37 = vor.u32 %v503_v16, %v502_v25 }
  0xd9   : > { %v638_v31 = vld [vmem:[#allocation2] sm:$0xe]  ;;  %v492_v32 = vshrl.u32 %v4137_v20, 16  ;;  %v495_v33 = vshll.u32 %v4137_v20, 16  ;;  %435 = vst [vmem:[#allocation2 + $0x24] sm:$0x1] %v434_v26  ;;  %v4139_v35 = vpack.c.bf16 %v453_v30, %v453_v30 }
  0xda   : > { %400 = vst [vmem:[#allocation2 + $0x18] sm:$0x1] %v399_v28  ;;  %v431_v34 = vsel %vm5448_vm7, 0, %v430_v29  ;;  %v424_v36 = vld [vmem:[#allocation2 + $0xc] sm:$0x1]  ;;  %v516_v38 = vshrl.u32 %v4140_v27, 16 }
  0xdb   : > { %v519_v39 = vshll.u32 %v4140_v27, 16  ;;  %432 = vst [vmem:[#allocation2 + $0x1c] sm:$0x1] %v431_v34  ;;  %v404_v40 = vld [vmem:[#allocation2 + $0x28] sm:$0x1]  ;;  %v455_v41 = vld [vmem:[%s5410_s10 + $0x20] sm:$0xff] }
  0xdc   : > { %v506_v43 = vrot.slane %v502_v25, 4  ;;  %v5481_v44 = vrot.slane %v492_v32, 7  ;;  %v508_v45 = vshrl.u32 %v4139_v35, 16  ;;  %v425_v46 = vsel %vm5448_vm7, 0, %v424_v36  ;;  %v436_v47 = vld [vmem:[#allocation2 + $0x2c] sm:$0x1] }
  0xdd   : > { %v518_v48 = vrot.slane %v516_v38, 7  ;;  %v511_v49 = vshll.u32 %v4139_v35, 16  ;;  %426 = vst [vmem:[#allocation2 + $0xc] sm:$0x1] %v425_v46  ;;  %v405_v50 = vsel %vm5438_vm5, 0, %v404_v40  ;;  %v437_v51 = vsel %vm5448_vm7, 0, %v436_v47 }
  0xde   : > { %v622_v53 = vld [vmem:[#allocation2] sm:$0xf]  ;;  %v580_v54 = vld [vmem:[#allocation2 + $0x10] sm:$0xf]  ;;  %v497_v55 = vor.u32 %v495_v33, %v5481_v44  ;;  %406 = vst [vmem:[#allocation2 + $0x28] sm:$0x1] %v405_v50  ;;  %v4141_v56 = vpack.c.bf16 %v455_v41, %v455_v41 }
  0xdf   : > { %v630_v52 = vld [vmem:[#allocation2 + $0x4] sm:$0x1]  ;;  %438 = vst [vmem:[#allocation2 + $0x2c] sm:$0x1] %v437_v51  ;;  %v581_v59 = vsel %vm5477_vm8, %v505_v37, %v580_v54  ;;  %v583_v60 = vld [vmem:[#allocation2 + $0x14] sm:$0x1]  ;;  %v521_v62 = vor.u32 %v519_v39, %v518_v48 }
  0xe0   : > { %v3897_v57 = vcombine.low %v638_v31, %v630_v52  ;;  %v3889_v58 = vcombine.low %v622_v53, %v630_v52  ;;  %v574_v61 = vld [vmem:[#allocation2 + $0x8] sm:$0xf]  ;;  %v407_v63 = vld [vmem:[#allocation2 + $0x30] sm:$0x1]  ;;  %582 = vst [vmem:[#allocation2 + $0x10] sm:$0xf] %v581_v59  ;;  %v584_v4 = vsel %vm5438_vm5, %v506_v43, %v583_v60 }
  0xe1   : > { %v575_v5 = vsel %vm5477_vm8, %v497_v55, %v574_v61  ;;  %v522_v6 = vrot.slane %v518_v48, 4  ;;  %v592_v7 = vld [vmem:[#allocation2 + $0x20] sm:$0xf]  ;;  %v510_v8 = vrot.slane %v508_v45, 7  ;;  %v439_v9 = vld [vmem:[#allocation2 + $0x34] sm:$0x1] }
  0xe2   : > { %v831_v10 = vrot.slane %v3897_v57, 1  ;;  %v738_v11 = vshll.u32 %v3889_v58, 16  ;;  %v736_v12 = vshrl.u32 %v3889_v58, 16  ;;  %585 = vst [vmem:[#allocation2 + $0x14] sm:$0x1] %v584_v4  ;;  %v593_v13 = vsel %vm5477_vm8, %v521_v62, %v592_v7  ;;  %v456_v48 = vld [vmem:[%s5410_s10 + $0x28] sm:$0xff] }
  0xe3   : > { %576 = vst [vmem:[#allocation2 + $0x8] sm:$0xf] %v575_v5  ;;  %v595_v14 = vld [vmem:[#allocation2 + $0x24] sm:$0x1]  ;;  %v410_v15 = vld [vmem:[#allocation2 + $0x38] sm:$0x1]  ;;  %v513_v17 = vor.u32 %v511_v49, %v510_v8  ;;  %v4142_v59 = vpack.c.bf16 %v456_v48, %v456_v48 }
  0xe4   : > { %594 = vst [vmem:[#allocation2 + $0x20] sm:$0xf] %v593_v13  ;;  %v596_v16 = vsel %vm5438_vm5, %v522_v6, %v595_v14  ;;  %v514_v18 = vrot.slane %v510_v8, 4  ;;  %v586_v19 = vld [vmem:[#allocation2 + $0x18] sm:$0xf]  ;;  %v498_v21 = vrot.slane %v5481_v44, 4  ;;  %839 = vrot.lane.b32.xlu0 %v831_v10, %s5092_s8 }
  0xe5   : > { %v589_v20 = vld [vmem:[#allocation2 + $0x1c] sm:$0x1]  ;;  %v740_v22 = vrot.slane %v738_v11, 1  ;;  %597 = vst [vmem:[#allocation2 + $0x24] sm:$0x1] %v596_v16  ;;  %v524_v23 = vshrl.u32 %v4141_v56, 16  ;;  %v587_v27 = vsel %vm5477_vm8, %v513_v17, %v586_v19 }
  0xe6   : > { %v527_v24 = vshll.u32 %v4141_v56, 16  ;;  %v408_v25 = vsel %vm5438_vm5, 0, %v407_v63  ;;  %v442_v26 = vld [vmem:[#allocation2 + $0x3c] sm:$0x1]  ;;  %v590_v28 = vsel %vm5438_vm5, %v514_v18, %v589_v20  ;;  %v577_v29 = vld [vmem:[#allocation2 + $0xc] sm:$0x1] }
  0xe7   : > { %409 = vst [vmem:[#allocation2 + $0x30] sm:$0x1] %v408_v25  ;;  %v440_v30 = vsel %vm5448_vm7, 0, %v439_v9  ;;  %v741_v31 = vor.u32 %v740_v22, %v736_v12  ;;  %588 = vst [vmem:[#allocation2 + $0x18] sm:$0xf] %v587_v27  ;;  %v578_v32 = vsel %vm5438_vm5, %v498_v21, %v577_v29  ;;  %v5512_v33 = vrot.slane %v524_v23, 7 }
  0xe8   : > { %591 = vst [vmem:[#allocation2 + $0x1c] sm:$0x1] %v590_v28  ;;  %441 = vst [vmem:[#allocation2 + $0x34] sm:$0x1] %v440_v30  ;;  %v598_v34 = vld [vmem:[#allocation2 + $0x28] sm:$0xf] }
  0xe9   : > { %579 = vst [vmem:[#allocation2 + $0xc] sm:$0x1] %v578_v32  ;;  %v411_v35 = vsel %vm5438_vm5, 0, %v410_v15  ;;  %v443_v36 = vsel %vm5448_vm7, 0, %v442_v26  ;;  %791 = vrot.lane.b32.xlu0 %v741_v31, %s5093_s28  ;;  %v647_v37 = vld [vmem:[#allocation2 + $0x10] sm:$0xf]  ;;  %v529_v38 = vor.u32 %v527_v24, %v5512_v33 }
  0xea   : > { %412 = vst [vmem:[#allocation2 + $0x38] sm:$0x1] %v411_v35  ;;  %444 = vst [vmem:[#allocation2 + $0x3c] sm:$0x1] %v443_v36  ;;  %v3906_v39 = vcombine.low %v647_v37, %v647_v37  ;;  %v646_v40 = vld [vmem:[#allocation2 + $0x8] sm:$0xf] }
  0xeb   : > { %v640_v41 = vld [vmem:[#allocation2 + $0x10] sm:$0xe]  ;;  %v3905_v43 = vcombine.low %v646_v40, %v646_v40  ;;  %v5520_v44 = vld [vmem:[#allocation2 + $0x20] sm:$0xf]  ;;  %v632_v45 = vld [vmem:[#allocation2 + $0x14] sm:$0x1]  ;;  %v599_v46 = vsel %vm5477_vm8, %v529_v38, %v598_v34 }
  0xec   : > { %881 = vrot.lane.b32.xlu1 %v3906_v39, %s5094_s20  ;;  %v3908_v47 = vcombine.low %v5520_v44, %v5520_v44  ;;  %600 = vst [vmem:[#allocation2 + $0x28] sm:$0xf] %v599_v46  ;;  %v639_v49 = vld [vmem:[#allocation2 + $0x8] sm:$0xe]  ;;  %v5531_v51 = vld [vmem:[#allocation2 + $0x10] sm:$0xf]  ;;  %v3899_v52 = vcombine.low %v640_v41, %v632_v45 }
  0xed   : > { %879 = vrot.lane.b32.xlu0 %v3905_v43, %s5094_s20  ;;  %v5529_v50 = vld [vmem:[#allocation2 + $0x8] sm:$0xf]  ;;  %v655_v55 = vld [vmem:[#allocation2 + $0x14] sm:$0x1]  ;;  %v3891_v62 = vcombine.low %v5531_v51, %v632_v45  ;;  %v663_v5 = vld [vmem:[#allocation2 + $0x10] sm:$0xe] }
  0xee   : > { %v648_v53 = vld [vmem:[#allocation2 + $0x18] sm:$0xf]  ;;  %v662_v54 = vld [vmem:[#allocation2 + $0x8] sm:$0xe]  ;;  %v833_v7 = vrot.slane %v3899_v52, 1  ;;  %v3922_v14 = vcombine.low %v663_v5, %v655_v55  ;;  %v532_v15 = vshrl.u32 %v4142_v59, 16  ;;  %v3914_v25 = vcombine.low %v647_v37, %v655_v55 }
  0xef   : > { %v3907_v56 = vcombine.low %v648_v53, %v648_v53  ;;  %v633_v58 = vld [vmem:[#allocation2 + $0x1c] sm:$0x1]  ;;  %v641_v63 = vld [vmem:[#allocation2 + $0x18] sm:$0xe]  ;;  %v752_v19 = vshll.u32 %v3891_v62, 16  ;;  %v457_v20 = vld [vmem:[%s5410_s10 + $0x30] sm:$0xff] }
  0xf0   : > { %v631_v57 = vld [vmem:[#allocation2 + $0xc] sm:$0x1]  ;;  %885 = vrot.lane.b32.xlu1 %v3908_v47, %s5094_s20  ;;  %v5536_v6 = vld [vmem:[#allocation2 + $0x1c] sm:$0x1]  ;;  %v5539_v8 = vld [vmem:[#allocation2 + $0x18] sm:$0xf]  ;;  %v3900_v9 = vcombine.low %v641_v63, %v633_v58  ;;  %v5548_v28 = vpack.c.bf16 %v457_v20, %v457_v20 }
  0xf1   : > { %v3898_v60 = vcombine.low %v639_v49, %v631_v57  ;;  %v3890_v61 = vcombine.low %v5529_v50, %v631_v57  ;;  %v654_v4 = vld [vmem:[#allocation2 + $0xc] sm:$0x1]  ;;  %883 = vrot.lane.b32.xlu0 %v3907_v56, %s5094_s20  ;;  %v5542_v16 = vcombine.low %v648_v53, %v5536_v6  ;;  %v3892_v17 = vcombine.low %v5539_v8, %v633_v58  ;;  %v5551_v34 = vld [vmem:[#allocation2 + $0x24] sm:$0x1]  ;;  %v458_v52 = vld [vmem:[%s5410_s10 + $0x38] sm:$0xff]  ;;  %s5096_s19 = smov 32  }
  0xf2   : > { %v3913_v10 = vcombine.low %v646_v40, %v654_v4  ;;  %v3921_v11 = vcombine.low %v662_v54, %v654_v4  ;;  %v834_v18 = vrot.slane %v3900_v9, 1  ;;  %v534_v26 = vrot.slane %v532_v15, 7  ;;  %v601_v39 = vld [vmem:[#allocation2 + $0x2c] sm:$0x1]  ;;  %v604_v57 = vld [vmem:[#allocation2 + $0x30] sm:$0xf] }
  0xf3   : > { %v832_v12 = vrot.slane %v3898_v60, 1  ;;  %v745_v13 = vshll.u32 %v3890_v61, 16  ;;  %v743_v22 = vshrl.u32 %v3890_v61, 16  ;;  %v535_v27 = vshll.u32 %v4142_v59, 16  ;;  %v445_v58 = vld [vmem:[#allocation2 + $0x44] sm:$0x1] }
  0xf4   : > { %v1015_v21 = vrot.slane %v3921_v11, 1  ;;  %v922_v24 = vshll.u32 %v3913_v10, 16  ;;  %v1016_v29 = vrot.slane %v3922_v14, 1  ;;  %v750_v30 = vshrl.u32 %v3891_v62, 16  ;;  %v5567_v61 = vld [vmem:[#allocation2 + $0x14] sm:$0x1] }
  0xf5   : > { %841 = vrot.lane.b32.xlu1 %v832_v12, %s5092_s8  ;;  %843 = vrot.lane.b32.xlu0 %v833_v7, %s5092_s8  ;;  %v747_v23 = vrot.slane %v745_v13, 1  ;;  %v754_v31 = vrot.slane %v752_v19, 1  ;;  %v759_v32 = vshll.u32 %v3892_v17, 16  ;;  %v920_v36 = vshrl.u32 %v3913_v10, 16  ;;  %v607_v62 = vld [vmem:[#allocation2 + $0x34] sm:$0x1] }
  0xf6   : > { %v924_v38 = vrot.slane %v922_v24, 1  ;;  %v936_v37 = vshll.u32 %v5542_v16, 16  ;;  %v929_v40 = vshll.u32 %v3914_v25, 16  ;;  %v530_v41 = vrot.slane %v5512_v33, 4  ;;  %v664_v33 = vld [vmem:[#allocation2 + $0x18] sm:$0xe] }
  0xf7   : > { %v748_v35 = vor.u32 %v747_v23, %v743_v22  ;;  %v537_v43 = vor.u32 %v535_v27, %v534_v26  ;;  %v540_v45 = vshrl.u32 %v5548_v28, 16  ;;  %v5559_v46 = vcombine.low %v5520_v44, %v5551_v34  ;;  %v413_v44 = vld [vmem:[#allocation2 + $0x40] sm:$0x1]  ;;  %v671_v9 = vld [vmem:[#allocation2 + $0x10] sm:$0xf]  ;;  %s5097_s21 = smov 48  }
  0xf8   : > { %v755_v47 = vor.u32 %v754_v31, %v750_v30  ;;  %v757_v48 = vshrl.u32 %v3892_v17, 16  ;;  %v761_v49 = vrot.slane %v759_v32, 1  ;;  %v925_v53 = vor.u32 %v924_v38, %v920_v36  ;;  %v613_v11 = vld [vmem:[#allocation2 + $0x3c] sm:$0x1]  ;;  %v416_v12 = vld [vmem:[#allocation2 + $0x48] sm:$0x1] }
  0xf9   : > { %845 = vrot.lane.b32.xlu1 %v834_v18, %s5092_s8  ;;  %1023 = vrot.lane.b32.xlu0 %v1015_v21, %s5095_s9  ;;  %v934_v54 = vshrl.u32 %v5542_v16, 16  ;;  %v938_v55 = vrot.slane %v936_v37, 1  ;;  %v602_v56 = vsel %vm5438_vm5, %v530_v41, %v601_v39  ;;  %v927_v59 = vshrl.u32 %v3914_v25, 16  ;;  %v610_v22 = vld [vmem:[#allocation2 + $0x38] sm:$0xf]  ;;  %s5098_s16 = smov 56  }
  0xfa   : > { %603 = vst [vmem:[#allocation2 + $0x2c] sm:$0x1] %v602_v56  ;;  %v931_v60 = vrot.slane %v929_v40, 1  ;;  %v4144_v63 = vpack.c.bf16 %v458_v52, %v458_v52  ;;  %v762_v4 = vor.u32 %v761_v49, %v757_v48  ;;  %v3923_v5 = vcombine.low %v664_v33, %v5536_v6  ;;  %v5590_v30 = vld [vmem:[#allocation2 + $0x24] sm:$0x1]  ;;  %s5099_s17 = smov 64  }
  0xfb   : > { %v943_v7 = vshll.u32 %v5559_v46, 16  ;;  %v538_v10 = vrot.slane %v534_v26, 4  ;;  %v939_v13 = vor.u32 %v938_v55, %v934_v54  ;;  %v941_v14 = vshrl.u32 %v5559_v46, 16  ;;  %v5598_v40 = vld [vmem:[#allocation2 + $0x1c] sm:$0x1]  ;;  %v4662_v54 = vld [vmem:[#allocation7] sm:$0xff]  }
  0xfc   : > { %v605_v15 = vsel %vm5477_vm8, %v537_v43, %v604_v57  ;;  %v542_v16 = vrot.slane %v540_v45, 7  ;;  %v543_v17 = vshll.u32 %v5548_v28, 16  ;;  %v414_v18 = vsel %vm5438_vm5, 0, %v413_v44  ;;  %v672_v46 = vld [vmem:[#allocation2 + $0x18] sm:$0xf]  ;;  %4260 = vmatprep.subr.bf16.mxu0 %v4662_v54  ;;  %s3880_s13 = sshll.u32 %s5406_s18, 5 }
  0xfd   : > { %1025 = vrot.lane.b32.xlu1 %v1016_v29, %s5095_s9  ;;  %793 = vrot.lane.b32.xlu0 %v748_v35, %s5093_s28  ;;  %606 = vst [vmem:[#allocation2 + $0x30] sm:$0xf] %v605_v15  ;;  %v608_v6 = vsel %vm5438_vm5, %v538_v10, %v607_v62  ;;  %v932_v19 = vor.u32 %v931_v60, %v927_v59  ;;  %415 = vst [vmem:[#allocation2 + $0x40] sm:$0x1] %v414_v18  ;;  %v446_v23 = vsel %vm5448_vm7, 0, %v445_v58  ;;  %vm1223_vm10 = vcmask 64512  }
  0xfe   : > { %v5582_v20 = vcombine.low %v671_v9, %v5567_v61  ;;  %609 = vst [vmem:[#allocation2 + $0x34] sm:$0x1] %v608_v6  ;;  %v546_v21 = vrot.slane %v542_v16, 4  ;;  %v945_v24 = vrot.slane %v943_v7, 1  ;;  %v545_v25 = vor.u32 %v543_v17, %v542_v16  ;;  %447 = vst [vmem:[#allocation2 + $0x44] sm:$0x1] %v446_v23  ;;  %4261 = vmatpush3.bf16.msra.mxu0 %v4662_v54 }
  0xff   : > { %v548_v26 = vshrl.u32 %v4144_v63, 16  ;;  %v417_v27 = vsel %vm5438_vm5, 0, %v416_v12  ;;  %v1017_v28 = vrot.slane %v3923_v5, 1  ;;  %v665_v29 = vld [vmem:[#allocation2 + $0x20] sm:$0xe]  ;;  %v551_v32 = vshll.u32 %v4144_v63, 16 }
 0x100   : > { %v614_v31 = vsel %vm5438_vm5, %v546_v21, %v613_v11  ;;  %418 = vst [vmem:[#allocation2 + $0x48] sm:$0x1] %v417_v27  ;;  %v673_v35 = vld [vmem:[#allocation2 + $0x20] sm:$0xf]  ;;  %v611_v36 = vsel %vm5477_vm8, %v545_v25, %v610_v22  ;;  %v946_v37 = vor.u32 %v945_v24, %v941_v14  ;;  %v3924_v39 = vcombine.low %v665_v29, %v5551_v34  ;;  %v5611_v59 = vld [vmem:[#allocation2 + $0x24] sm:$0x1] }
 0x101   : > { %795 = vrot.lane.b32.xlu1 %v755_v47, %s5093_s28  ;;  %975 = vrot.lane.b32.xlu0 %v925_v53, %s5096_s19  ;;  %615 = vst [vmem:[#allocation2 + $0x3c] sm:$0x1] %v614_v31  ;;  %612 = vst [vmem:[#allocation2 + $0x38] sm:$0xf] %v611_v36  ;;  %v550_v38 = vrot.slane %v548_v26, 7  ;;  %v1106_v41 = vshll.u32 %v5582_v20, 16  ;;  %v3929_v43 = vcombine.low %v671_v9, %v671_v9 }
 0x102   : > { %v3939_v45 = vcombine.low %v673_v35, %v5590_v30  ;;  %v3938_v48 = vcombine.low %v672_v46, %v5598_v40  ;;  %v1018_v52 = vrot.slane %v3924_v39, 1  ;;  %v1104_v53 = vshrl.u32 %v5582_v20, 16  ;;  %v5607_v33 = vld [vmem:[#allocation2 + $0x2c] sm:$0x1]  ;;  %v5609_v58 = vld [vmem:[#allocation2 + $0x20] sm:$0xf] }
 0x103   : > { %v553_v47 = vor.u32 %v551_v32, %v550_v38  ;;  %v1108_v34 = vrot.slane %v1106_v41, 1  ;;  %v3931_v55 = vcombine.low %v673_v35, %v673_v35  ;;  %v554_v57 = vrot.slane %v550_v38, 4  ;;  %v674_v62 = vld [vmem:[#allocation2 + $0x28] sm:$0xf]  ;;  %v687_v7 = vld [vmem:[#allocation2 + $0x10] sm:$0xe] }
 0x104   : > { %v616_v49 = vld [vmem:[#allocation2 + $0x40] sm:$0xf]  ;;  %v1120_v56 = vshll.u32 %v3939_v45, 16  ;;  %v1113_v63 = vshll.u32 %v3938_v48, 16  ;;  %v3940_v5 = vcombine.low %v674_v62, %v5607_v33  ;;  %v1118_v11 = vshrl.u32 %v3939_v45, 16  ;;  %v4664_v24 = vld [vmem:[#allocation7 + $0x10] sm:$0xff]  }
 0x105   : > { %797 = vrot.lane.b32.xlu1 %v762_v4, %s5093_s28  ;;  %979 = vrot.lane.b32.xlu0 %v939_v13, %s5096_s19  ;;  %v619_v44 = vld [vmem:[#allocation2 + $0x44] sm:$0x1]  ;;  %v617_v60 = vsel %vm5477_vm8, %v553_v47, %v616_v49  ;;  %v3930_v4 = vcombine.low %v672_v46, %v672_v46  ;;  %v1109_v10 = vor.u32 %v1108_v34, %v1104_v53  ;;  %v4663_v13 = vld [vmem:[#allocation7 + $0x8] sm:$0xff]   ;;  %v1111_v15 = vshrl.u32 %v3938_v48, 16  ;;  %v5628_v20 = vld [vmem:[#allocation2 + $0x30] sm:$0xf] }
 0x106   : > { %618 = vst [vmem:[#allocation2 + $0x40] sm:$0xf] %v617_v60  ;;  %v620_v9 = vsel %vm5438_vm5, %v554_v57, %v619_v44  ;;  %v1122_v42 = vrot.slane %v1120_v56, 1  ;;  %v3893_v12 = vcombine.low %v5609_v58, %v5611_v59  ;;  %v5622_v14 = vld [vmem:[#allocation2 + $0x28] sm:$0xf]  ;;  %v1115_v16 = vrot.slane %v1113_v63, 1  ;;  %4262 = vmatprep.subr.bf16.mxu0 %v4663_v13  ;;  %vm5768_vm5 = vmand %vm1570_vm3, %vm419_vm4 }
 0x107   : > { %621 = vst [vmem:[#allocation2 + $0x44] sm:$0x1] %v620_v9  ;;  %v3945_v6 = vcombine.low %v687_v7, %v5567_v61  ;;  %v5625_v17 = vld [vmem:[#allocation2 + $0x2c] sm:$0x1]  ;;  %v3932_v18 = vcombine.low %v674_v62, %v674_v62  ;;  %v636_v21 = vld [vmem:[#allocation2 + $0x34] sm:$0x1]  ;;  %4263 = vmatpush3.bf16.msra.mxu0 %v4663_v13 }
 0x108   : > { %v448_v1 = vld [vmem:[#allocation2 + $0x4c] sm:$0x1]  ;;  %v1123_v22 = vor.u32 %v1122_v42, %v1118_v11  ;;  %v766_v23 = vshll.u32 %v3893_v12, 16  ;;  %v688_v25 = vld [vmem:[#allocation2 + $0x18] sm:$0xe]  ;;  %v1116_v61 = vor.u32 %v1115_v16, %v1111_v15  ;;  %v764_v27 = vshrl.u32 %v3893_v12, 16  ;;  %4264 = vmatprep.subr.bf16.mxu0 %v4664_v24 }
 0x109   : > { %977 = vrot.lane.b32.xlu1 %v932_v19, %s5096_s19  ;;  %1027 = vrot.lane.b32.xlu0 %v1017_v28, %s5095_s9  ;;  %v1127_v19 = vshll.u32 %v3940_v5, 16  ;;  %v1199_v26 = vrot.slane %v3945_v6, 1  ;;  %v689_v28 = vld [vmem:[#allocation2 + $0x20] sm:$0xe]  ;;  %v3894_v29 = vcombine.low %v5622_v14, %v5625_v17  ;;  %v1125_v31 = vshrl.u32 %v3940_v5, 16  ;;  %s377_s29 = scalar_lea.vmem [#allocation16], %s3880_s13 }
 0x10a   : > { %v3895_v35 = vcombine.low %v5628_v20, %v636_v21  ;;  %v449_v36 = vsel %vm5448_vm7, 0, %v448_v1  ;;  %v768_v38 = vrot.slane %v766_v23, 1  ;;  %v3946_v39 = vcombine.low %v688_v25, %v5598_v40  ;;  %v5642_v45 = vld [vmem:[#allocation2 + $0x3c] sm:$0x1]  ;;  %v690_v46 = vld [vmem:[#allocation2 + $0x28] sm:$0xe] }
 0x10b   : > { %v1129_v32 = vrot.slane %v1127_v19, 1  ;;  %4265 = vmatpush3.bf16.msra.mxu0 %v4664_v24  ;;  %450 = vst [vmem:[#allocation2 + $0x4c] sm:$0x1] %v449_v36  ;;  %v3947_v41 = vcombine.low %v689_v28, %v5590_v30  ;;  %v773_v47 = vshll.u32 %v3894_v29, 16  ;;  %v642_v49 = vld [vmem:[#allocation2 + $0x20] sm:$0xe]  ;;  %v3948_v56 = vcombine.low %v690_v46, %v5607_v33 }
 0x10c   : > { %v780_v48 = vshll.u32 %v3895_v35, 16  ;;  %v769_v40 = vor.u32 %v768_v38, %v764_v27  ;;  %v4666_v53 = vld [vmem:[#allocation7 + $0x20] ss:$0 sps:$4 sm:$0xff]   ;;  %v1200_v34 = vrot.slane %v3946_v39, 1  ;;  %v3901_v57 = vcombine.low %v642_v49, %v5611_v59  ;;  %v643_v12 = vld [vmem:[#allocation2 + $0x28] sm:$0xe] }
 0x10d   : > { %981 = vrot.lane.b32.xlu1 %v946_v37, %s5096_s19  ;;  %1063 = vrot.lane.b32.xlu0 %v3929_v43, %s5097_s21  ;;  %v4665_v37 = vld [vmem:[#allocation7 + $0x18] sm:$0xff]   ;;  %v1130_v3 = vor.u32 %v1129_v32, %v1125_v31  ;;  %v1201_v54 = vrot.slane %v3947_v41, 1  ;;  %v775_v60 = vrot.slane %v773_v47, 1  ;;  %v778_v62 = vshrl.u32 %v3895_v35, 16  ;;  %v658_v13 = vld [vmem:[#allocation2 + $0x2c] sm:$0x1] }
 0x10e   : > { %v5640_v43 = vld [vmem:[#allocation2 + $0x38] sm:$0xf]  ;;  %4266 = vmatprep.subr.bf16.mxu0 %v4665_v37  ;;  %v782_v63 = vrot.slane %v780_v48, 1  ;;  %v1445_v5 = vsel %vm1443_vm9, %v4666_v53, 0  ;;  %v1202_v7 = vrot.slane %v3948_v56, 1  ;;  %v835_v9 = vrot.slane %v3901_v57, 1 }
 0x10f   : > { %4267 = vmatpush3.bf16.msra.mxu0 %v4665_v37  ;;  %v3896_v30 = vcombine.low %v5640_v43, %v5642_v45  ;;  %v650_v15 = vld [vmem:[#allocation2 + $0x28] sm:$0xf]  ;;  %v645_v16 = vld [vmem:[#allocation2 + $0x38] sm:$0xe]  ;;  %v3902_v1 = vcombine.low %v643_v12, %v5625_v17  ;;  %v660_v19 = vld [vmem:[#allocation2 + $0x3c] sm:$0x1] }
 0x110   : > { %4478 = vmatprep.subr.msk.bf16.mxu0 %vm1443_vm9, %v4666_v53  ;;  %v783_v59 = vor.u32 %v782_v63, %v778_v62  ;;  %v652_v23 = vld [vmem:[#allocation2 + $0x38] sm:$0xf]  ;;  %v3909_v24 = vcombine.low %v650_v15, %v650_v15  ;;  %v651_v27 = vld [vmem:[#allocation2 + $0x30] sm:$0xf]  ;;  %v661_v35 = vld [vmem:[#allocation2 + $0x44] sm:$0x1] }
 0x111   : > { %1029 = vrot.lane.b32.xlu1 %v1018_v52, %s5095_s9  ;;  %1067 = vrot.lane.b32.xlu0 %v3931_v55, %s5097_s21  ;;  %v644_v52 = vld [vmem:[#allocation2 + $0x30] sm:$0xe]  ;;  %v771_v55 = vshrl.u32 %v3894_v29, 16  ;;  %v785_v11 = vshrl.u32 %v3896_v30, 16  ;;  %v3919_v25 = vcombine.low %v652_v23, %v660_v19  ;;  %v3911_v29 = vcombine.low %v652_v23, %v652_v23  ;;  %v653_v38 = vld [vmem:[#allocation2 + $0x40] sm:$0xf] }
 0x112   : > { %v3903_v44 = vcombine.low %v644_v52, %v636_v21  ;;  %v836_v21 = vrot.slane %v3902_v1, 1  ;;  %v3910_v37 = vcombine.low %v651_v27, %v651_v27  ;;  %v3920_v39 = vcombine.low %v653_v38, %v661_v35  ;;  %v666_v47 = vld [vmem:[#allocation2 + $0x28] sm:$0xe]  ;;  %v683_v62 = vld [vmem:[#allocation2 + $0x34] sm:$0x1]  ;;  %s3730_s14 = sshll.u32 %s377_s29, 4  ;;  %s6129_s14 = int_to_ptr.vmem [resolvable:$true] %s3730_s14 }
 0x113   : > { %4269 = vmatpush3.bf16.msra.mxu0 %v1445_v5  ;;  %v776_v33 = vor.u32 %v775_v60, %v771_v55  ;;  %v964_v36 = vshll.u32 %v3919_v25, 16  ;;  %v962_v46 = vshrl.u32 %v3919_v25, 16  ;;  %v3912_v48 = vcombine.low %v653_v38, %v653_v38  ;;  %v667_v60 = vld [vmem:[#allocation2 + $0x30] sm:$0xe]  ;;  %v686_v23 = vld [vmem:[#allocation2 + $0x4c] sm:$0x1] }
 0x114   : > { %v3925_v53 = vcombine.low %v666_v47, %v658_v13  ;;  %v969_v55 = vshrl.u32 %v3920_v39, 16  ;;  %v675_v5 = vld [vmem:[#allocation2 + $0x30] sm:$0xf]  ;;  %v678_v25 = vld [vmem:[#allocation2 + $0x48] sm:$0xf]  ;;  %vm1248_vm11 = vcmask 130048  }
 0x115   : > { %1065 = vrot.lane.b32.xlu1 %v3930_v4, %s5097_s21  ;;  %1159 = vrot.lane.b32.xlu0 %v1109_v10, %s5098_s16  ;;  %v787_v4 = vshll.u32 %v3896_v30, 16  ;;  %v837_v10 = vrot.slane %v3903_v44, 1  ;;  %v3933_v12 = vcombine.low %v675_v5, %v675_v5  ;;  %vm1265_vm12 = vcmask 195584   ;;  %s4161_s22 = sshll.u32 %s5163_s30, 9  ;;  %p6223_p9 = scmp.ne.s32.totalorder %s6197_s12, 0 }
 0x116   : > { %v1019_v57 = vrot.slane %v3925_v53, 1  ;;  %vm1282_vm13 = vcmask 261120   ;;  %vm1299_vm14 = vcmask 326656   ;;  %vm1316_vm15 = vcmask 392192   ;;  %s5100_s30 = smov [#allocation16]  }
 0x117   : > { %v789_v42 = vrot.slane %v787_v4, 1  ;;  %vm1333_vm0 = vcmask 457728   ;;  %vm1350_vm1 = vcmask 523264   ;;  %vm1430_vm2 = vcmask 588800  }
 0x118   : > { %vm1568_vm7 = vcmask 257024   ;;  %vm1822_vm8 = vsmask.f32 7440 }
 0x119   : > { %1069 = vrot.lane.b32.xlu1 %v3932_v18, %s5097_s21  ;;  %1163 = vrot.lane.b32.xlu0 %v1123_v22, %s5098_s16  ;;  %v790_v6 = vor.u32 %v789_v42, %v785_v11  ;;  %v3917_v18 = vcombine.low %v650_v15, %v658_v13  ;;  %v3904_v22 = vcombine.low %v645_v16, %v5642_v45  ;;  %v677_v42 = vld [vmem:[#allocation2 + $0x40] sm:$0xf]  ;;  %v684_v15 = vld [vmem:[#allocation2 + $0x3c] sm:$0x1]  ;;  %vm5833_vm3 = vmand %vm1568_vm7, %vm419_vm4  ;;  %vm1821_vm4 = vsmask.f32 3328 }
 0x11a   : > { %1569 = vst.msk [vmem:[#allocation3] sm:$0xf] %vm1568_vm7, %v5091_v0  ;;  %1573 = vst.msk [vmem:[#allocation3 + $0x48] sm:$0xf] %vm1568_vm7, %v5091_v0 }
 0x11b   : > { %v838_v17 = vrot.slane %v3904_v22, 1  ;;  %v948_v31 = vshrl.u32 %v3917_v18, 16  ;;  %vm5870_vm9 = vmor %vm1821_vm4, %vm1822_vm8 }
 0x11d   : > { %1161 = vrot.lane.b32.xlu1 %v1116_v61, %s5098_s16  ;;  %1207 = vrot.lane.b32.xlu0 %v1199_v26, %s5099_s17  ;;  %v659_v61 = vld [vmem:[#allocation2 + $0x34] sm:$0x1]  ;;  %v950_v26 = vshll.u32 %v3917_v18, 16 }
 0x11e   : > { %v3918_v28 = vcombine.low %v651_v27, %v659_v61  ;;  %v3926_v4 = vcombine.low %v667_v60, %v659_v61 }
 0x11f   : > { %v952_v32 = vrot.slane %v950_v26, 1  ;;  %v3944_v26 = vcombine.low %v678_v25, %v686_v23 }
 0x120   : > { %v957_v41 = vshll.u32 %v3918_v28, 16  ;;  %v955_v49 = vshrl.u32 %v3918_v28, 16 }
 0x121   : > { %1165 = vrot.lane.b32.xlu1 %v1130_v3, %s5098_s16  ;;  %799 = vrot.lane.b32.xlu0 %v769_v40, %s5093_s28  ;;  %v953_v45 = vor.u32 %v952_v32, %v948_v31  ;;  %v966_v3 = vrot.slane %v964_v36, 1  ;;  %v971_v40 = vshll.u32 %v3920_v39, 16  ;;  %v691_v31 = vld [vmem:[#allocation2 + $0x30] sm:$0xe]  ;;  %v3936_v32 = vcombine.low %v678_v25, %v678_v25 }
 0x122   : > { %v959_v52 = vrot.slane %v957_v41, 1  ;;  %v1155_v38 = vshll.u32 %v3944_v26, 16  ;;  %v3949_v39 = vcombine.low %v691_v31, %v683_v62  ;;  %v693_v41 = vld [vmem:[#allocation2 + $0x40] sm:$0xe] }
 0x123   : > { %v967_v30 = vor.u32 %v966_v3, %v962_v46  ;;  %v973_v56 = vrot.slane %v971_v40, 1  ;;  %v1153_v3 = vshrl.u32 %v3944_v26, 16 }
 0x124   : > { %v1157_v47 = vrot.slane %v1155_v38, 1 }
 0x125   : > { %1209 = vrot.lane.b32.xlu1 %v1200_v34, %s5099_s17  ;;  %1211 = vrot.lane.b32.xlu0 %v1201_v54, %s5099_s17  ;;  %v668_v34 = vld [vmem:[#allocation2 + $0x38] sm:$0xe]  ;;  %v960_v54 = vor.u32 %v959_v52, %v955_v49  ;;  %v974_v63 = vor.u32 %v973_v56, %v969_v55 }
 0x126   : > { %v3927_v44 = vcombine.low %v668_v34, %v660_v19  ;;  %v3935_v19 = vcombine.low %v677_v42, %v677_v42  ;;  %v692_v52 = vld [vmem:[#allocation2 + $0x38] sm:$0xe] }
 0x127   : > { %v3950_v53 = vcombine.low %v692_v52, %v684_v15 }
 0x129   : > { %801 = vrot.lane.b32.xlu1 %v776_v33, %s5093_s28  ;;  %803 = vrot.lane.b32.xlu0 %v783_v59, %s5093_s28  ;;  %v685_v33 = vld [vmem:[#allocation2 + $0x44] sm:$0x1]  ;;  %v1020_v59 = vrot.slane %v3926_v4, 1 }
 0x12a   : > { %v3943_v13 = vcombine.low %v677_v42, %v685_v33  ;;  %v3951_v49 = vcombine.low %v693_v41, %v685_v33 }
 0x12c   : > { %v1146_v28 = vshrl.u32 %v3943_v13, 16  ;;  %v1205_v34 = vrot.slane %v3951_v49, 1 }
 0x12d   : > { %1213 = vrot.lane.b32.xlu1 %v1202_v7, %s5099_s17  ;;  %847 = vrot.lane.b32.xlu0 %v835_v9, %s5092_s8  ;;  %v1021_v7 = vrot.slane %v3927_v44, 1  ;;  %v3941_v9 = vcombine.low %v675_v5, %v683_v62 }
 0x12f   : > { %v1134_v16 = vshll.u32 %v3941_v9, 16 }
 0x131   : > { %805 = vrot.lane.b32.xlu1 %v790_v6, %s5093_s28  ;;  %851 = vrot.lane.b32.xlu0 %v837_v10, %s5092_s8  ;;  %v669_v10 = vld [vmem:[#allocation2 + $0x40] sm:$0xe]  ;;  %v676_v6 = vld [vmem:[#allocation2 + $0x38] sm:$0xf]  ;;  %v1136_v22 = vrot.slane %v1134_v16, 1  ;;  %s6134_s28 = scalar_lea.hbm %s6187_s7, %s4161_s22 }
 0x132   : > { %v3928_v11 = vcombine.low %v669_v10, %v661_v35  ;;  %v3942_v18 = vcombine.low %v676_v6, %v684_v15  ;;  %v3934_v61 = vcombine.low %v676_v6, %v676_v6 }
 0x134   : > { %v1022_v1 = vrot.slane %v3928_v11, 1  ;;  %v1141_v27 = vshll.u32 %v3942_v18, 16  ;;  %v1139_v35 = vshrl.u32 %v3942_v18, 16 }
 0x135   : > { %849 = vrot.lane.b32.xlu1 %v836_v21, %s5092_s8  ;;  %887 = vrot.lane.b32.xlu0 %v3909_v24, %s5094_s20  ;;  %v1132_v21 = vshrl.u32 %v3941_v9, 16  ;;  %v1148_v24 = vshll.u32 %v3943_v13, 16 }
 0x136   : > { %v1143_v36 = vrot.slane %v1141_v27, 1 }
 0x138   : > { %v1144_v46 = vor.u32 %v1143_v36, %v1139_v35 }
 0x139   : > { %853 = vrot.lane.b32.xlu1 %v838_v17, %s5092_s8  ;;  %891 = vrot.lane.b32.xlu0 %v3911_v29, %s5094_s20  ;;  %v1137_v17 = vor.u32 %v1136_v22, %v1132_v21  ;;  %v1150_v29 = vrot.slane %v1148_v24, 1  ;;  %v4801_v22 = vld [vmem:[#allocation2] sm:$0xf] }
 0x13d   : > { %889 = vrot.lane.b32.xlu1 %v3910_v37, %s5094_s20  ;;  %983 = vrot.lane.b32.xlu0 %v953_v45, %s5096_s19  ;;  %v1151_v37 = vor.u32 %v1150_v29, %v1146_v28 }
 0x141   : > { %893 = vrot.lane.b32.xlu1 %v3912_v48, %s5094_s20  ;;  %987 = vrot.lane.b32.xlu0 %v967_v30, %s5096_s19  ;;  %v1203_v48 = vrot.slane %v3949_v39, 1  ;;  %v1158_v30 = vor.u32 %v1157_v47, %v1153_v3  ;;  %s3717_s20 = scalar_lea.sflag [#allocation6], %s5406_s18 }
 0x145   : > { %985 = vrot.lane.b32.xlu1 %v960_v54, %s5096_s19  ;;  %1031 = vrot.lane.b32.xlu0 %v1019_v57, %s5095_s9  ;;  %v694_v54 = vld [vmem:[#allocation2 + $0x48] sm:$0xe]  ;;  %v1204_v57 = vrot.slane %v3950_v53, 1 }
 0x146   : > { %v3952_v44 = vcombine.low %v694_v54, %v686_v23 }
 0x149   : > { %989 = vrot.lane.b32.xlu1 %v974_v63, %s5096_s19  ;;  %1035 = vrot.lane.b32.xlu0 %v1021_v7, %s5095_s9  ;;  %v1206_v63 = vrot.slane %v3952_v44, 1  ;;  %s5004_s19 = sshll.u32 %s5100_s30, 4  ;;  %s5005_s19 = int_to_ptr.vmem [resolvable:$false] %s5004_s19 }
 0x14a   : > { %p5007_p1 = scmp.lt.s32.totalorder %s6129_s14, %s5005_s19 }
 0x14d   : > { %1033 = vrot.lane.b32.xlu1 %v1020_v59, %s5095_s9  ;;  %1071 = vrot.lane.b32.xlu0 %v3933_v12, %s5097_s21 }
 0x151   : > { %1037 = vrot.lane.b32.xlu1 %v1022_v1, %s5095_s9  ;;  %1075 = vrot.lane.b32.xlu0 %v3935_v19, %s5097_s21  ;;  %s5000_s9 = scalar_lea.vmem %s6129_s14, 512 }
 0x152   : > { %p5001_p6 = scmp.ne.s32.totalorder %s6129_s14, %s5000_s9 }
 0x154   : > { %p5002_p12 = pnand %p5001_p6, %p6223_p9 }
 0x155   : > { %1073 = vrot.lane.b32.xlu1 %v3934_v61, %s5097_s21  ;;  %1167 = vrot.lane.b32.xlu0 %v1137_v17, %s5098_s16 }
 0x156   : > { %v840_v45 = vpop.permute.xlu0 %839  ;;  %p5003_p13 = pneg %p5002_p12 }
 0x159   : > { %1077 = vrot.lane.b32.xlu1 %v3936_v32, %s5097_s21  ;;  %1171 = vrot.lane.b32.xlu0 %v1151_v37, %s5098_s16  ;;  %s5006_s21 = scalar_lea.vmem %s5005_s19, 1024 }
 0x15a   : > { %p5008_p3 = scmp.lt.s32.totalorder %s5006_s21, %s5000_s9 }
 0x15b   : > { %v792_v40 = vpop.permute.xlu0 %791 }
 0x15c   : > { %v1226_v23 = vsel %vm1223_vm10, %v4801_v22, %v792_v40  ;;  %p5009_p2 = por %p5008_p3, %p5007_p1 }
 0x15d   : > { %1169 = vrot.lane.b32.xlu1 %v1144_v46, %s5098_s16  ;;  %1215 = vrot.lane.b32.xlu0 %v1203_v48, %s5099_s17  ;;  %v1250_v26 = vsel %vm1248_vm11, %v1226_v23, %v840_v45 }
 0x15e   : > { %v882_v55 = vpop.permute.xlu1 %881  ;;  %p5010_p8 = pnand %p5009_p2, %p5003_p13 }
 0x15f   : > { %v880_v56 = vpop.permute.xlu0 %879 }
 0x160   : > { %v1267_v29 = vsel %vm1265_vm12, %v1250_v26, %v880_v56 }
 0x161   : > { %1173 = vrot.lane.b32.xlu1 %v1158_v30, %s5098_s16  ;;  %1219 = vrot.lane.b32.xlu0 %v1205_v34, %s5099_s17 }
 0x162   : > { %v5686_v60 = vpop.permute.xlu1 %885 }
 0x163   : > { %v884_v62 = vpop.permute.xlu0 %883 }
 0x165   : > { %1217 = vrot.lane.b32.xlu1 %v1204_v57, %s5099_s17 }
 0x167   : > { %v842_v4 = vpop.permute.xlu1 %841  ;;  %v844_v5 = vpop.permute.xlu0 %843 }
 0x169   : > { %1221 = vrot.lane.b32.xlu1 %v1206_v63, %s5099_s17 }
 0x16b   : > { %v846_v7 = vpop.permute.xlu1 %845  ;;  %v1024_v9 = vpop.permute.xlu0 %1023 }
 0x16f   : > { %v1026_v10 = vpop.permute.xlu1 %1025  ;;  %v794_v33 = vpop.permute.xlu0 %793 }
 0x170   : > { %v1229_v24 = vsel %vm1223_vm10, %v5529_v50, %v794_v33 }
 0x171   : > { %v1252_v27 = vsel %vm1248_vm11, %v1229_v24, %v842_v4 }
 0x172   : > { %v1269_v31 = vsel %vm1265_vm12, %v1252_v27, %v882_v55 }
 0x173   : > { %v796_v59 = vpop.permute.xlu1 %795  ;;  %v976_v11 = vpop.permute.xlu0 %975 }
 0x174   : > { %v1284_v32 = vsel %vm1282_vm13, %v1267_v29, %v976_v11  ;;  %v1232_v38 = vsel %vm1223_vm10, %v5531_v51, %v796_v59 }
 0x175   : > { %v1301_v39 = vsel %vm1299_vm14, %v1284_v32, %v1024_v9  ;;  %v1254_v49 = vsel %vm1248_vm11, %v1232_v38, %v844_v5 }
 0x176   : > { %v1271_v53 = vsel %vm1265_vm12, %v1254_v49, %v884_v62 }
 0x177   : > { %v798_v42 = vpop.permute.xlu1 %797  ;;  %v980_v12 = vpop.permute.xlu0 %979 }
 0x178   : > { %v1235_v37 = vsel %vm1223_vm10, %v5539_v8, %v798_v42  ;;  %v1288_v55 = vsel %vm1282_vm13, %v1271_v53, %v980_v12 }
 0x179   : > { %v1256_v51 = vsel %vm1248_vm11, %v1235_v37, %v846_v7 }
 0x17a   : > { %v1273_v34 = vsel %vm1265_vm12, %v1256_v51, %v5686_v60 }
 0x17b   : > { %v978_v13 = vpop.permute.xlu1 %977  ;;  %v1028_v15 = vpop.permute.xlu0 %1027 }
 0x17c   : > { %v1286_v35 = vsel %vm1282_vm13, %v1269_v31, %v978_v13  ;;  %v1305_v44 = vsel %vm1299_vm14, %v1288_v55, %v1028_v15 }
 0x17d   : > { %v1303_v41 = vsel %vm1299_vm14, %v1286_v35, %v1026_v10 }
 0x17f   : > { %v982_v16 = vpop.permute.xlu1 %981  ;;  %v1064_v6 = vpop.permute.xlu0 %1063 }
 0x180   : > { %v1318_v45 = vsel %vm1316_vm15, %v1301_v39, %v1064_v6  ;;  %v1290_v56 = vsel %vm1282_vm13, %v1273_v34, %v982_v16 }
 0x183   : > { %v1030_v1 = vpop.permute.xlu1 %1029  ;;  %v1068_v18 = vpop.permute.xlu0 %1067 }
 0x184   : > { %v1307_v63 = vsel %vm1299_vm14, %v1290_v56, %v1030_v1  ;;  %v1322_v4 = vsel %vm1316_vm15, %v1305_v44, %v1068_v18 }
 0x187   : > { %v1066_v19 = vpop.permute.xlu1 %1065  ;;  %v1160_v21 = vpop.permute.xlu0 %1159 }
 0x188   : > { %v1320_v46 = vsel %vm1316_vm15, %v1303_v41, %v1066_v19  ;;  %v1335_v3 = vsel %vm1333_vm0, %v1318_v45, %v1160_v21 }
 0x18b   : > { %v1070_v25 = vpop.permute.xlu1 %1069  ;;  %v1164_v61 = vpop.permute.xlu0 %1163 }
 0x18c   : > { %v1324_v5 = vsel %vm1316_vm15, %v1307_v63, %v1070_v25  ;;  %v1339_v62 = vsel %vm1333_vm0, %v1322_v4, %v1164_v61 }
 0x18f   : > { %v1162_v17 = vpop.permute.xlu1 %1161  ;;  %v1208_v28 = vpop.permute.xlu0 %1207 }
 0x190   : > { %v1337_v47 = vsel %vm1333_vm0, %v1320_v46, %v1162_v17  ;;  %v1352_v8 = vsel %vm1350_vm1, %v1335_v3, %v1208_v28 }
 0x193   : > { %v1166_v50 = vpop.permute.xlu1 %1165  ;;  %v800_v36 = vpop.permute.xlu0 %799 }
 0x194   : > { %v1341_v60 = vsel %vm1333_vm0, %v1324_v5, %v1166_v50  ;;  %v1238_v35 = vsel %vm1223_vm10, %v5609_v58, %v800_v36 }
 0x197   : > { %v1210_v48 = vpop.permute.xlu1 %1209  ;;  %v1212_v40 = vpop.permute.xlu0 %1211 }
 0x198   : > { %v1354_v52 = vsel %vm1350_vm1, %v1337_v47, %v1210_v48  ;;  %v1356_v9 = vsel %vm1350_vm1, %v1339_v62, %v1212_v40 }
 0x199   : > { %v3954_v30 = vcombine.low %v1352_v8, %v1354_v52 }
 0x19b   : > { %v802_v54 = vpop.permute.xlu1 %801  ;;  %4270 = vmatprep.mubr.msk.bf16.mxu0 %vm1430_vm2, %v3954_v30  ;;  %v804_v57 = vpop.permute.xlu0 %803 }
 0x19c   : > { %v1241_v50 = vsel %vm1223_vm10, %v5622_v14, %v802_v54  ;;  %v1244_v39 = vsel %vm1223_vm10, %v5628_v20, %v804_v57 }
 0x19f   : > { %v1214_v7 = vpop.permute.xlu1 %1213  ;;  %v848_v33 = vpop.permute.xlu0 %847 }
 0x1a0   : > { %v1358_v10 = vsel %vm1350_vm1, %v1341_v60, %v1214_v7  ;;  %v1258_v38 = vsel %vm1248_vm11, %v1238_v35, %v848_v33  ;;  %v4668_v35 = vld [vmem:[#allocation10 + $0x18] sm:$0xff]  }
 0x1a1   : > { %v3955_v59 = vcombine.low %v1356_v9, %v1358_v10 }
 0x1a3   : > { %v806_v11 = vpop.permute.xlu1 %805  ;;  %4271 = vmatmul.mubr.msk.bf16.vlgmr.msra.gmra.mrb[0].mxu0 %vm1430_vm2, %v3955_v59  ;;  %v852_v42 = vpop.permute.xlu0 %851 }
 0x1a4   : > { %v1247_v14 = vsel %vm1223_vm10, %v5640_v43, %v806_v11  ;;  %v1262_v49 = vsel %vm1248_vm11, %v1244_v39, %v852_v42  ;;  %v1586_v42 = vld [vmem:[#allocation3 + $0x18] sm:$0x1]  ;;  %vm2175_vm10 = vcmask 1042432  }
 0x1a7   : > { %v850_v12 = vpop.permute.xlu1 %849  ;;  %v888_v13 = vpop.permute.xlu0 %887 }
 0x1a8   : > { %v1260_v37 = vsel %vm1248_vm11, %v1241_v50, %v850_v12  ;;  %v1275_v41 = vsel %vm1265_vm12, %v1258_v38, %v888_v13  ;;  %v1617_v12 = vld [vmem:[#allocation3 + $0x1c] sm:$0x1]  ;;  %v1587_v13 = vsel %vm5443_vm6, 0, %v1586_v42  ;;  %v1598_v38 = vld [vmem:[#allocation3 + $0x38] sm:$0x1] }
 0x1a9   : > { %1588 = vst [vmem:[#allocation3 + $0x18] sm:$0x1] %v1587_v13  ;;  %v5798_v50 = vld [vmem:[#allocation10] sm:$0xff]   ;;  %v1599_v39 = vsel %vm5443_vm6, 0, %v1598_v38 }
 0x1aa   : > { %1600 = vst [vmem:[#allocation3 + $0x38] sm:$0x1] %v1599_v39 }
 0x1ab   : > { %v854_v15 = vpop.permute.xlu1 %853  ;;  %v892_v16 = vpop.permute.xlu0 %891 }
 0x1ac   : > { %v1264_v20 = vsel %vm1248_vm11, %v1247_v14, %v854_v15  ;;  %v1279_v52 = vsel %vm1265_vm12, %v1262_v49, %v892_v16  ;;  %v1618_v15 = vsel %vm5768_vm5, 0, %v1617_v12  ;;  %v1580_v16 = vld [vmem:[#allocation3 + $0x8] sm:$0x1]  ;;  %v1632_v14 = vld [vmem:[#allocation3 + $0x44] sm:$0x1]  ;;  %vm2176_vm11 = vcmask 1046532  }
 0x1ad   : > { %1619 = vst [vmem:[#allocation3 + $0x1c] sm:$0x1] %v1618_v15  ;;  %v1595_v49 = vld [vmem:[#allocation3 + $0x30] sm:$0x1] }
 0x1af   : > { %v890_v6 = vpop.permute.xlu1 %889  ;;  %v984_v1 = vpop.permute.xlu0 %983 }
 0x1b0   : > { %v1277_v45 = vsel %vm1265_vm12, %v1260_v37, %v890_v6  ;;  %v1292_v47 = vsel %vm1282_vm13, %v1275_v41, %v984_v1  ;;  %v1611_v6 = vld [vmem:[#allocation3 + $0xc] sm:$0x1]  ;;  %v1581_v1 = vsel %vm5443_vm6, 0, %v1580_v16  ;;  %v1629_v37 = vld [vmem:[#allocation3 + $0x3c] sm:$0x1] }
 0x1b1   : > { %1582 = vst [vmem:[#allocation3 + $0x8] sm:$0x1] %v1581_v1  ;;  %v1630_v41 = vsel %vm5768_vm5, 0, %v1629_v37 }
 0x1b2   : > { %1631 = vst [vmem:[#allocation3 + $0x3c] sm:$0x1] %v1630_v41 }
 0x1b3   : > { %v894_v18 = vpop.permute.xlu1 %893  ;;  %v988_v19 = vpop.permute.xlu0 %987 }
 0x1b4   : > { %v1281_v40 = vsel %vm1265_vm12, %v1264_v20, %v894_v18  ;;  %v1296_v34 = vsel %vm1282_vm13, %v1279_v52, %v988_v19  ;;  %v1612_v18 = vsel %vm5768_vm5, 0, %v1611_v6  ;;  %v1589_v19 = vld [vmem:[#allocation3 + $0x20] sm:$0x1]  ;;  %v1626_v20 = vld [vmem:[#allocation3 + $0x34] sm:$0x1]  ;;  %v5817_v52 = vld [vmem:[#allocation10 + $0x30] sm:$0xff]  }
 0x1b5   : > { %1613 = vst [vmem:[#allocation3 + $0xc] sm:$0x1] %v1612_v18  ;;  %v1590_v0 = vsel %vm5443_vm6, 0, %v1589_v19  ;;  %vm5918_vm12 = vmor %vm2175_vm10, %vm2176_vm11 }
 0x1b6   : > { %1591 = vst [vmem:[#allocation3 + $0x20] sm:$0x1] %v1590_v0 }
 0x1b7   : > { %v986_v21 = vpop.permute.xlu1 %985  ;;  %v1032_v22 = vpop.permute.xlu0 %1031 }
 0x1b8   : > { %v1294_v58 = vsel %vm1282_vm13, %v1277_v45, %v986_v21  ;;  %v1309_v36 = vsel %vm1299_vm14, %v1292_v47, %v1032_v22  ;;  %v1620_v21 = vld [vmem:[#allocation3 + $0x24] sm:$0x1]  ;;  %v1592_v45 = vld [vmem:[#allocation3 + $0x28] sm:$0x1] }
 0x1b9   : > { %v1621_v22 = vsel %vm5768_vm5, 0, %v1620_v21 }
 0x1ba   : > { %1622 = vst [vmem:[#allocation3 + $0x24] sm:$0x1] %v1621_v22 }
 0x1bb   : > { %v990_v23 = vpop.permute.xlu1 %989  ;;  %v1036_v24 = vpop.permute.xlu0 %1035 }
 0x1bc   : > { %v1298_v54 = vsel %vm1282_vm13, %v1281_v40, %v990_v23  ;;  %v1313_v57 = vsel %vm1299_vm14, %v1296_v34, %v1036_v24  ;;  %v1583_v23 = vld [vmem:[#allocation3 + $0x10] sm:$0x1]  ;;  %v1614_v24 = vld [vmem:[#allocation3 + $0x14] sm:$0x1]  ;;  %v1756_v41 = vld [vmem:[#allocation3 + $0xc] sm:$0x1] }
 0x1bd   : > { %v5820_v40 = vld [vmem:[#allocation9] ss:$0 sm:$0xff] }
 0x1bf   : > { %v1034_v25 = vpop.permute.xlu1 %1033  ;;  %v1072_v61 = vpop.permute.xlu0 %1071 }
 0x1c0   : > { %v1311_v48 = vsel %vm1299_vm14, %v1294_v58, %v1034_v25  ;;  %v1326_v51 = vsel %vm1316_vm15, %v1309_v36, %v1072_v61  ;;  %v1584_v25 = vsel %vm5443_vm6, 0, %v1583_v23  ;;  %v1615_v61 = vsel %vm5768_vm5, 0, %v1614_v24  ;;  %v1601_v58 = vld [vmem:[#allocation3 + $0x40] sm:$0x1] }
 0x1c1   : > { %1585 = vst [vmem:[#allocation3 + $0x10] sm:$0x1] %v1584_v25  ;;  %1616 = vst [vmem:[#allocation3 + $0x14] sm:$0x1] %v1615_v61  ;;  %v1602_v36 = vsel %vm5443_vm6, 0, %v1601_v58 }
 0x1c2   : > { %1603 = vst [vmem:[#allocation3 + $0x40] sm:$0x1] %v1602_v36  ;;  %v1765_v61 = vld [vmem:[#allocation3 + $0x18] sm:$0xf]  ;;  %v1771_v36 = vld [vmem:[#allocation3 + $0x20] sm:$0xf] }
 0x1c3   : > { %v1038_v26 = vpop.permute.xlu1 %1037  ;;  %v1076_v27 = vpop.permute.xlu0 %1075 }
 0x1c4   : > { %v1315_v44 = vsel %vm1299_vm14, %v1298_v54, %v1038_v26  ;;  %v1330_v5 = vsel %vm1316_vm15, %v1313_v57, %v1076_v27  ;;  %v1577_v26 = vld [vmem:[#allocation3] sm:$0x1]  ;;  %v1604_v27 = vld [vmem:[#allocation3 + $0x48] sm:$0x1] }
 0x1c7   : > { %v1074_v17 = vpop.permute.xlu1 %1073  ;;  %v1168_v28 = vpop.permute.xlu0 %1167 }
 0x1c8   : > { %v1328_v8 = vsel %vm1316_vm15, %v1311_v48, %v1074_v17  ;;  %v1343_v30 = vsel %vm1333_vm0, %v1326_v51, %v1168_v28  ;;  %v1578_v17 = vsel %vm5443_vm6, 0, %v1577_v26  ;;  %v1605_v28 = vsel %vm5443_vm6, 0, %v1604_v27  ;;  %v1768_v26 = vld [vmem:[#allocation3 + $0x1c] sm:$0x1] }
 0x1c9   : > { %1579 = vst [vmem:[#allocation3] sm:$0x1] %v1578_v17  ;;  %1606 = vst [vmem:[#allocation3 + $0x48] sm:$0x1] %v1605_v28  ;;  %v1633_v48 = vsel %vm5768_vm5, 0, %v1632_v14  ;;  %v1596_v51 = vsel %vm5443_vm6, 0, %v1595_v49 }
 0x1ca   : > { %1634 = vst [vmem:[#allocation3 + $0x44] sm:$0x1] %v1633_v48  ;;  %1597 = vst [vmem:[#allocation3 + $0x30] sm:$0x1] %v1596_v51 }
 0x1cb   : > { %v1078_v29 = vpop.permute.xlu1 %1077  ;;  %v1172_v31 = vpop.permute.xlu0 %1171 }
 0x1cc   : > { %v1332_v62 = vsel %vm1316_vm15, %v1315_v44, %v1078_v29  ;;  %v1347_v60 = vsel %vm1333_vm0, %v1330_v5, %v1172_v31  ;;  %v1608_v29 = vld [vmem:[#allocation3 + $0x4] sm:$0x1] }
 0x1cd   : > { %v1609_v31 = vsel %vm5768_vm5, 0, %v1608_v29 }
 0x1ce   : > { %1610 = vst [vmem:[#allocation3 + $0x4] sm:$0x1] %v1609_v31  ;;  %v1753_v31 = vld [vmem:[#allocation3 + $0x8] sm:$0xf] }
 0x1cf   : > { %v1170_v32 = vpop.permute.xlu1 %1169  ;;  %v1216_v46 = vpop.permute.xlu0 %1215 }
 0x1d0   : > { %v1345_v43 = vsel %vm1333_vm0, %v1328_v8, %v1170_v32  ;;  %v1360_v55 = vsel %vm1350_vm1, %v1343_v30, %v1216_v46  ;;  %v4667_v32 = vld [vmem:[#allocation10 + $0x10] sm:$0xff]   ;;  %v1627_v8 = vsel %vm5768_vm5, 0, %v1626_v20  ;;  %v5828_v23 = vld [vmem:[#allocation3] sm:$0xf]  ;;  %v1774_v20 = vld [vmem:[#allocation3 + $0x24] sm:$0x1] }
 0x1d1   : > { %4278 = vmatprep.subr.bf16.mxu0 %v4667_v32  ;;  %4410 = vmatprep.subr.bf16.mxu1 %v4667_v32  ;;  %v1623_v46 = vld [vmem:[#allocation3 + $0x2c] sm:$0x1]  ;;  %1628 = vst [vmem:[#allocation3 + $0x34] sm:$0x1] %v1627_v8 }
 0x1d2   : > { %4279 = vmatpush3.bf16.msra.mxu0 %v4667_v32  ;;  %4412 = vmatpush3.bf16.msra.mxu1 %v4667_v32  ;;  %v1624_v47 = vsel %vm5768_vm5, 0, %v1623_v46  ;;  %v1828_v46 = vshll.u32 %v5828_v23, 16 }
 0x1d3   : > { %v1174_v3 = vpop.permute.xlu1 %1173  ;;  %v1220_v63 = vpop.permute.xlu0 %1219  ;;  %4280 = vmatprep.subr.bf16.mxu0 %v4668_v35  ;;  %4411 = vmatprep.subr.bf16.mxu1 %v4668_v35  ;;  %1625 = vst [vmem:[#allocation3 + $0x2c] sm:$0x1] %v1624_v47 }
 0x1d4   : > { %v1349_v7 = vsel %vm1333_vm0, %v1332_v62, %v1174_v3  ;;  %v1364_v10 = vsel %vm1350_vm1, %v1347_v60, %v1220_v63  ;;  %v1593_v3 = vsel %vm5443_vm6, 0, %v1592_v45  ;;  %v1635_v62 = vld [vmem:[#allocation3 + $0x4c] sm:$0x1] }
 0x1d5   : > { %1594 = vst [vmem:[#allocation3 + $0x28] sm:$0x1] %v1593_v3  ;;  %v1636_v60 = vsel %vm5768_vm5, 0, %v1635_v62 }
 0x1d6   : > { %4281 = vmatpush3.bf16.msra.mxu0 %v4668_v35  ;;  %4413 = vmatpush3.bf16.msra.mxu1 %v4668_v35  ;;  %1637 = vst [vmem:[#allocation3 + $0x4c] sm:$0x1] %v1636_v60  ;;  %v1825_v35 = vshrl.u32 %v5828_v23, 16  ;;  %v1830_v60 = vrot.slane %v1828_v46, 5 }
 0x1d7   : > { %v1218_v53 = vpop.permute.xlu1 %1217  ;;  %4290 = vmatprep.subr.bf16.mxu0 %v5798_v50  ;;  %4314 = vmatprep.subr.bf16.mxu1 %v5817_v52 }
 0x1d8   : > { %v1362_v56 = vsel %vm1350_vm1, %v1345_v43, %v1218_v53  ;;  %v1827_v62 = vrot.slane %v1825_v35, 4 }
 0x1d9   : > { %v3956_v4 = vcombine.low %v1360_v55, %v1362_v56 }
 0x1db   : > { %v1222_v9 = vpop.permute.xlu1 %1221  ;;  %4274 = vmatprep.mubr.msk.bf16.mxu0 %vm1430_vm2, %v3956_v4 }
 0x1dc   : > { %v1366_v33 = vsel %vm1350_vm1, %v1349_v7, %v1222_v9 }
 0x1dd   : > { %v3957_v59 = vcombine.low %v1364_v10, %v1366_v33 }
 0x1df   : > { %4275 = vmatmul.mubr.msk.bf16.gmra.mrb[4].mxu0 %vm1430_vm2, %v3957_v59 }
 0x276   : > { %v4272_v30 = vpop.f32.mrb[0].mxu0 }
 0x277   : > { %v1490_v43 = vadd.f32 %v4272_v30, %v5820_v40  ;;  %v1481_v53 = vpop.f32.mrb[1].mxu0 }
 0x278   : > { %v1482_v34 = vadd.f32 %v5820_v40, %v1481_v53  ;;  %v4273_v54 = vpop.f32.mrb[2].mxu0 }
 0x279   : > { %v3969_v55 = vmul.f32 -1.442695, %v1490_v43  ;;  %v1493_v56 = vadd.f32 %v4273_v54, %v5820_v40  ;;  %v1484_v57 = vpop.f32.mrb[3].mxu0  ;;  %v1759_v54 = vld [vmem:[#allocation3 + $0x10] sm:$0xf] }
 0x27a   : > { %v3967_v44 = vmul.f32 -1.442695, %v1482_v34  ;;  %v1485_v63 = vadd.f32 %v5820_v40, %v1484_v57 }
 0x27b   : > { %4705 = vpow2.f32 %v3969_v55  ;;  %v3970_v4 = vmul.f32 -1.442695, %v1493_v56  ;;  %v1762_v55 = vld [vmem:[#allocation3 + $0x14] sm:$0x1] }
 0x27c   : > { %4707 = vpow2.f32 %v3967_v44  ;;  %v3968_v5 = vmul.f32 -1.442695, %v1485_v63 }
 0x27d   : > { %4709 = vpow2.f32 %v3970_v4 }
 0x27e   : > { %4711 = vpow2.f32 %v3968_v5 }
 0x285   : > { %v4706_v7 = vpop.eup %4705 }
 0x286   : > { %v4708_v9 = vpop.eup %4707  ;;  %v1538_v10 = vadd.f32 1.0, %v4706_v7 }
 0x287   : > { %v4710_v33 = vpop.eup %4709  ;;  %v1536_v59 = vadd.f32 1.0, %v4708_v9 }
 0x288   : > { %v4712_v42 = vpop.eup %4711  ;;  %4713 = vrcp.f32 %v1538_v10  ;;  %v1539_v12 = vadd.f32 1.0, %v4710_v33  ;;  %v5854_v10 = vld [vmem:[#allocation3 + $0x4] sm:$0x1]  ;;  %v1831_v33 = vor.u32 %v1830_v60, %v1827_v62  ;;  %v4675_v60 = vld [vmem:[#allocation10 + $0x20] sm:$0xff]  }
 0x289   : > { %4715 = vrcp.f32 %v1536_v59  ;;  %v1537_v13 = vadd.f32 1.0, %v4712_v42  ;;  %v1834_v59 = vshll.u32 %v5854_v10, 16 }
 0x28a   : > { %4717 = vrcp.f32 %v1539_v12 }
 0x28b   : > { %4719 = vrcp.f32 %v1537_v13 }
 0x292   : > { %v4714_v15 = vpop.eup %4713 }
 0x293   : > { %v4716_v16 = vpop.eup %4715  ;;  %v1562_v6 = vmul.f32 %v4714_v15, %v1490_v43 }
 0x294   : > { %v4718_v1 = vpop.eup %4717  ;;  %v1560_v11 = vmul.f32 %v4716_v16, %v1482_v34 }
 0x295   : > { %v4720_v18 = vpop.eup %4719  ;;  %v4147_v19 = vpack.c.bf16 %v1562_v6, %v1562_v6  ;;  %v1563_v21 = vmul.f32 %v4718_v1, %v1493_v56  ;;  %v1832_v6 = vrot.slane %v1831_v33, 4  ;;  %v1836_v1 = vrot.slane %v1834_v59, 5 }
 0x296   : > { %v4145_v0 = vpack.c.bf16 %v1560_v11, %v1560_v11  ;;  %v1561_v22 = vmul.f32 %v4720_v18, %v1485_v63 }
 0x297   : > { %v1687_v24 = vshrl.u32 %v4147_v19, 16  ;;  %v4148_v25 = vpack.c.bf16 %v1563_v21, %v1563_v21  ;;  %v1690_v29 = vshll.u32 %v4147_v19, 16 }
 0x298   : > { %v1671_v27 = vshrl.u32 %v4145_v0, 16  ;;  %v4146_v17 = vpack.c.bf16 %v1561_v22, %v1561_v22  ;;  %v1674_v39 = vshll.u32 %v4145_v0, 16 }
 0x299   : > { %v1689_v28 = vrot.slane %v1687_v24, 7  ;;  %v1695_v32 = vshrl.u32 %v4148_v25, 16  ;;  %v1698_v14 = vshll.u32 %v4148_v25, 16 }
 0x29a   : > { %v1673_v37 = vrot.slane %v1671_v27, 7  ;;  %v1679_v45 = vshrl.u32 %v4146_v17, 16  ;;  %v1682_v8 = vshll.u32 %v4146_v17, 16 }
 0x29b   : > { %v1692_v3 = vor.u32 %v1690_v29, %v1689_v28  ;;  %v1693_v47 = vrot.slane %v1689_v28, 4  ;;  %v1697_v58 = vrot.slane %v1695_v32, 7 }
 0x29c   : > { %v1676_v48 = vor.u32 %v1674_v39, %v1673_v37  ;;  %v1677_v49 = vrot.slane %v1673_v37, 4  ;;  %v1681_v51 = vrot.slane %v1679_v45, 7 }
 0x29d   : > { %v1766_v30 = vsel %vm5833_vm3, %v1692_v3, %v1765_v61  ;;  %v1769_v43 = vsel %vm5443_vm6, %v1693_v47, %v1768_v26  ;;  %v1700_v53 = vor.u32 %v1698_v14, %v1697_v58  ;;  %v1701_v34 = vrot.slane %v1697_v58, 4 }
 0x29e   : > { %1767 = vst [vmem:[#allocation3 + $0x18] sm:$0xf] %v1766_v30  ;;  %1770 = vst [vmem:[#allocation3 + $0x1c] sm:$0x1] %v1769_v43  ;;  %v1754_v56 = vsel %vm5833_vm3, %v1676_v48, %v1753_v31  ;;  %v1757_v57 = vsel %vm5443_vm6, %v1677_v49, %v1756_v41  ;;  %v1684_v44 = vor.u32 %v1682_v8, %v1681_v51  ;;  %v1685_v63 = vrot.slane %v1681_v51, 4 }
 0x29f   : > { %1755 = vst [vmem:[#allocation3 + $0x8] sm:$0xf] %v1754_v56  ;;  %1758 = vst [vmem:[#allocation3 + $0xc] sm:$0x1] %v1757_v57  ;;  %v1772_v4 = vsel %vm5833_vm3, %v1700_v53, %v1771_v36  ;;  %v1775_v5 = vsel %vm5443_vm6, %v1701_v34, %v1774_v20  ;;  %v1837_v41 = vsel %vm5870_vm9, %v1832_v6, %v1836_v1  ;;  %v4671_v34 = vld [vmem:[#allocation10 + $0x8] sm:$0xff]  }
 0x2a0   : > { %1773 = vst [vmem:[#allocation3 + $0x20] sm:$0xf] %v1772_v4  ;;  %1776 = vst [vmem:[#allocation3 + $0x24] sm:$0x1] %v1775_v5  ;;  %v1760_v7 = vsel %vm5833_vm3, %v1684_v44, %v1759_v54  ;;  %v1763_v9 = vsel %vm5443_vm6, %v1685_v63, %v1762_v55 }
 0x2a1   : > { %1761 = vst [vmem:[#allocation3 + $0x10] sm:$0xf] %v1760_v7  ;;  %1764 = vst [vmem:[#allocation3 + $0x14] sm:$0x1] %v1763_v9  ;;  %v4676_v9 = vld [vmem:[#allocation10 + $0x28] sm:$0xff]  }
 0x2a5   : > { %v5857_v42 = vld [vmem:[#allocation3 + $0x18] sm:$0xf]  ;;  %v5863_v21 = vld [vmem:[#allocation3 + $0x1c] sm:$0x1] }
 0x2a6   : > { %v1802_v12 = vld [vmem:[#allocation3 + $0x8] sm:$0xf]  ;;  %v5859_v13 = vld [vmem:[#allocation3 + $0xc] sm:$0x1]  ;;  %v1867_v15 = vshrl.u32 %v5857_v42, 16  ;;  %v1870_v16 = vshll.u32 %v5857_v42, 16 }
 0x2a7   : > { %v1839_v11 = vshrl.u32 %v1802_v12, 16  ;;  %v1842_v18 = vshll.u32 %v1802_v12, 16  ;;  %v1848_v61 = vshll.u32 %v5859_v13, 16  ;;  %v1876_v39 = vshll.u32 %v5863_v21, 16  ;;  %v2155_v38 = vld [vmem:[#allocation3 + $0x20] sm:$0xe] }
 0x2a8   : > { %v1803_v19 = vld [vmem:[#allocation3 + $0x10] sm:$0xf]  ;;  %v1869_v0 = vrot.slane %v1867_v15, 4  ;;  %v1872_v22 = vrot.slane %v1870_v16, 5  ;;  %v5866_v26 = vld [vmem:[#allocation3 + $0x14] sm:$0x1]  ;;  %v3993_v56 = vcombine.low %v5828_v23, %v1802_v12 }
 0x2a9   : > { %v1841_v24 = vrot.slane %v1839_v11, 4  ;;  %v1844_v25 = vrot.slane %v1842_v18, 5  ;;  %v1853_v27 = vshrl.u32 %v1803_v19, 16  ;;  %v1856_v28 = vshll.u32 %v1803_v19, 16 }
 0x2aa   : > { %v1873_v29 = vor.u32 %v1872_v22, %v1869_v0  ;;  %v1862_v37 = vshll.u32 %v5866_v26, 16  ;;  %v1850_v46 = vrot.slane %v1848_v61, 5  ;;  %v1878_v49 = vrot.slane %v1876_v39, 5 }
 0x2ab   : > { %v1845_v31 = vor.u32 %v1844_v25, %v1841_v24  ;;  %v1855_v32 = vrot.slane %v1853_v27, 4  ;;  %v1858_v35 = vrot.slane %v1856_v28, 5  ;;  %v3994_v23 = vcombine.low %v1803_v19, %v5857_v42  ;;  %v5895_v42 = vld [vmem:[#allocation3 + $0x20] sm:$0xf] }
 0x2ac   : > { %v1874_v47 = vrot.slane %v1873_v29, 4  ;;  %v1864_v48 = vrot.slane %v1862_v37, 5  ;;  %v1881_v61 = vshrl.u32 %v5895_v42, 16  ;;  %v1884_v29 = vshll.u32 %v5895_v42, 16  ;;  %v1792_v37 = vld [vmem:[#allocation3 + $0x3c] sm:$0x1] }
 0x2ad   : > { %v1846_v45 = vrot.slane %v1845_v31, 4  ;;  %v1859_v3 = vor.u32 %v1858_v35, %v1855_v32  ;;  %v1789_v35 = vld [vmem:[#allocation3 + $0x38] sm:$0xf] }
 0x2ae   : > { %v1879_v8 = vsel %vm5870_vm9, %v1874_v47, %v1878_v49  ;;  %v1780_v47 = vld [vmem:[#allocation3 + $0x2c] sm:$0x1]  ;;  %v1795_v49 = vld [vmem:[#allocation3 + $0x40] sm:$0xf] }
 0x2af   : > { %v1851_v58 = vsel %vm5870_vm9, %v1846_v45, %v1850_v46  ;;  %v1860_v36 = vrot.slane %v1859_v3, 4  ;;  %v1777_v3 = vld [vmem:[#allocation3 + $0x28] sm:$0xf] }
 0x2b0   : > { %v3983_v14 = vcombine.low %v1837_v41, %v1851_v58 }
 0x2b1   : > { %v1865_v51 = vsel %vm5870_vm9, %v1860_v36, %v1864_v48 }
 0x2b2   : > { %v4276_v20 = vpop.f32.mrb[4].mxu0  ;;  %4282 = vmatprep.mubr.msk.bf16.mxu0 %vm1282_vm13, %v3983_v14  ;;  %v3984_v53 = vcombine.low %v1865_v51, %v1879_v8  ;;  %v1883_v14 = vrot.slane %v1881_v61, 4  ;;  %v2151_v51 = vld [vmem:[#allocation3] sm:$0xe]  ;;  %v1886_v8 = vrot.slane %v1884_v29, 5  ;;  %v2188_v29 = vrot.slane %v5866_v26, 5 }
 0x2b3   : > { %v1506_v30 = vadd.f32 %v4276_v20, %v5820_v40  ;;  %v1497_v43 = vpop.f32.mrb[5].mxu0 }
 0x2b4   : > { %v1498_v54 = vadd.f32 %v5820_v40, %v1497_v43  ;;  %v4277_v55 = vpop.f32.mrb[6].mxu0  ;;  %4283 = vmatmul.mubr.msk.bf16.vlgmr.msra.gmra.mrb[8].mxu0 %vm1282_vm13, %v3984_v53 }
 0x2b5   : > { %v3973_v57 = vmul.f32 -1.442695, %v1506_v30  ;;  %v1509_v44 = vadd.f32 %v4277_v55, %v5820_v40  ;;  %v1500_v63 = vpop.f32.mrb[7].mxu0  ;;  %4294 = vmatprep.mubr.msk.bf16.mxu0 %vm1282_vm13, %v3993_v56  ;;  %4291 = vmatpush3.bf16.msra.mxu0 %v5798_v50 }
 0x2b6   : > { %v3971_v4 = vmul.f32 -1.442695, %v1498_v54  ;;  %v1501_v5 = vadd.f32 %v5820_v40, %v1500_v63  ;;  %4292 = vmatprep.subr.bf16.mxu0 %v4671_v34  ;;  %v1783_v63 = vld [vmem:[#allocation3 + $0x30] sm:$0xf] }
 0x2b7   : > { %4721 = vpow2.f32 %v3973_v57  ;;  %v3974_v62 = vmul.f32 -1.442695, %v1509_v44 }
 0x2b8   : > { %4723 = vpow2.f32 %v3971_v4  ;;  %v3972_v7 = vmul.f32 -1.442695, %v1501_v5 }
 0x2b9   : > { %4725 = vpow2.f32 %v3974_v62  ;;  %4293 = vmatpush3.bf16.msra.mxu0 %v4671_v34 }
 0x2ba   : > { %4727 = vpow2.f32 %v3972_v7  ;;  %4302 = vmatprep.subr.bf16.mxu0 %v4675_v60  ;;  %v1786_v7 = vld [vmem:[#allocation3 + $0x34] sm:$0x1] }
 0x2c0   : > { %4295 = vmatmul.mubr.msk.bf16.vlgmr.msra.gmra.mrb[8].mxu0 %vm1282_vm13, %v3994_v23  ;;  %v2152_v23 = vld [vmem:[#allocation3 + $0x8] sm:$0xe] }
 0x2c1   : > { %v4722_v33 = vpop.eup %4721  ;;  %4303 = vmatpush3.bf16.msra.mxu0 %v4675_v60 }
 0x2c2   : > { %v4724_v40 = vpop.eup %4723  ;;  %v1542_v59 = vadd.f32 1.0, %v4722_v33  ;;  %4304 = vmatprep.subr.bf16.mxu0 %v4676_v9 }
 0x2c3   : > { %v4726_v50 = vpop.eup %4725  ;;  %v1540_v12 = vadd.f32 1.0, %v4724_v40 }
 0x2c4   : > { %v4728_v15 = vpop.eup %4727  ;;  %4729 = vrcp.f32 %v1542_v59  ;;  %v1543_v16 = vadd.f32 1.0, %v4726_v50 }
 0x2c5   : > { %4731 = vrcp.f32 %v1540_v12  ;;  %v1541_v6 = vadd.f32 1.0, %v4728_v15  ;;  %4305 = vmatpush3.bf16.msra.mxu0 %v4676_v9  ;;  %v4003_v15 = vrot.slane %v2151_v51, 9 }
 0x2c6   : > { %4733 = vrcp.f32 %v1543_v16  ;;  %v2180_v16 = vrot.slane %v5854_v10, 5  ;;  %v1887_v10 = vor.u32 %v1886_v8, %v1883_v14 }
 0x2c7   : > { %4735 = vrcp.f32 %v1541_v6 }
 0x2c8   : > { %v2181_v2 = vsel %vm5918_vm12, %v4003_v15, %v2180_v16 }
 0x2ce   : > { %v4730_v1 = vpop.eup %4729 }
 0x2cf   : > { %v4732_v11 = vpop.eup %4731  ;;  %v1566_v18 = vmul.f32 %v4730_v1, %v1506_v30 }
 0x2d0   : > { %v4734_v19 = vpop.eup %4733  ;;  %v1564_v0 = vmul.f32 %v4732_v11, %v1498_v54  ;;  %v1798_v54 = vld [vmem:[#allocation3 + $0x44] sm:$0x1] }
 0x2d1   : > { %v4736_v22 = vpop.eup %4735  ;;  %v4151_v24 = vpack.c.bf16 %v1566_v18, %v1566_v18  ;;  %v1567_v25 = vmul.f32 %v4734_v19, %v1509_v44  ;;  %v4004_v18 = vrot.slane %v2152_v23, 9  ;;  %v2184_v19 = vrot.slane %v5859_v13, 5  ;;  %v4700_v11 = vld [vmem:[#allocation13 + $0x18] sm:$0xff]  }
 0x2d2   : > { %v4149_v27 = vpack.c.bf16 %v1564_v0, %v1564_v0  ;;  %v1565_v28 = vmul.f32 %v4736_v22, %v1501_v5  ;;  %v1817_v0 = vld [vmem:[#allocation3 + $0x24] sm:$0x1]  ;;  %v2153_v22 = vld [vmem:[#allocation3 + $0x10] sm:$0xe]  ;;  %v1888_v13 = vrot.slane %v1887_v10, 4 }
 0x2d3   : > { %v1719_v31 = vshrl.u32 %v4151_v24, 16  ;;  %v4152_v32 = vpack.c.bf16 %v1567_v25, %v1567_v25  ;;  %v1722_v46 = vshll.u32 %v4151_v24, 16  ;;  %v2154_v24 = vld [vmem:[#allocation3 + $0x18] sm:$0xe]  ;;  %v1890_v25 = vshll.u32 %v1817_v0, 16 }
 0x2d4   : > { %v1703_v39 = vshrl.u32 %v4149_v27, 16  ;;  %v4150_v41 = vpack.c.bf16 %v1565_v28, %v1565_v28  ;;  %v1706_v48 = vshll.u32 %v4149_v27, 16  ;;  %v2185_v61 = vsel %vm5918_vm12, %v4004_v18, %v2184_v19 }
 0x2d5   : > { %v1721_v45 = vrot.slane %v1719_v31, 7  ;;  %v1727_v58 = vshrl.u32 %v4152_v32, 16  ;;  %v1730_v34 = vshll.u32 %v4152_v32, 16  ;;  %v2196_v27 = vrot.slane %v1817_v0, 5 }
 0x2d6   : > { %v1705_v36 = vrot.slane %v1703_v39, 7  ;;  %v1711_v20 = vshrl.u32 %v4150_v41, 16  ;;  %v1714_v44 = vshll.u32 %v4150_v41, 16  ;;  %v4005_v28 = vrot.slane %v2153_v22, 9 }
 0x2d7   : > { %v1724_v30 = vor.u32 %v1722_v46, %v1721_v45  ;;  %v1725_v43 = vrot.slane %v1721_v45, 4  ;;  %v1729_v53 = vrot.slane %v1727_v58, 7  ;;  %v4006_v32 = vrot.slane %v2154_v24, 9 }
 0x2d8   : > { %v1708_v55 = vor.u32 %v1706_v48, %v1705_v36  ;;  %v1709_v56 = vrot.slane %v1705_v36, 4  ;;  %v1713_v57 = vrot.slane %v1711_v20, 7  ;;  %v4011_v20 = vcombine.low %v2181_v2, %v2185_v61 }
 0x2d9   : > { %v1790_v4 = vsel %vm5833_vm3, %v1724_v30, %v1789_v35  ;;  %v1793_v5 = vsel %vm5443_vm6, %v1725_v43, %v1792_v37  ;;  %v1732_v62 = vor.u32 %v1730_v34, %v1729_v53  ;;  %v1733_v60 = vrot.slane %v1729_v53, 4 }
 0x2da   : > { %1791 = vst [vmem:[#allocation3 + $0x38] sm:$0xf] %v1790_v4  ;;  %1794 = vst [vmem:[#allocation3 + $0x3c] sm:$0x1] %v1793_v5  ;;  %v1778_v9 = vsel %vm5833_vm3, %v1708_v55, %v1777_v3  ;;  %v1781_v33 = vsel %vm5443_vm6, %v1709_v56, %v1780_v47  ;;  %v1716_v40 = vor.u32 %v1714_v44, %v1713_v57  ;;  %v1717_v59 = vrot.slane %v1713_v57, 4 }
 0x2db   : > { %1779 = vst [vmem:[#allocation3 + $0x28] sm:$0xf] %v1778_v9  ;;  %1782 = vst [vmem:[#allocation3 + $0x2c] sm:$0x1] %v1781_v33  ;;  %v1796_v50 = vsel %vm5833_vm3, %v1732_v62, %v1795_v49  ;;  %v1799_v12 = vsel %vm5443_vm6, %v1733_v60, %v1798_v54  ;;  %v2192_v35 = vrot.slane %v5863_v21, 5  ;;  %v4007_v37 = vrot.slane %v2155_v38, 9 }
 0x2dc   : > { %1797 = vst [vmem:[#allocation3 + $0x40] sm:$0xf] %v1796_v50  ;;  %1800 = vst [vmem:[#allocation3 + $0x44] sm:$0x1] %v1799_v12  ;;  %v1784_v6 = vsel %vm5833_vm3, %v1716_v40, %v1783_v63  ;;  %v1787_v1 = vsel %vm5443_vm6, %v1717_v59, %v1786_v7  ;;  %v2454_v56 = vld [vmem:[#allocation3 + $0x8] sm:$0xf]  ;;  %v2189_v60 = vsel %vm5918_vm12, %v4005_v28, %v2188_v29 }
 0x2dd   : > { %1785 = vst [vmem:[#allocation3 + $0x30] sm:$0xf] %v1784_v6  ;;  %1788 = vst [vmem:[#allocation3 + $0x34] sm:$0x1] %v1787_v1  ;;  %v1892_v5 = vrot.slane %v1890_v25, 5  ;;  %v2193_v7 = vsel %vm5918_vm12, %v4006_v32, %v2192_v35  ;;  %v2197_v33 = vsel %vm5918_vm12, %v4007_v37, %v2196_v27  ;;  %v2471_v15 = vshrl.u32 %v2454_v56, 16 }
 0x2de   : > { %v2456_v40 = vld [vmem:[#allocation3 + $0x10] sm:$0xf]  ;;  %v4012_v10 = vcombine.low %v2189_v60, %v2193_v7  ;;  %v2474_v27 = vshll.u32 %v2454_v56, 16 }
 0x2df   : > { %v1893_v59 = vsel %vm5870_vm9, %v1888_v13, %v1892_v5  ;;  %v2485_v22 = vshrl.u32 %v2456_v40, 16  ;;  %v2488_v24 = vshll.u32 %v2456_v40, 16  ;;  %v4678_v35 = vld [vmem:[#allocation3 + $0x8] ss:$8 sps:$4 sm:$0xff]  }
 0x2e0   : > { %v5972_v40 = vld [vmem:[#allocation10 + $0x50] sm:$0xff]  }
 0x2e1   : > { %v1808_v31 = vld [vmem:[#allocation3 + $0x38] sm:$0xf]  ;;  %v5930_v36 = vld [vmem:[#allocation3 + $0x3c] sm:$0x1] }
 0x2e2   : > { %v1806_v39 = vld [vmem:[#allocation3 + $0x28] sm:$0xf]  ;;  %v1923_v41 = vshrl.u32 %v1808_v31, 16  ;;  %v1926_v45 = vshll.u32 %v1808_v31, 16  ;;  %v1818_v46 = vld [vmem:[#allocation3 + $0x2c] sm:$0x1] }
 0x2e3   : > { %v3995_v3 = vcombine.low %v5895_v42, %v1806_v39  ;;  %v1895_v47 = vshrl.u32 %v1806_v39, 16  ;;  %v1898_v58 = vshll.u32 %v1806_v39, 16  ;;  %v1904_v14 = vshll.u32 %v1818_v46, 16  ;;  %v2156_v51 = vld [vmem:[#allocation3 + $0x28] sm:$0xe] }
 0x2e4   : > { %v1807_v48 = vld [vmem:[#allocation3 + $0x30] sm:$0xf]  ;;  %v1925_v49 = vrot.slane %v1923_v41, 4  ;;  %v1928_v26 = vrot.slane %v1926_v45, 5  ;;  %v1819_v53 = vld [vmem:[#allocation3 + $0x34] sm:$0x1] }
 0x2e5   : > { %4298 = vmatprep.mubr.msk.bf16.mxu0 %vm1282_vm13, %v3995_v3  ;;  %v1909_v21 = vshrl.u32 %v1807_v48, 16  ;;  %v1912_v8 = vshll.u32 %v1807_v48, 16  ;;  %v3996_v30 = vcombine.low %v1807_v48, %v1808_v31  ;;  %v1897_v43 = vrot.slane %v1895_v47, 4  ;;  %v2157_v19 = vld [vmem:[#allocation3 + $0x30] sm:$0xe] }
 0x2e6   : > { %v1900_v34 = vrot.slane %v1898_v58, 5  ;;  %v2200_v54 = vrot.slane %v1818_v46, 5  ;;  %v1929_v42 = vor.u32 %v1928_v26, %v1925_v49  ;;  %v1932_v55 = vshll.u32 %v5930_v36, 16  ;;  %v2158_v61 = vld [vmem:[#allocation3 + $0x38] sm:$0xe]  ;;  %v4679_v31 = vld [vmem:[#allocation10 + $0x38] sm:$0xff]  }
 0x2e7   : > { %v1911_v57 = vrot.slane %v1909_v21, 4  ;;  %v1914_v44 = vrot.slane %v1912_v8, 5  ;;  %4299 = vmatmul.mubr.msk.bf16.gmra.mrb[12].mxu0 %vm1282_vm13, %v3996_v30  ;;  %v1918_v63 = vshll.u32 %v1819_v53, 16  ;;  %v4008_v4 = vrot.slane %v2156_v51, 9  ;;  %v2460_v46 = vld [vmem:[#allocation3 + $0x20] sm:$0xf] }
 0x2e8   : > { %4306 = vmatprep.mubr.msk.bf16.mxu0 %vm1282_vm13, %v4011_v20  ;;  %v1901_v62 = vor.u32 %v1900_v34, %v1897_v43  ;;  %v1930_v9 = vrot.slane %v1929_v42, 4  ;;  %v1906_v12 = vrot.slane %v1904_v14, 5  ;;  %v1934_v1 = vrot.slane %v1932_v55, 5  ;;  %v2464_v3 = vld [vmem:[#allocation3 + $0x30] sm:$0xf]  ;;  %v4680_v58 = vld [vmem:[#allocation10 + $0x40] sm:$0xff]  }
 0x2e9   : > { %v1915_v23 = vor.u32 %v1914_v44, %v1911_v57  ;;  %v1920_v6 = vrot.slane %v1918_v63, 5  ;;  %v2201_v18 = vsel %vm5918_vm12, %v4008_v4, %v2200_v54  ;;  %v4009_v13 = vrot.slane %v2157_v19, 9  ;;  %v2458_v49 = vld [vmem:[#allocation3 + $0x18] sm:$0xf]  ;;  %v5961_v26 = vld [vmem:[#allocation3 + $0x14] sm:$0x1] }
 0x2ea   : > { %v1902_v50 = vrot.slane %v1901_v62, 4  ;;  %v1935_v25 = vsel %vm5870_vm9, %v1930_v9, %v1934_v1  ;;  %v4013_v29 = vcombine.low %v2197_v33, %v2201_v18  ;;  %v2204_v32 = vrot.slane %v1819_v53, 5  ;;  %v2462_v51 = vld [vmem:[#allocation3 + $0x28] sm:$0xf]  ;;  %v5965_v34 = vld [vmem:[#allocation3 + $0xc] sm:$0x1] }
 0x2eb   : > { %v1916_v16 = vrot.slane %v1915_v23, 4  ;;  %v4010_v37 = vrot.slane %v2158_v61, 9  ;;  %v2208_v39 = vrot.slane %v5930_v36, 5  ;;  %v2487_v41 = vrot.slane %v2485_v22, 4  ;;  %v4683_v55 = vld [vmem:[#allocation10 + $0x48] sm:$0xff]  }
 0x2ec   : > { %v1907_v0 = vsel %vm5870_vm9, %v1902_v50, %v1906_v12  ;;  %v2490_v45 = vrot.slane %v2488_v24, 5  ;;  %v2205_v47 = vsel %vm5918_vm12, %v4009_v13, %v2204_v32  ;;  %v2473_v14 = vrot.slane %v2471_v15, 4  ;;  %v4682_v4 = vld [vmem:[#allocation3 + $0x28] ss:$8 sps:$4 sm:$0xff]   ;;  %v2468_v33 = vld [vmem:[#allocation3 + $0x40] sm:$0xf] }
 0x2ed   : > { %v3985_v38 = vcombine.low %v1893_v59, %v1907_v0  ;;  %v1921_v2 = vsel %vm5870_vm9, %v1916_v16, %v1920_v6  ;;  %v2476_v48 = vrot.slane %v2474_v27, 5  ;;  %v2513_v20 = vshrl.u32 %v2460_v46, 16  ;;  %v5974_v59 = vld [vmem:[#allocation3 + $0x24] sm:$0x1]  ;;  %v2466_v18 = vld [vmem:[#allocation3 + $0x38] sm:$0xf] }
 0x2ee   : > { %v3986_v28 = vcombine.low %v1921_v2, %v1935_v25  ;;  %v2516_v36 = vshll.u32 %v2460_v46, 16  ;;  %v2209_v21 = vsel %vm5918_vm12, %v4010_v37, %v2208_v39  ;;  %v2491_v8 = vor.u32 %v2490_v45, %v2487_v41  ;;  %v5976_v19 = vld [vmem:[#allocation3 + $0x1c] sm:$0x1]  ;;  %v4684_v13 = vld [vmem:[#allocation3 + $0x38] ss:$8 sps:$4 sm:$0xff]  }
 0x2ef   : > { %4286 = vmatprep.mubr.msk.bf16.mxu1 %vm1282_vm13, %v3985_v38  ;;  %4307 = vmatmul.mubr.msk.bf16.vlgmr.msra.gmra.mrb[8].mxu0 %vm1282_vm13, %v4012_v10  ;;  %v2541_v30 = vshrl.u32 %v2464_v3, 16  ;;  %v2544_v43 = vshll.u32 %v2464_v3, 16  ;;  %v4014_v53 = vcombine.low %v2205_v47, %v2209_v21  ;;  %v2499_v54 = vshrl.u32 %v2458_v49, 16  ;;  %v5978_v10 = vld [vmem:[#allocation3 + $0x34] sm:$0x1] }
 0x2f0   : > { %4287 = vmatmul.mubr.msk.bf16.vlgmr.msra.gmra.mrb[0].mxu1 %vm1282_vm13, %v3986_v28  ;;  %4310 = vmatprep.mubr.msk.bf16.mxu0 %vm1282_vm13, %v4013_v29  ;;  %v2502_v42 = vshll.u32 %v2458_v49, 16  ;;  %v2477_v56 = vor.u32 %v2476_v48, %v2473_v14  ;;  %v2494_v57 = vshll.u32 %v5961_v26, 16  ;;  %v2527_v44 = vshrl.u32 %v2462_v51, 16  ;;  %v5983_v28 = vld [vmem:[#allocation3 + $0x2c] sm:$0x1] }
 0x2f1   : > { %4315 = vmatpush3.bf16.msra.mxu1 %v5817_v52  ;;  %4318 = vmatprep.mubr.msk.bf16.mxu1 %vm1282_vm13, %v4678_v35  ;;  %v4681_v52 = vld [vmem:[#allocation3 + $0x18] ss:$8 sps:$4 sm:$0xff]   ;;  %v2530_v63 = vshll.u32 %v2462_v51, 16  ;;  %v2515_v5 = vrot.slane %v2513_v20, 4  ;;  %v2518_v62 = vrot.slane %v2516_v36, 5  ;;  %v2480_v60 = vshll.u32 %v5965_v34, 16 }
 0x2f2   : > { %4316 = vmatprep.subr.bf16.mxu1 %v4679_v31  ;;  %v2492_v7 = vrot.slane %v2491_v8, 4  ;;  %v2543_v23 = vrot.slane %v2541_v30, 4  ;;  %v2546_v9 = vrot.slane %v2544_v43, 5  ;;  %v2501_v50 = vrot.slane %v2499_v54, 4  ;;  %v5993_v21 = vld [vmem:[#allocation3 + $0x44] sm:$0x1] }
 0x2f3   : > { %v2504_v12 = vrot.slane %v2502_v42, 5  ;;  %v2478_v15 = vrot.slane %v2477_v56, 4  ;;  %v2496_v16 = vrot.slane %v2494_v57, 5  ;;  %v2529_v6 = vrot.slane %v2527_v44, 4  ;;  %v5999_v54 = vld [vmem:[#allocation3 + $0x3c] sm:$0x1] }
 0x2f4   : > { %v2532_v1 = vrot.slane %v2530_v63, 5  ;;  %v2519_v0 = vor.u32 %v2518_v62, %v2515_v5  ;;  %v2569_v22 = vshrl.u32 %v2468_v33, 16  ;;  %v2572_v24 = vshll.u32 %v2468_v33, 16  ;;  %v2697_v57 = vld [vmem:[#allocation3 + $0x10] sm:$0xe] }
 0x2f5   : > { %4317 = vmatpush3.bf16.msra.mxu1 %v4679_v31  ;;  %v2482_v38 = vrot.slane %v2480_v60, 5  ;;  %v2497_v2 = vsel %vm5870_vm9, %v2492_v7, %v2496_v16  ;;  %v2547_v25 = vor.u32 %v2546_v9, %v2543_v23  ;;  %v2505_v61 = vor.u32 %v2504_v12, %v2501_v50  ;;  %v2696_v7 = vld [vmem:[#allocation3 + $0x8] sm:$0xe]  ;;  %v4687_v16 = vld [vmem:[#allocation10 + $0x60] sm:$0xff]  }
 0x2f6   : > { %4326 = vmatprep.subr.bf16.mxu1 %v4680_v58  ;;  %v2522_v27 = vshll.u32 %v5974_v59, 16  ;;  %v2555_v29 = vshrl.u32 %v2466_v18, 16  ;;  %v2558_v31 = vshll.u32 %v2466_v18, 16  ;;  %v2508_v35 = vshll.u32 %v5976_v19, 16 }
 0x2f7   : > { %4311 = vmatmul.mubr.msk.bf16.gmra.mrb[12].mxu0 %vm1282_vm13, %v4014_v53  ;;  %v2483_v32 = vsel %vm5870_vm9, %v2478_v15, %v2482_v38  ;;  %v2533_v37 = vor.u32 %v2532_v1, %v2529_v6  ;;  %v2550_v39 = vshll.u32 %v5978_v10, 16  ;;  %v2520_v45 = vrot.slane %v2519_v0, 4  ;;  %v2699_v0 = vld [vmem:[#allocation3 + $0x20] sm:$0xe] }
 0x2f8   : > { %4319 = vmatmul.mubr.msk.bf16.vlgmr.msra.gmra.mrb[4].mxu1 %vm1282_vm13, %v4681_v52  ;;  %v4031_v41 = vcombine.low %v2483_v32, %v2497_v2  ;;  %v2571_v46 = vrot.slane %v2569_v22, 4  ;;  %v2574_v3 = vrot.slane %v2572_v24, 5  ;;  %v2536_v47 = vshll.u32 %v5983_v28, 16 }
 0x2f9   : > { %4327 = vmatpush3.bf16.msra.mxu1 %v4680_v58  ;;  %4322 = vmatprep.mubr.msk.bf16.mxu1 %vm1282_vm13, %v4682_v4  ;;  %v2548_v58 = vrot.slane %v2547_v25, 4  ;;  %v2506_v14 = vrot.slane %v2505_v61, 4  ;;  %v2524_v48 = vrot.slane %v2522_v27, 5  ;;  %v2557_v49 = vrot.slane %v2555_v29, 4  ;;  %v4686_v4 = vld [vmem:[#allocation10 + $0x58] sm:$0xff]  }
 0x2fa   : > { %4328 = vmatprep.subr.bf16.mxu1 %v4683_v55  ;;  %v2560_v20 = vrot.slane %v2558_v31, 5  ;;  %v2534_v36 = vrot.slane %v2533_v37, 4  ;;  %v2552_v51 = vrot.slane %v2550_v39, 5  ;;  %v2510_v52 = vrot.slane %v2508_v35, 5  ;;  %v2700_v61 = vld [vmem:[#allocation3 + $0x28] sm:$0xe] }
 0x2fb   : > { %v2525_v8 = vsel %vm5870_vm9, %v2520_v45, %v2524_v48  ;;  %v2575_v30 = vor.u32 %v2574_v3, %v2571_v46  ;;  %v2538_v43 = vrot.slane %v2536_v47, 5  ;;  %v2578_v56 = vshll.u32 %v5993_v21, 16  ;;  %v2703_v39 = vld [vmem:[#allocation3 + $0x40] sm:$0xe]  ;;  %v2702_v3 = vld [vmem:[#allocation3 + $0x38] sm:$0xe] }
 0x2fc   : > { %v2553_v53 = vsel %vm5870_vm9, %v2548_v58, %v2552_v51  ;;  %v2511_v42 = vsel %vm5870_vm9, %v2506_v14, %v2510_v52  ;;  %v2564_v62 = vshll.u32 %v5999_v54, 16  ;;  %v4042_v23 = vrot.slane %v2697_v57, 9  ;;  %v4688_v46 = vld [vmem:[#allocation10 + $0x68] sm:$0xff]   ;;  %v2997_v48 = vld [vmem:[#allocation3 + $0x10] sm:$0xf] }
 0x2fd   : > { %4329 = vmatpush3.bf16.msra.mxu1 %v4683_v55  ;;  %v2561_v55 = vor.u32 %v2560_v20, %v2557_v49  ;;  %v4032_v44 = vcombine.low %v2511_v42, %v2525_v8  ;;  %v2539_v63 = vsel %vm5870_vm9, %v2534_v36, %v2538_v43  ;;  %v2576_v60 = vrot.slane %v2575_v30, 4  ;;  %v4690_v49 = vld [vmem:[#allocation10 + $0x70] sm:$0xff]   ;;  %v2999_v36 = vld [vmem:[#allocation3 + $0x18] sm:$0xf] }
 0x2fe   : > { %4338 = vmatprep.subr.bf16.mxu1 %v5972_v40  ;;  %v4033_v5 = vcombine.low %v2539_v63, %v2553_v53  ;;  %v2726_v9 = vrot.slane %v5961_v26, 5  ;;  %v2580_v50 = vrot.slane %v2578_v56, 5  ;;  %v4041_v12 = vrot.slane %v2696_v7, 9  ;;  %v4689_v53 = vld [vmem:[#allocation3 + $0x10] ss:$8 sps:$4 sm:$0xff]  }
 0x2ff   : > { %v2562_v33 = vrot.slane %v2561_v55, 4  ;;  %v2722_v15 = vrot.slane %v5965_v34, 5  ;;  %v2566_v6 = vrot.slane %v2564_v62, 5  ;;  %v2698_v34 = vld [vmem:[#allocation3 + $0x18] sm:$0xe]  ;;  %v4044_v2 = vrot.slane %v2699_v0, 9 }
 0x300   : > { %4323 = vmatmul.mubr.msk.bf16.gmra.mrb[8].mxu1 %vm1282_vm13, %v4684_v13  ;;  %v2581_v1 = vsel %vm5870_vm9, %v2576_v60, %v2580_v50  ;;  %v2727_v18 = vsel %vm5918_vm12, %v4042_v23, %v2726_v9  ;;  %v2734_v25 = vrot.slane %v5974_v59, 5  ;;  %v2742_v29 = vrot.slane %v5978_v10, 5  ;;  %v3003_v55 = vld [vmem:[#allocation3 + $0x28] sm:$0xf]  ;;  %v3005_v56 = vld [vmem:[#allocation3 + $0x30] sm:$0xf] }
 0x301   : > { %4330 = vmatprep.mubr.msk.bf16.mxu1 %vm1282_vm13, %v4031_v41  ;;  %v2567_v26 = vsel %vm5870_vm9, %v2562_v33, %v2566_v6  ;;  %v2723_v24 = vsel %vm5918_vm12, %v4041_v12, %v2722_v15  ;;  %v4043_v31 = vrot.slane %v2698_v34, 9  ;;  %v2730_v13 = vrot.slane %v5976_v19, 5  ;;  %v3001_v63 = vld [vmem:[#allocation3 + $0x20] sm:$0xf]  ;;  %v3007_v60 = vld [vmem:[#allocation3 + $0x38] sm:$0xf] }
 0x302   : > { %v4034_v22 = vcombine.low %v2567_v26, %v2581_v1  ;;  %v4049_v38 = vcombine.low %v2723_v24, %v2727_v18  ;;  %v4045_v32 = vrot.slane %v2700_v61, 9  ;;  %v2738_v35 = vrot.slane %v5983_v28, 5  ;;  %v6046_v33 = vld [vmem:[#allocation3 + $0x1c] sm:$0x1]  ;;  %v3011_v15 = vld [vmem:[#allocation3 + $0x48] sm:$0xf] }
 0x303   : > { %v2735_v37 = vsel %vm5918_vm12, %v4044_v2, %v2734_v25  ;;  %v2731_v41 = vsel %vm5918_vm12, %v4043_v31, %v2730_v13  ;;  %v4048_v47 = vrot.slane %v2703_v39, 9  ;;  %v2750_v28 = vrot.slane %v5993_v21, 5  ;;  %v4693_v6 = vld [vmem:[#allocation10 + $0x78] sm:$0xff]   ;;  %v3009_v61 = vld [vmem:[#allocation3 + $0x40] sm:$0xf] }
 0x304   : > { %v4050_v45 = vcombine.low %v2731_v41, %v2735_v37  ;;  %v2739_v10 = vsel %vm5918_vm12, %v4045_v32, %v2738_v35  ;;  %v4047_v58 = vrot.slane %v2702_v3, 9  ;;  %v2746_v14 = vrot.slane %v5999_v54, 5 }
 0x305   : > { %v2751_v20 = vsel %vm5918_vm12, %v4048_v47, %v2750_v28  ;;  %v3014_v51 = vshrl.u32 %v2997_v48, 16  ;;  %v3017_v52 = vshll.u32 %v2997_v48, 16  ;;  %v3028_v30 = vshrl.u32 %v2999_v36, 16 }
 0x306   : > { %v2747_v21 = vsel %vm5918_vm12, %v4047_v58, %v2746_v14  ;;  %v3031_v43 = vshll.u32 %v2999_v36, 16  ;;  %v3059_v62 = vshll.u32 %v3003_v55, 16  ;;  %v3070_v23 = vshrl.u32 %v3005_v56, 16 }
 0x307   : > { %v4052_v8 = vcombine.low %v2747_v21, %v2751_v20  ;;  %v3016_v54 = vrot.slane %v3014_v51, 4  ;;  %v3019_v42 = vrot.slane %v3017_v52, 5  ;;  %v3030_v57 = vrot.slane %v3028_v30, 4  ;;  %v4694_v51 = vld [vmem:[#allocation3 + $0x40] ss:$8 sps:$4 sm:$0xff]  }
 0x308   : > { %4331 = vmatmul.mubr.msk.bf16.vlgmr.msra.gmra.mrb[4].mxu1 %vm1282_vm13, %v4032_v44  ;;  %v3033_v44 = vrot.slane %v3031_v43, 5  ;;  %v3073_v9 = vshll.u32 %v3005_v56, 16  ;;  %v3042_v50 = vshrl.u32 %v3001_v63, 16  ;;  %v3045_v12 = vshll.u32 %v3001_v63, 16 }
 0x309   : > { %4339 = vmatpush3.bf16.msra.mxu1 %v5972_v40  ;;  %4334 = vmatprep.mubr.msk.bf16.mxu1 %vm1282_vm13, %v4033_v5  ;;  %v2701_v40 = vld [vmem:[#allocation3 + $0x30] sm:$0xe]  ;;  %v3056_v5 = vshrl.u32 %v3003_v55, 16  ;;  %v3020_v7 = vor.u32 %v3019_v42, %v3016_v54  ;;  %v3084_v0 = vshrl.u32 %v3007_v60, 16  ;;  %v3087_v26 = vshll.u32 %v3007_v60, 16 }
 0x30a   : > { %4340 = vmatprep.subr.bf16.mxu1 %v4686_v4  ;;  %v4046_v27 = vrot.slane %v2701_v40, 9  ;;  %v3034_v18 = vor.u32 %v3033_v44, %v3030_v57  ;;  %v4692_v40 = vld [vmem:[#allocation3 + $0x30] ss:$8 sps:$4 sm:$0xff]   ;;  %v3061_v24 = vrot.slane %v3059_v62, 5  ;;  %v3072_v2 = vrot.slane %v3070_v23, 4 }
 0x30b   : > { %v3021_v34 = vrot.slane %v3020_v7, 4  ;;  %v3075_v25 = vrot.slane %v3073_v9, 5  ;;  %v3047_v31 = vrot.slane %v3045_v12, 5  ;;  %v3112_v13 = vshrl.u32 %v3011_v15, 16  ;;  %v6073_v62 = vld [vmem:[#allocation3 + $0x44] sm:$0x1] }
 0x30c   : > { %v2743_v59 = vsel %vm5918_vm12, %v4046_v27, %v2742_v29  ;;  %v6052_v27 = vld [vmem:[#allocation10 + $0x80] sm:$0xff]   ;;  %v3044_v29 = vrot.slane %v3042_v50, 4  ;;  %v3115_v32 = vshll.u32 %v3011_v15, 16  ;;  %v3035_v37 = vrot.slane %v3034_v18, 4  ;;  %v6075_v60 = vld [vmem:[#allocation3 + $0x4c] sm:$0x1] }
 0x30d   : > { %4341 = vmatpush3.bf16.msra.mxu1 %v4686_v4  ;;  %v4051_v19 = vcombine.low %v2739_v10, %v2743_v59  ;;  %v6044_v4 = vld [vmem:[#allocation3 + $0x14] sm:$0x1]  ;;  %v6054_v59 = vld [vmem:[#allocation3 + $0x2c] sm:$0x1]  ;;  %v3086_v39 = vrot.slane %v3084_v0, 4  ;;  %v3089_v41 = vrot.slane %v3087_v26, 5  ;;  %v3076_v58 = vor.u32 %v3075_v25, %v3072_v2 }
 0x30e   : > { %4350 = vmatprep.subr.bf16.mxu1 %v4687_v16  ;;  %v3023_v1 = vshll.u32 %v6044_v4, 16  ;;  %v3098_v3 = vshrl.u32 %v3009_v61, 16  ;;  %v3048_v14 = vor.u32 %v3047_v31, %v3044_v29  ;;  %v3065_v48 = vshll.u32 %v6054_v59, 16  ;;  %v3239_v18 = vld [vmem:[#allocation3 + $0x10] sm:$0xe] }
 0x30f   : > { %v3114_v20 = vrot.slane %v3112_v13, 4  ;;  %v3117_v36 = vrot.slane %v3115_v32, 5  ;;  %v3090_v30 = vor.u32 %v3089_v41, %v3086_v39  ;;  %v3077_v55 = vrot.slane %v3076_v58, 4  ;;  %v3240_v2 = vld [vmem:[#allocation3 + $0x18] sm:$0xe] }
 0x310   : > { %4335 = vmatmul.mubr.msk.bf16.gmra.mrb[8].mxu1 %vm1282_vm13, %v4034_v22  ;;  %v3058_v22 = vrot.slane %v3056_v5, 4  ;;  %v3025_v35 = vrot.slane %v3023_v1, 5  ;;  %v3100_v54 = vrot.slane %v3098_v3, 4  ;;  %v3049_v57 = vrot.slane %v3048_v14, 4  ;;  %v3242_v39 = vld [vmem:[#allocation3 + $0x28] sm:$0xe] }
 0x311   : > { %4342 = vmatprep.mubr.msk.bf16.mxu1 %vm1282_vm13, %v4049_v38  ;;  %v3037_v38 = vshll.u32 %v6046_v33, 16  ;;  %v3067_v44 = vrot.slane %v3065_v48, 5  ;;  %v3091_v5 = vrot.slane %v3090_v30, 4  ;;  %v3118_v7 = vor.u32 %v3117_v36, %v3114_v20 }
 0x312   : > { %v3062_v10 = vor.u32 %v3061_v24, %v3058_v22  ;;  %v3026_v47 = vsel %vm5870_vm9, %v3021_v34, %v3025_v35  ;;  %v3121_v12 = vshll.u32 %v6075_v60, 16  ;;  %v3107_v1 = vshll.u32 %v6073_v62, 16 }
 0x313   : > { %v3039_v28 = vrot.slane %v3037_v38, 5  ;;  %v3119_v34 = vrot.slane %v3118_v7, 4  ;;  %v4079_v25 = vrot.slane %v3239_v18, 9  ;;  %v4080_v31 = vrot.slane %v3240_v2, 9  ;;  %v4097_v2 = vld [vmem:[#allocation12] ss:$0 sm:$0xff] }
 0x314   : > { %v3123_v38 = vrot.slane %v3121_v12, 5  ;;  %v3109_v29 = vrot.slane %v3107_v1, 5  ;;  %v3269_v13 = vrot.slane %v6046_v33, 5  ;;  %v3277_v33 = vrot.slane %v6054_v59, 5 }
 0x315   : > { %v3040_v52 = vsel %vm5870_vm9, %v3035_v37, %v3039_v28 }
 0x316   : > { %v4069_v43 = vcombine.low %v3026_v47, %v3040_v52  ;;  %v3124_v35 = vsel %vm5870_vm9, %v3119_v34, %v3123_v38  ;;  %v3270_v41 = vsel %vm5918_vm12, %v4080_v31, %v3269_v13  ;;  %v3244_v47 = vld [vmem:[#allocation3 + $0x38] sm:$0xe]  ;;  %v3245_v52 = vld [vmem:[#allocation3 + $0x40] sm:$0xe] }
 0x317   : > { %v4084_v48 = vrot.slane %v3244_v47, 9  ;;  %v4704_v34 = vld [vmem:[#allocation13 + $0x38] sm:$0xff]  }
 0x318   : > { %4343 = vmatmul.mubr.msk.bf16.vlgmr.msra.gmra.mrb[4].mxu1 %vm1282_vm13, %v4050_v45  ;;  %v6056_v45 = vld [vmem:[#allocation3 + $0x24] sm:$0x1] }
 0x319   : > { %4351 = vmatpush3.bf16.msra.mxu1 %v4687_v16  ;;  %4346 = vmatprep.mubr.msk.bf16.mxu1 %vm1282_vm13, %v4051_v19  ;;  %v4691_v16 = vld [vmem:[#allocation3 + $0x20] ss:$8 sps:$4 sm:$0xff]   ;;  %v3101_v19 = vshll.u32 %v3009_v61, 16  ;;  %v3051_v21 = vshll.u32 %v6056_v45, 16  ;;  %v3265_v61 = vrot.slane %v6044_v4, 5  ;;  %v3273_v14 = vrot.slane %v6056_v45, 5 }
 0x31a   : > { %4352 = vmatprep.subr.bf16.mxu1 %v4688_v46  ;;  %v3243_v4 = vld [vmem:[#allocation3 + $0x30] sm:$0xe] }
 0x31b   : > { %v3103_v42 = vrot.slane %v3101_v19, 5  ;;  %v3053_v23 = vrot.slane %v3051_v21, 5  ;;  %v3266_v37 = vsel %vm5918_vm12, %v4079_v25, %v3265_v61  ;;  %v4082_v19 = vrot.slane %v3242_v39, 9 }
 0x31c   : > { %v4087_v3 = vcombine.low %v3266_v37, %v3270_v41  ;;  %v4083_v17 = vrot.slane %v3243_v4, 9 }
 0x31d   : > { %4353 = vmatpush3.bf16.msra.mxu1 %v4688_v46  ;;  %v6058_v46 = vld [vmem:[#allocation3 + $0x34] sm:$0x1]  ;;  %v3104_v50 = vor.u32 %v3103_v42, %v3100_v54  ;;  %v3278_v36 = vsel %vm5918_vm12, %v4082_v19, %v3277_v33 }
 0x31e   : > { %4362 = vmatprep.subr.bf16.mxu1 %v4690_v49  ;;  %v3281_v28 = vrot.slane %v6058_v46, 5 }
 0x31f   : > { %v3105_v24 = vrot.slane %v3104_v50, 4 }
 0x320   : > { %4347 = vmatmul.mubr.msk.bf16.gmra.mrb[8].mxu1 %vm1282_vm13, %v4052_v8  ;;  %v3079_v8 = vshll.u32 %v6058_v46, 16  ;;  %v3282_v59 = vsel %vm5918_vm12, %v4083_v17, %v3281_v28 }
 0x321   : > { %4354 = vmatprep.mubr.msk.bf16.mxu1 %vm1282_vm13, %v4689_v53  ;;  %v3063_v53 = vrot.slane %v3062_v10, 4  ;;  %v3110_v32 = vsel %vm5870_vm9, %v3105_v24, %v3109_v29  ;;  %v3241_v10 = vld [vmem:[#allocation3 + $0x20] sm:$0xe]  ;;  %v4703_v24 = vld [vmem:[#allocation13 + $0x30] sm:$0xff]  }
 0x322   : > { %v3081_v63 = vrot.slane %v3079_v8, 5  ;;  %v4081_v58 = vrot.slane %v3241_v10, 9 }
 0x323   : > { %v3068_v9 = vsel %vm5870_vm9, %v3063_v53, %v3067_v44  ;;  %v3293_v53 = vrot.slane %v6075_v60, 5 }
 0x324   : > { %v3082_v15 = vsel %vm5870_vm9, %v3077_v55, %v3081_v63  ;;  %v3274_v21 = vsel %vm5918_vm12, %v4081_v58, %v3273_v14 }
 0x325   : > { %v4088_v46 = vcombine.low %v3274_v21, %v3278_v36 }
 0x328   : > { %4355 = vmatmul.mubr.msk.bf16.vlgmr.msra.gmra.mrb[4].mxu1 %vm1282_vm13, %v4691_v16 }
 0x329   : > { %4363 = vmatpush3.bf16.msra.mxu1 %v4690_v49  ;;  %4358 = vmatprep.mubr.msk.bf16.mxu1 %vm1282_vm13, %v4692_v40  ;;  %v6063_v49 = vld [vmem:[#allocation3 + $0x3c] sm:$0x1]  ;;  %v4696_v40 = vld [vmem:[#allocation10 + $0x88] sm:$0xff]  }
 0x32a   : > { %4364 = vmatprep.subr.bf16.mxu1 %v4693_v6  ;;  %v3093_v56 = vshll.u32 %v6063_v49, 16  ;;  %v3285_v20 = vrot.slane %v6063_v49, 5  ;;  %v3289_v49 = vrot.slane %v6073_v62, 5 }
 0x32c   : > { %v3095_v16 = vrot.slane %v3093_v56, 5  ;;  %v3286_v8 = vsel %vm5918_vm12, %v4084_v48, %v3285_v20  ;;  %v4697_v56 = vld [vmem:[#allocation13] sm:$0xff]  }
 0x32d   : > { %4365 = vmatpush3.bf16.msra.mxu1 %v4693_v6  ;;  %v3054_v6 = vsel %vm5870_vm9, %v3049_v57, %v3053_v23  ;;  %v4089_v45 = vcombine.low %v3282_v59, %v3286_v8  ;;  %4386 = vmatprep.subr.bf16.mxu0 %v4697_v56  ;;  %v4698_v23 = vld [vmem:[#allocation13 + $0x8] sm:$0xff]  }
 0x32e   : > { %4374 = vmatprep.subr.bf16.mxu1 %v6052_v27  ;;  %v4070_v0 = vcombine.low %v3054_v6, %v3068_v9  ;;  %v3096_v26 = vsel %vm5870_vm9, %v3091_v5, %v3095_v16  ;;  %4387 = vmatpush3.bf16.msra.mxu0 %v4697_v56  ;;  %v4699_v9 = vld [vmem:[#allocation13 + $0x10] sm:$0xff]  }
 0x32f   : > { %v4071_v22 = vcombine.low %v3082_v15, %v3096_v26  ;;  %4388 = vmatprep.subr.bf16.mxu0 %v4698_v23  ;;  %v4701_v26 = vld [vmem:[#allocation13 + $0x20] sm:$0xff]  }
 0x330   : > { %4359 = vmatmul.mubr.msk.bf16.gmra.mrb[8].mxu1 %vm1282_vm13, %v4694_v51  ;;  %v3246_v51 = vld [vmem:[#allocation3 + $0x48] sm:$0xe] }
 0x331   : > { %4366 = vmatprep.mubr.msk.bf16.mxu1 %vm1282_vm13, %v4069_v43  ;;  %v4086_v30 = vrot.slane %v3246_v51, 9  ;;  %v4085_v43 = vrot.slane %v3245_v52, 9 }
 0x332   : > { %4389 = vmatpush3.bf16.msra.mxu0 %v4698_v23 }
 0x333   : > { %v3290_v54 = vsel %vm5918_vm12, %v4085_v43, %v3289_v49  ;;  %v3294_v42 = vsel %vm5918_vm12, %v4086_v30, %v3293_v53  ;;  %4390 = vmatprep.subr.bf16.mxu0 %v4699_v9 }
 0x334   : > { %v4090_v55 = vcombine.low %v3290_v54, %v3294_v42 }
 0x336   : > { %4391 = vmatpush3.bf16.msra.mxu0 %v4699_v9 }
 0x337   : > { %4392 = vmatprep.subr.bf16.mxu0 %v4700_v11 }
 0x338   : > { %4367 = vmatmul.mubr.msk.bf16.vlgmr.msra.gmra.mrb[4].mxu1 %vm1282_vm13, %v4070_v0 }
 0x339   : > { %4375 = vmatpush3.bf16.msra.mxu1 %v6052_v27  ;;  %4370 = vmatprep.mubr.msk.bf16.mxu1 %vm1282_vm13, %v4071_v22  ;;  %v4072_v27 = vcombine.low %v3110_v32, %v3124_v35  ;;  %v4702_v22 = vld [vmem:[#allocation13 + $0x28] sm:$0xff]  }
 0x33a   : > { %4376 = vmatprep.subr.bf16.mxu1 %v4696_v40  ;;  %4393 = vmatpush3.bf16.msra.mxu0 %v4700_v11 }
 0x33b   : > { %4394 = vmatprep.subr.bf16.mxu0 %v4701_v26 }
 0x33d   : > { %4377 = vmatpush3.bf16.msra.mxu1 %v4696_v40 }
 0x33e   : > { %4395 = vmatpush3.bf16.msra.mxu0 %v4701_v26 }
 0x33f   : > { %4396 = vmatprep.subr.bf16.mxu0 %v4702_v22 }
 0x340   : > { %4371 = vmatmul.mubr.msk.bf16.gmra.mrb[8].mxu1 %vm1282_vm13, %v4072_v27 }
 0x341   : > { %4378 = vmatprep.mubr.msk.bf16.mxu1 %vm1282_vm13, %v4087_v3 }
 0x342   : > { %4397 = vmatpush3.bf16.msra.mxu0 %v4702_v22 }
 0x343   : > { %4398 = vmatprep.subr.bf16.mxu0 %v4703_v24 }
 0x346   : > { %4399 = vmatpush3.bf16.msra.mxu0 %v4703_v24 }
 0x347   : > { %4400 = vmatprep.subr.bf16.mxu0 %v4704_v34 }
 0x348   : > { %4379 = vmatmul.mubr.msk.bf16.vlgmr.msra.gmra.mrb[4].mxu1 %vm1282_vm13, %v4088_v46 }
 0x349   : > { %4382 = vmatprep.mubr.msk.bf16.mxu1 %vm1282_vm13, %v4089_v45 }
 0x34a   : > { %4401 = vmatpush3.bf16.msra.mxu0 %v4704_v34 }
 0x350   : > { %4383 = vmatmul.mubr.msk.bf16.gmra.mrb[8].mxu1 %vm1282_vm13, %v4090_v55 }
 0x3c2   : > { %v4308_v57 = vpop.f32.mrb[8].mxu0 }
 0x3c3   : > { %v4288_v44 = vpop.f32.mrb[0].mxu1  ;;  %v2285_v63 = vpop.f32.mrb[9].mxu0 }
 0x3c4   : > { %v2027_v5 = vpop.f32.mrb[1].mxu1  ;;  %v4309_v62 = vpop.f32.mrb[10].mxu0 }
 0x3c5   : > { %v4289_v60 = vpop.f32.mrb[2].mxu1  ;;  %v2288_v7 = vpop.f32.mrb[11].mxu0 }
 0x3c6   : > { %v2030_v50 = vpop.f32.mrb[3].mxu1 }
 0x3ca   : > { %v4312_v12 = vpop.f32.mrb[12].mxu0 }
 0x3cb   : > { %v4418_v15 = vadd.f32 %v4312_v12, %v4288_v44  ;;  %v2301_v16 = vpop.f32.mrb[13].mxu0 }
 0x3cc   : > { %v4420_v6 = vadd.f32 %v2301_v16, %v2027_v5  ;;  %v4313_v1 = vpop.f32.mrb[14].mxu0 }
 0x3cd   : > { %v4422_v18 = vadd.f32 %v4313_v1, %v4289_v60  ;;  %v2304_v0 = vpop.f32.mrb[15].mxu0 }
 0x3ce   : > { %v4424_v40 = vadd.f32 %v2304_v0, %v2030_v50 }
 0x41b   : > { %v4380_v38 = vpop.f32.mrb[4].mxu1 }
 0x41c   : > { %v4414_v25 = vadd.f32 %v4380_v38, %v4308_v57  ;;  %v3370_v61 = vpop.f32.mrb[5].mxu1 }
 0x41d   : > { %v4415_v29 = vadd.f32 %v3370_v61, %v2285_v63  ;;  %v4381_v31 = vpop.f32.mrb[6].mxu1 }
 0x41e   : > { %v6123_v13 = vadd.f32 %v4414_v25, %v4097_v2  ;;  %v4416_v32 = vadd.f32 %v4381_v31, %v4309_v62  ;;  %v3373_v35 = vpop.f32.mrb[7].mxu1  ;;  %v4106_v31 = vld [vmem:[#allocation15] ss:$0 sm:$0xff] }
 0x41f   : > { %v3416_v37 = vadd.f32 %v4415_v29, %v4097_v2  ;;  %v4417_v39 = vadd.f32 %v3373_v35, %v2288_v7 }
 0x420   : > { %v4100_v4 = vmul.f32 -1.442695, %v6123_v13  ;;  %v3419_v27 = vadd.f32 %v4416_v32, %v4097_v2 }
 0x421   : > { %v4098_v41 = vmul.f32 -1.442695, %v3416_v37  ;;  %v3417_v10 = vadd.f32 %v4417_v39, %v4097_v2 }
 0x422   : > { %4737 = vpow2.f32 %v4100_v4  ;;  %v4101_v3 = vmul.f32 -1.442695, %v3419_v27 }
 0x423   : > { %4739 = vpow2.f32 %v4098_v41  ;;  %v4099_v19 = vmul.f32 -1.442695, %v3417_v10  ;;  %v4384_v33 = vpop.f32.mrb[8].mxu1 }
 0x424   : > { %4741 = vpow2.f32 %v4101_v3  ;;  %v4419_v47 = vadd.f32 %v4418_v15, %v4384_v33  ;;  %v3386_v17 = vpop.f32.mrb[9].mxu1 }
 0x425   : > { %4743 = vpow2.f32 %v4099_v19  ;;  %v4421_v28 = vadd.f32 %v4420_v6, %v3386_v17  ;;  %v4385_v58 = vpop.f32.mrb[10].mxu1 }
 0x426   : > { %v3422_v14 = vadd.f32 %v4419_v47, %v4097_v2  ;;  %v4423_v48 = vadd.f32 %v4422_v18, %v4385_v58  ;;  %v3389_v20 = vpop.f32.mrb[11].mxu1 }
 0x427   : > { %v3420_v36 = vadd.f32 %v4421_v28, %v4097_v2  ;;  %v4425_v51 = vadd.f32 %v4424_v40, %v3389_v20 }
 0x428   : > { %v4104_v59 = vmul.f32 -1.442695, %v3422_v14  ;;  %v3423_v52 = vadd.f32 %v4423_v48, %v4097_v2 }
 0x429   : > { %v4102_v21 = vmul.f32 -1.442695, %v3420_v36  ;;  %v3421_v46 = vadd.f32 %v4425_v51, %v4097_v2 }
 0x42a   : > { %4745 = vpow2.f32 %v4104_v59  ;;  %v4105_v8 = vmul.f32 -1.442695, %v3423_v52 }
 0x42b   : > { %4747 = vpow2.f32 %v4102_v21  ;;  %v4103_v30 = vmul.f32 -1.442695, %v3421_v46 }
 0x42c   : > { %v4738_v45 = vpop.eup %4737  ;;  %4749 = vpow2.f32 %v4105_v8 }
 0x42d   : > { %v4740_v43 = vpop.eup %4739  ;;  %v3450_v49 = vadd.f32 1.0, %v4738_v45  ;;  %4751 = vpow2.f32 %v4103_v30 }
 0x42e   : > { %v4742_v53 = vpop.eup %4741  ;;  %v3448_v54 = vadd.f32 1.0, %v4740_v43 }
 0x42f   : > { %v4744_v42 = vpop.eup %4743  ;;  %4753 = vrcp.f32 %v3450_v49  ;;  %v3451_v55 = vadd.f32 1.0, %v4742_v53 }
 0x430   : > { %4755 = vrcp.f32 %v3448_v54  ;;  %v3449_v56 = vadd.f32 1.0, %v4744_v42 }
 0x431   : > { %4757 = vrcp.f32 %v3451_v55 }
 0x432   : > { %4759 = vrcp.f32 %v3449_v56 }
 0x434   : > { %v4746_v57 = vpop.eup %4745 }
 0x435   : > { %v4748_v44 = vpop.eup %4747  ;;  %v3454_v63 = vadd.f32 1.0, %v4746_v57 }
 0x436   : > { %v4750_v5 = vpop.eup %4749  ;;  %v3452_v62 = vadd.f32 1.0, %v4748_v44 }
 0x437   : > { %v4752_v60 = vpop.eup %4751  ;;  %4761 = vrcp.f32 %v3454_v63  ;;  %v3455_v7 = vadd.f32 1.0, %v4750_v5 }
 0x438   : > { %4763 = vrcp.f32 %v3452_v62  ;;  %v3453_v23 = vadd.f32 1.0, %v4752_v60 }
 0x439   : > { %v4754_v9 = vpop.eup %4753  ;;  %4765 = vrcp.f32 %v3455_v7 }
 0x43a   : > { %v4756_v50 = vpop.eup %4755  ;;  %4767 = vrcp.f32 %v3453_v23  ;;  %v3474_v15 = vmul.f32 %v4754_v9, %v6123_v13 }
 0x43b   : > { %v4758_v11 = vpop.eup %4757  ;;  %v3472_v6 = vmul.f32 %v4756_v50, %v3416_v37 }
 0x43c   : > { %v4760_v12 = vpop.eup %4759  ;;  %v3475_v16 = vmul.f32 %v4758_v11, %v3419_v27 }
 0x43d   : > { %v3473_v1 = vmul.f32 %v4760_v12, %v3417_v10 }
 0x43e   : > { %v3481_v18 = vpack.c.bf16 %v3475_v16, %v3474_v15 }
 0x43f   : > { %v3480_v0 = vpack.c.bf16 %v3473_v1, %v3472_v6 }
 0x441   : > { %v4762_v26 = vpop.eup %4761  ;;  %4402 = vmatprep.mubr.bf16.mxu0 %v3480_v0 }
 0x442   : > { %v4764_v40 = vpop.eup %4763  ;;  %4403 = vmatmul.mubr.bf16.vlgmr.msra.gmra.mrb[16].mxu0 %v3481_v18  ;;  %v3478_v34 = vmul.f32 %v4762_v26, %v3422_v14 }
 0x443   : > { %v4766_v22 = vpop.eup %4765  ;;  %v3476_v2 = vmul.f32 %v4764_v40, %v3420_v36 }
 0x444   : > { %v4768_v24 = vpop.eup %4767  ;;  %v3479_v38 = vmul.f32 %v4766_v22, %v3423_v52 }
 0x445   : > { %v3477_v25 = vmul.f32 %v4768_v24, %v3421_v46 }
 0x446   : > { %v3483_v61 = vpack.c.bf16 %v3479_v38, %v3478_v34 }
 0x447   : > { %v3482_v29 = vpack.c.bf16 %v3477_v25, %v3476_v2 }
 0x449   : > { %4406 = vmatprep.mubr.bf16.mxu0 %v3482_v29 }
 0x44a   : > { %4407 = vmatmul.mubr.bf16.gmra.mrb[20].mxu0 %v3483_v61 }
 0x515   : > { %v4404_v13 = vpop.f32.mrb[16].mxu0 }
 0x516   : > { %v3598_v32 = vadd.f32 %v4404_v13, %v4106_v31  ;;  %v3589_v35 = vpop.f32.mrb[17].mxu0 }
 0x517   : > { %v3590_v37 = vadd.f32 %v4106_v31, %v3589_v35  ;;  %v4405_v39 = vpop.f32.mrb[18].mxu0 }
 0x518   : > { %v4117_v4 = vmul.f32 -1.442695, %v3598_v32  ;;  %v3601_v27 = vadd.f32 %v4405_v39, %v4106_v31  ;;  %v3592_v41 = vpop.f32.mrb[19].mxu0 }
 0x519   : > { %v4115_v10 = vmul.f32 -1.442695, %v3590_v37  ;;  %v3593_v3 = vadd.f32 %v4106_v31, %v3592_v41 }
 0x51a   : > { %4769 = vpow2.f32 %v4117_v4  ;;  %v4118_v19 = vmul.f32 -1.442695, %v3601_v27 }
 0x51b   : > { %4771 = vpow2.f32 %v4115_v10  ;;  %v4116_v33 = vmul.f32 -1.442695, %v3593_v3 }
 0x51c   : > { %4773 = vpow2.f32 %v4118_v19 }
 0x51d   : > { %4775 = vpow2.f32 %v4116_v33  ;;  %v4408_v47 = vpop.f32.mrb[20].mxu0 }
 0x51e   : > { %v3614_v17 = vadd.f32 %v4408_v47, %v4106_v31  ;;  %v3605_v28 = vpop.f32.mrb[21].mxu0 }
 0x51f   : > { %v3606_v58 = vadd.f32 %v4106_v31, %v3605_v28  ;;  %v4409_v14 = vpop.f32.mrb[22].mxu0 }
 0x520   : > { %v4121_v48 = vmul.f32 -1.442695, %v3614_v17  ;;  %v3617_v20 = vadd.f32 %v4409_v14, %v4106_v31  ;;  %v3608_v36 = vpop.f32.mrb[23].mxu0 }
 0x521   : > { %v4119_v51 = vmul.f32 -1.442695, %v3606_v58  ;;  %v3609_v59 = vadd.f32 %v4106_v31, %v3608_v36 }
 0x522   : > { %4777 = vpow2.f32 %v4121_v48  ;;  %v4122_v52 = vmul.f32 -1.442695, %v3617_v20 }
 0x523   : > { %4779 = vpow2.f32 %v4119_v51  ;;  %v4120_v21 = vmul.f32 -1.442695, %v3609_v59 }
 0x524   : > { %v4770_v46 = vpop.eup %4769  ;;  %4781 = vpow2.f32 %v4122_v52 }
 0x525   : > { %v4772_v8 = vpop.eup %4771  ;;  %v3646_v30 = vadd.f32 1.0, %v4770_v46  ;;  %4783 = vpow2.f32 %v4120_v21 }
 0x526   : > { %v4774_v45 = vpop.eup %4773  ;;  %v3644_v43 = vadd.f32 1.0, %v4772_v8 }
 0x527   : > { %v4776_v49 = vpop.eup %4775  ;;  %4785 = vrcp.f32 %v3646_v30  ;;  %v3647_v53 = vadd.f32 1.0, %v4774_v45 }
 0x528   : > { %4787 = vrcp.f32 %v3644_v43  ;;  %v3645_v54 = vadd.f32 1.0, %v4776_v49 }
 0x529   : > { %4789 = vrcp.f32 %v3647_v53 }
 0x52a   : > { %4791 = vrcp.f32 %v3645_v54 }
 0x52c   : > { %v4778_v42 = vpop.eup %4777 }
 0x52d   : > { %v4780_v55 = vpop.eup %4779  ;;  %v3650_v56 = vadd.f32 1.0, %v4778_v42 }
 0x52e   : > { %v4782_v57 = vpop.eup %4781  ;;  %v3648_v44 = vadd.f32 1.0, %v4780_v55 }
 0x52f   : > { %v4784_v63 = vpop.eup %4783  ;;  %4793 = vrcp.f32 %v3650_v56  ;;  %v3651_v5 = vadd.f32 1.0, %v4782_v57 }
 0x530   : > { %4795 = vrcp.f32 %v3648_v44  ;;  %v3649_v62 = vadd.f32 1.0, %v4784_v63 }
 0x531   : > { %v4786_v60 = vpop.eup %4785  ;;  %4797 = vrcp.f32 %v3651_v5 }
 0x532   : > { %v4788_v7 = vpop.eup %4787  ;;  %4799 = vrcp.f32 %v3649_v62  ;;  %v3670_v50 = vmul.f32 %v4786_v60, %v3598_v32 }
 0x533   : > { %v4790_v23 = vpop.eup %4789  ;;  %v3668_v12 = vmul.f32 %v4788_v7, %v3590_v37 }
 0x534   : > { %v4792_v9 = vpop.eup %4791  ;;  %v3671_v11 = vmul.f32 %v4790_v23, %v3601_v27 }
 0x535   : > { %v3669_v15 = vmul.f32 %v4792_v9, %v3593_v3 }
 0x536   : > { %v4170_v16 = vpack.c.bf16 %v3671_v11, %v3670_v50 }
 0x537   : > { %v4165_v6 = vpack.c.bf16 %v3669_v15, %v3668_v12 }
 0x538   : > { %4182 = vst [vmem:[%s377_s29 + $0x8] sm:$0xff] %v4170_v16  }
 0x539   : > { %v4794_v1 = vpop.eup %4793  ;;  %4166 = vst [vmem:[%s377_s29] sm:$0xff] %v4165_v6  }
 0x53a   : > { %v4796_v18 = vpop.eup %4795  ;;  %v3674_v40 = vmul.f32 %v4794_v1, %v3614_v17 }
 0x53b   : > { %v4798_v0 = vpop.eup %4797  ;;  %v3672_v24 = vmul.f32 %v4796_v18, %v3606_v58 }
 0x53c   : > { %v4800_v26 = vpop.eup %4799  ;;  %v3675_v22 = vmul.f32 %v4798_v0, %v3617_v20 }
 0x53d   : > { %v3673_v34 = vmul.f32 %v4800_v26, %v3609_v59 }
 0x53e   : > { %v4180_v38 = vpack.c.bf16 %v3675_v22, %v3674_v40 }
 0x53f   : > { %v4175_v2 = vpack.c.bf16 %v3673_v34, %v3672_v24 }
 0x540   : > { %4184 = vst [vmem:[%s377_s29 + $0x18] sm:$0xff] %v4180_v38  }
 0x541   : > { %4183 = vst [vmem:[%s377_s29 + $0x10] sm:$0xff] %v4175_v2  }
 0x542   : > { %5013 = shalt.err (!%p5010_p8)
}
 0x543   : > { %s5014_s16 = scalar_lea.hbm %s6134_s28, 512  ;;  %s5018_s22 = scalar_lea.hbm %s6187_s7, 1024 }
 0x544   : > { %p5015_p4 = scmp.ne.s32.totalorder %s6134_s28, %s5014_s16  ;;  %p5019_p0 = scmp.lt.u32.totalorder %s6134_s28, %s6187_s7 }
 0x545   : > { %p5020_p5 = scmp.lt.u32.totalorder %s5018_s22, %s5014_s16  ;;  %p5022_p6 = scmp.lt.u32.totalorder %s5014_s16, %s6134_s28 }
 0x546   : > { %p5016_p10 = pnand %p5015_p4, %p6223_p9 }
 0x547   : > { %p5021_p7 = por %p5020_p5, %p5019_p0 }
 0x548   : > { %p5017_p11 = pneg %p5016_p10 }
 0x549   : > { %p5023_p12 = por %p5022_p6, %p5021_p7 }
 0x54b   : > { %p5024_p13 = pnand %p5023_p12, %p5017_p11 }
 0x54d   : > { %5027 = shalt.err (!%p5024_p13)
}
 0x54e   : > { %s5101_s9 = smov 4  }
 0x54f   : > { %4505 = dma.vmem_to_hbm [thread:$0]  (%p6223_p9), %s6129_s14, 512, %s6134_s28, %s3717_s20, %s5099_s17, %s5099_s17, %s5101_s9  }
 0x550 PF: > { %s3745_s30 = sand.u32 1, %s5066_s24   ;;  %p6224_p1 = scmp.ne.s32.totalorder %s6198_s15, 0 }
 0x551   : > { %p6225_p3 = scmp.ge.s32.totalorder %s5078_s27, 2  ;;  %s3746_s19 = scalar_lea.sflag [#allocation6], %s3745_s30 }
 0x553   : > { %p4531_p2 = pnand %p6225_p3, %p6224_p1 }
 0x555   : > { %5061 = dma.done.wait (!%p4531_p2), %s3746_s19, 512  }
 0x556   : > { %5063 = vsyncadd (!%p4531_p2), %s3746_s19, 4294966784  ;;  %p23_p8 = scmp.ge.s32.totalorder %s5327_s11, 4   ;;  %s6226_s24 = smov %s5070_s25 }
 0x557   : > { %s6227_s25 = smov %s5074_s26  ;;  %s6228_s26 = smov %s5338_s23 }
 0x558   : > { %s6229_s27 = smov %s5327_s11  ;;  %25 = sbr.rel (!%p23_p8) target bundleno = 8 (0x8), region = 131 }
 0x55f   :  { %3751 = vsyncpa [#allocation5], 1 }
 0x560   :  { %3753 = vsyncpa [#allocation5 + $0x1], 1 }
 0x561   :  { %3754 = vsyncpa [#allocation8], 1 }
 0x562   :  { %3755 = vsyncpa [#allocation11], 1 }
 0x563   :  { %3756 = vsyncpa [#allocation14], 1 }
 0x564   :  { %3757 = vsyncpa [#allocation6], 1 }
 0x565   :  { %3759 = vsyncpa [#allocation6 + $0x1], 1 }

</bundles_post_ra>
